<compile_context>
chip_gen: v6e
topology: v6e:2x2x1
jax: 0.10.0
libtpu: 0.0.40
codegen_flags: <defaults>
</compile_context>

<pallas_src>
import functools

import jax
import jax.numpy as jnp
import numpy as np
from jax import lax
from jax.experimental import pallas as pl
from jax.experimental.pallas import tpu as pltpu


def _round_up(x, m):
    return ((x + m - 1) // m) * m


# ----------------------------------------------------------------------------
# Fused forward kernel: MLP + LSTM-over-time + lane-dense policy/value head.
# ----------------------------------------------------------------------------
def fused_forward_kernel(obs_ref, act_ref, rew_ref, h0_ref, c0_ref,
                         w1_ref, b1_ref, w2_ref, b2_ref,
                         wihx_ref, wiha_ref, wihr_ref, blstm_ref, whh_ref,
                         whead_ref, bhead_ref,
                         head_ref, hn_ref, cn_ref,
                         gates_in_sc, lstm_out_sc,
                         *, n_actions):
    # ----- MLP over all T*Bp rows (two batched MXU passes) -----
    x = obs_ref[...]                                                    # (TBp, F)
    h1 = jnp.dot(x, w1_ref[...], preferred_element_type=jnp.float32) + b1_ref[...]
    h1 = jnp.maximum(h1, 0.0)
    mlp_out = jnp.dot(h1, w2_ref[...], preferred_element_type=jnp.float32) + b2_ref[...]
    mlp_out = jnp.maximum(mlp_out, 0.0)                                 # (TBp, H2)

    # ----- LSTM input projection hoisted out of the time loop -----
    # lstm_in = [mlp_out, prev_action, prev_reward]; W_ih is pre-split so the
    # concat never materializes, and gate-padded so each gate owns Gp lanes.
    gates_in_sc[...] = (
        jnp.dot(mlp_out, wihx_ref[...], preferred_element_type=jnp.float32)
        + jnp.dot(act_ref[...], wiha_ref[...], preferred_element_type=jnp.float32)
        + rew_ref[...] * wihr_ref[...]
        + blstm_ref[...])                                               # (TBp, 4*Gp)

    # ----- recurrence: per step only h @ W_hh + vreg-aligned gate math -----
    Bp, Gp = h0_ref.shape
    T = gates_in_sc.shape[0] // Bp
    w_hh = whh_ref[...]

    def step(t, carry):
        h, c = carry
        row = pl.multiple_of(t * Bp, 8)                 # Bp is a multiple of 8
        gates = gates_in_sc[pl.ds(row, Bp), :] + jnp.dot(
            h, w_hh, preferred_element_type=jnp.float32)               # (Bp, 4*Gp)
        # Gate slices fall on 128-lane vreg boundaries -> no XLU shuffles.
        i_g = jax.nn.sigmoid(gates[:, 0 * Gp:1 * Gp])
        f_g = jax.nn.sigmoid(gates[:, 1 * Gp:2 * Gp])
        g_g = jnp.tanh(gates[:, 2 * Gp:3 * Gp])
        o_g = jax.nn.sigmoid(gates[:, 3 * Gp:4 * Gp])
        c_new = f_g * c + i_g * g_g
        h_new = o_g * jnp.tanh(c_new)
        lstm_out_sc[pl.ds(row, Bp), :] = h_new          # full-width unmasked store
        return (h_new, c_new)

    h_fin, c_fin = lax.fori_loop(0, T, step, (h0_ref[...], c0_ref[...]),
                                 unroll=min(T, 8))
    hn_ref[...] = h_fin
    cn_ref[...] = c_fin

    # ----- fused lane-dense policy + value head: [pi | v | 0 pad] -----
    head = (jnp.dot(lstm_out_sc[...], whead_ref[...],
                    preferred_element_type=jnp.float32) + bhead_ref[...])  # (TBp, Cp)
    col = lax.broadcasted_iota(jnp.int32, head.shape, 1)
    logits = jnp.where(col < n_actions, head, -1e30)    # mask pad + value columns
    m = jnp.max(logits, axis=-1, keepdims=True)
    e = jnp.exp(logits - m)
    denom = jnp.sum(e, axis=-1, keepdims=True)
    probs = e * pl.reciprocal(denom, approx=True)
    # column n_actions carries the value; pi columns carry softmax; pad stays 0.
    head_ref[...] = jnp.where(col == n_actions, head, probs)


# ----------------------------------------------------------------------------
# Full forward (wrapper: padding, weight split/fuse, VMEM budget, un-pad)
# ----------------------------------------------------------------------------
@jax.jit
def cwto_lstm_forward(params, observation, prev_action, prev_reward, init_rnn_state):
    T, B = observation.shape[0], observation.shape[1]
    A = params["w_pi"].shape[1]
    H = params["w_hh"].shape[0]
    H1 = params["w1"].shape[1]
    H2 = params["w2"].shape[1]

    Bp = _round_up(max(B, 8), 8)        # sublane-aligned batch
    Gp = _round_up(H, 128)              # per-gate lane width (vreg aligned)
    Cp = _round_up(A + 1, 128)          # lane-dense head output width

    def pad_to(a, shape):
        pads = [(0, s - d) for d, s in zip(a.shape, shape)]
        return jnp.pad(a, pads) if any(p[1] for p in pads) else a

    # --- flatten + batch-pad the time-major inputs ---
    obs = observation.astype(jnp.float32).reshape(T, B, -1)
    F_in = obs.shape[-1]
    obs = pad_to(obs, (T, Bp, F_in)).reshape(T * Bp, F_in)
    act = prev_action.astype(jnp.float32).reshape(T, B, -1)
    act = pad_to(act, (T, Bp, act.shape[-1])).reshape(T * Bp, -1)
    rew = prev_reward.astype(jnp.float32).reshape(T, B, 1)
    rew = pad_to(rew, (T, Bp, 1)).reshape(T * Bp, 1)

    h0, c0 = init_rnn_state                      # each (1, B, H) like torch LSTM state
    h0 = pad_to(h0[0].astype(jnp.float32), (Bp, Gp))
    c0 = pad_to(c0[0].astype(jnp.float32), (Bp, Gp))

    # --- gate-pad LSTM weights so every per-gate slice is a full 128-lane vreg ---
    def pad_gates(w):                    # (..., 4*H) -> (..., 4*Gp), zero-padded gates
        lead = w.shape[:-1]
        w4 = w.reshape(lead + (4, H))
        w4 = jnp.pad(w4, [(0, 0)] * len(lead) + [(0, 0), (0, Gp - H)])
        return w4.reshape(lead + (4 * Gp,))

    w_ih = pad_gates(params["w_ih"])                             # (H2+A+1, 4*Gp)
    wihx, wiha, wihr = w_ih[:H2], w_ih[H2:H2 + A], w_ih[H2 + A:]
    w_hh = pad_to(pad_gates(params["w_hh"]), (Gp, 4 * Gp))       # (Gp, 4*Gp)
    b_lstm = pad_gates(params["b_lstm"])                         # (1, 4*Gp)

    # --- fused, lane-dense head weights: cols [0:A]=pi, [A]=v, rest 0 ---
    w_head = pad_to(jnp.concatenate([params["w_pi"], params["w_v"]], axis=1), (Gp, Cp))
    b_head = pad_to(jnp.concatenate([params["b_pi"], params["b_v"]], axis=1), (1, Cp))

    # --- explicit VMEM budget (v7x: 64 MiB physical, 32 MiB scoped default) ---
    def nbytes(*shapes):
        return sum(int(np.prod(s)) * 4 for s in shapes)
    vmem_needed = nbytes(
        (T * Bp, F_in), (T * Bp, A), (T * Bp, 1), (Bp, Gp), (Bp, Gp),      # inputs
        (F_in, H1), (1, H1), (H1, H2), (1, H2),                            # mlp weights
        (H2, 4 * Gp), (A, 4 * Gp), (1, 4 * Gp), (1, 4 * Gp), (Gp, 4 * Gp),  # lstm weights
        (Gp, Cp), (1, Cp),                                                 # head weights
        (T * Bp, Cp), (Bp, Gp), (Bp, Gp),                                  # outputs
        (T * Bp, 4 * Gp), (T * Bp, Gp),                                    # scratch
    )
    vmem_limit = int(min(64 * 1024 * 1024, 2 * vmem_needed + 4 * 1024 * 1024))

    out_head, hn_p, cn_p = pl.pallas_call(
        functools.partial(fused_forward_kernel, n_actions=A),
        out_shape=(
            jax.ShapeDtypeStruct((T * Bp, Cp), jnp.float32),   # [pi | v | pad]
            jax.ShapeDtypeStruct((Bp, Gp), jnp.float32),       # hn (lane-padded)
            jax.ShapeDtypeStruct((Bp, Gp), jnp.float32),       # cn (lane-padded)
        ),
        scratch_shapes=[
            pltpu.VMEM((T * Bp, 4 * Gp), jnp.float32),   # input-projected gates, all T
            pltpu.VMEM((T * Bp, Gp), jnp.float32),       # lstm_out for the heads
        ],
        compiler_params=pltpu.CompilerParams(vmem_limit_bytes=vmem_limit),
    )(obs, act, rew, h0, c0,
      params["w1"], params["b1"], params["w2"], params["b2"],
      wihx, wiha, wihr, b_lstm, w_hh, w_head, b_head)

    # restore_leading_dims with lead_dim=2 -> (T, B, ...), drop padding.
    pi = out_head[:, :A].reshape(T, Bp, A)[:, :B]
    v = out_head[:, A].reshape(T, Bp)[:, :B]
    next_rnn_state = (hn_p[:B, :H][None], cn_p[:B, :H][None])   # RnnState(h, c), (1,B,H)
    return pi, v, next_rnn_state


# ----------------------------------------------------------------------------
# Pure-JAX reference (sanity check of the Pallas kernel)
# ----------------------------------------------------------------------------
def reference_forward(params, observation, prev_action, prev_reward, init_rnn_state):
    T, B = observation.shape[0], observation.shape[1]
    x = observation.reshape(T * B, -1).astype(jnp.float32)
    h1 = jnp.maximum(x @ params["w1"] + params["b1"], 0.0)
    h2 = jnp.maximum(h1 @ params["w2"] + params["b2"], 0.0)
    lstm_in = jnp.concatenate(
        [h2.reshape(T, B, -1),
         prev_action.reshape(T, B, -1).astype(jnp.float32),
         prev_reward.reshape(T, B, 1).astype(jnp.float32)], axis=2)

    H = params["w_hh"].shape[0]
    h0, c0 = init_rnn_state

    def step(carry, x_t):
        h, c = carry
        gates = x_t @ params["w_ih"] + h @ params["w_hh"] + params["b_lstm"][0]
        i = jax.nn.sigmoid(gates[:, 0 * H:1 * H])
        f = jax.nn.sigmoid(gates[:, 1 * H:2 * H])
        g = jnp.tanh(gates[:, 2 * H:3 * H])
        o = jax.nn.sigmoid(gates[:, 3 * H:4 * H])
        c = f * c + i * g
        h = o * jnp.tanh(c)
        return (h, c), h

    (hn, cn), outs = lax.scan(step, (h0[0], c0[0]), lstm_in)
    flat = outs.reshape(T * B, -1)
    logits = flat @ params["w_pi"] + params["b_pi"]
    pi = jax.nn.softmax(logits, axis=-1).reshape(T, B, -1)
    v = (flat @ params["w_v"] + params["b_v"]).reshape(T, B)
    return pi, v, (hn[None], cn[None])


# ----------------------------------------------------------------------------
if __name__ == "__main__":
    # Small shapes consistent with the module's forward:
    #   observation_shape = (4, 16) -> mlp_input_size = 64
    #   hidden_sizes = [32, 32], lstm_size = 32, output_size (A) = 4, T=8, B=2
    T, B = 8, 2
    obs_shape = (4, 16)
    F_in = int(np.prod(obs_shape))
    H1, H2 = 32, 32
    LSTM_H = 32
    A = 4
    D_in = H2 + A + 1   # mlp_out + prev_action + prev_reward

    key = jax.random.PRNGKey(0)
    ks = jax.random.split(key, 16)

    def init(k, shape, scale=0.1):
        return scale * jax.random.normal(k, shape, dtype=jnp.float32)

    params = {
        # MLP (Linear weights stored transposed: (in, out))
        "w1": init(ks[0], (F_in, H1)),
        "b1": init(ks[1], (1, H1)),
        "w2": init(ks[2], (H1, H2)),
        "b2": init(ks[3], (1, H2)),
        # LSTM: packed gate order [i, f, g, o]; b_lstm = b_ih + b_hh pre-summed
        "w_ih": init(ks[4], (D_in, 4 * LSTM_H)),
        "w_hh": init(ks[5], (LSTM_H, 4 * LSTM_H)),
        "b_lstm": init(ks[6], (1, 4 * LSTM_H)),
        # heads
        "w_pi": init(ks[7], (LSTM_H, A)),
        "b_pi": init(ks[8], (1, A)),
        "w_v": init(ks[9], (LSTM_H, 1)),
        "b_v": init(ks[10], (1, 1)),
    }

    observation = jax.random.normal(ks[11], (T, B) + obs_shape, dtype=jnp.float32)
    prev_action = jax.random.normal(ks[12], (T, B, A), dtype=jnp.float32)
    prev_reward = jax.random.normal(ks[13], (T, B), dtype=jnp.float32)
    h0 = init(ks[14], (1, B, LSTM_H), scale=0.5)
    c0 = init(ks[15], (1, B, LSTM_H), scale=0.5)
    init_rnn_state = (h0, c0)

    pi, v, (hn, cn) = cwto_lstm_forward(params, observation, prev_action,
                                        prev_reward, init_rnn_state)
    jax.block_until_ready((pi, v, hn, cn))

    # sanity check against a pure-JAX reference
    pi_r, v_r, (hn_r, cn_r) = reference_forward(params, observation, prev_action,
                                                prev_reward, init_rnn_state)
    np.testing.assert_allclose(np.asarray(pi), np.asarray(pi_r), rtol=1e-3, atol=1e-3)
    np.testing.assert_allclose(np.asarray(v), np.asarray(v_r), rtol=1e-3, atol=1e-3)
    np.testing.assert_allclose(np.asarray(hn), np.asarray(hn_r), rtol=1e-3, atol=1e-3)
    np.testing.assert_allclose(np.asarray(cn), np.asarray(cn_r), rtol=1e-3, atol=1e-3)

    assert pi.shape == (T, B, A) and v.shape == (T, B)
    assert hn.shape == (1, B, LSTM_H) and cn.shape == (1, B, LSTM_H)

    print("KERNEL_OK")
</pallas_src>

<mosaic_0001>
module attributes {stable_mosaic.version = 11 : i64} {
  func.func @fused_forward_kernel(%arg0: memref<64x64xf32, #tpu.memory_space<vmem>>, %arg1: memref<64x4xf32, #tpu.memory_space<vmem>>, %arg2: memref<64x1xf32, #tpu.memory_space<vmem>>, %arg3: memref<8x128xf32, #tpu.memory_space<vmem>>, %arg4: memref<8x128xf32, #tpu.memory_space<vmem>>, %arg5: memref<64x32xf32, #tpu.memory_space<vmem>>, %arg6: memref<1x32xf32, #tpu.memory_space<vmem>>, %arg7: memref<32x32xf32, #tpu.memory_space<vmem>>, %arg8: memref<1x32xf32, #tpu.memory_space<vmem>>, %arg9: memref<32x512xf32, #tpu.memory_space<vmem>>, %arg10: memref<4x512xf32, #tpu.memory_space<vmem>>, %arg11: memref<1x512xf32, #tpu.memory_space<vmem>>, %arg12: memref<1x512xf32, #tpu.memory_space<vmem>>, %arg13: memref<128x512xf32, #tpu.memory_space<vmem>>, %arg14: memref<128x128xf32, #tpu.memory_space<vmem>>, %arg15: memref<1x128xf32, #tpu.memory_space<vmem>>, %arg16: memref<64x128xf32, #tpu.memory_space<vmem>>, %arg17: memref<8x128xf32, #tpu.memory_space<vmem>>, %arg18: memref<8x128xf32, #tpu.memory_space<vmem>>, %arg19: memref<64x512xf32, #tpu.memory_space<vmem>>, %arg20: memref<64x128xf32, #tpu.memory_space<vmem>>) attributes {dimension_semantics = [], scalar_prefetch = 0 : i64, scratch_operands = 2 : i64, tpu.core_type = #tpu.core_type<tc>} {
    %c0 = arith.constant 0 : index
    %c0_0 = arith.constant 0 : index
    %0 = vector.load %arg0[%c0, %c0_0] : memref<64x64xf32, #tpu.memory_space<vmem>>, vector<64x64xf32>
    %c0_1 = arith.constant 0 : index
    %c0_2 = arith.constant 0 : index
    %1 = vector.load %arg5[%c0_1, %c0_2] : memref<64x32xf32, #tpu.memory_space<vmem>>, vector<64x32xf32>
    %cst = arith.constant dense<0.000000e+00> : vector<64x32xf32>
    %2 = tpu.matmul %0, %1, %cst {dimension_numbers = #tpu.dot_dimension_numbers<[1], [0], [0], [1], [0, 0, 1, 1], [], []>} : vector<64x64xf32>, vector<64x32xf32>, vector<64x32xf32> -> vector<64x32xf32>
    %c0_3 = arith.constant 0 : index
    %c0_4 = arith.constant 0 : index
    %3 = vector.load %arg6[%c0_3, %c0_4] : memref<1x32xf32, #tpu.memory_space<vmem>>, vector<1x32xf32>
    %4 = vector.broadcast %3 : vector<1x32xf32> to vector<64x32xf32>
    %5 = arith.addf %2, %4 : vector<64x32xf32>
    %cst_5 = arith.constant 0.000000e+00 : f32
    %6 = vector.broadcast %cst_5 : f32 to vector<64x32xf32>
    %7 = arith.maximumf %5, %6 : vector<64x32xf32>
    %c0_6 = arith.constant 0 : index
    %c0_7 = arith.constant 0 : index
    %8 = vector.load %arg7[%c0_6, %c0_7] : memref<32x32xf32, #tpu.memory_space<vmem>>, vector<32x32xf32>
    %cst_8 = arith.constant dense<0.000000e+00> : vector<64x32xf32>
    %9 = tpu.matmul %7, %8, %cst_8 {dimension_numbers = #tpu.dot_dimension_numbers<[1], [0], [0], [1], [0, 0, 1, 1], [], []>} : vector<64x32xf32>, vector<32x32xf32>, vector<64x32xf32> -> vector<64x32xf32>
    %c0_9 = arith.constant 0 : index
    %c0_10 = arith.constant 0 : index
    %10 = vector.load %arg8[%c0_9, %c0_10] : memref<1x32xf32, #tpu.memory_space<vmem>>, vector<1x32xf32>
    %11 = vector.broadcast %10 : vector<1x32xf32> to vector<64x32xf32>
    %12 = arith.addf %9, %11 : vector<64x32xf32>
    %cst_11 = arith.constant 0.000000e+00 : f32
    %13 = vector.broadcast %cst_11 : f32 to vector<64x32xf32>
    %14 = arith.maximumf %12, %13 : vector<64x32xf32>
    %c0_12 = arith.constant 0 : index
    %c0_13 = arith.constant 0 : index
    %15 = vector.load %arg9[%c0_12, %c0_13] : memref<32x512xf32, #tpu.memory_space<vmem>>, vector<32x512xf32>
    %cst_14 = arith.constant dense<0.000000e+00> : vector<64x512xf32>
    %16 = tpu.matmul %14, %15, %cst_14 {dimension_numbers = #tpu.dot_dimension_numbers<[1], [0], [0], [1], [0, 0, 1, 1], [], []>} : vector<64x32xf32>, vector<32x512xf32>, vector<64x512xf32> -> vector<64x512xf32>
    %c0_15 = arith.constant 0 : index
    %c0_16 = arith.constant 0 : index
    %17 = vector.load %arg1[%c0_15, %c0_16] : memref<64x4xf32, #tpu.memory_space<vmem>>, vector<64x4xf32>
    %c0_17 = arith.constant 0 : index
    %c0_18 = arith.constant 0 : index
    %18 = vector.load %arg10[%c0_17, %c0_18] : memref<4x512xf32, #tpu.memory_space<vmem>>, vector<4x512xf32>
    %cst_19 = arith.constant dense<0.000000e+00> : vector<64x512xf32>
    %19 = tpu.matmul %17, %18, %cst_19 {dimension_numbers = #tpu.dot_dimension_numbers<[1], [0], [0], [1], [0, 0, 1, 1], [], []>} : vector<64x4xf32>, vector<4x512xf32>, vector<64x512xf32> -> vector<64x512xf32>
    %20 = arith.addf %16, %19 : vector<64x512xf32>
    %c0_20 = arith.constant 0 : index
    %c0_21 = arith.constant 0 : index
    %21 = vector.load %arg2[%c0_20, %c0_21] : memref<64x1xf32, #tpu.memory_space<vmem>>, vector<64x1xf32>
    %c0_22 = arith.constant 0 : index
    %c0_23 = arith.constant 0 : index
    %22 = vector.load %arg11[%c0_22, %c0_23] : memref<1x512xf32, #tpu.memory_space<vmem>>, vector<1x512xf32>
    %23 = vector.broadcast %21 : vector<64x1xf32> to vector<64x512xf32>
    %24 = vector.broadcast %22 : vector<1x512xf32> to vector<64x512xf32>
    %25 = arith.mulf %23, %24 : vector<64x512xf32>
    %26 = arith.addf %20, %25 : vector<64x512xf32>
    %c0_24 = arith.constant 0 : index
    %c0_25 = arith.constant 0 : index
    %27 = vector.load %arg12[%c0_24, %c0_25] : memref<1x512xf32, #tpu.memory_space<vmem>>, vector<1x512xf32>
    %28 = vector.broadcast %27 : vector<1x512xf32> to vector<64x512xf32>
    %29 = arith.addf %26, %28 : vector<64x512xf32>
    %c0_26 = arith.constant 0 : index
    %c0_27 = arith.constant 0 : index
    %30 = vector.load %arg19[%c0_26, %c0_27] : memref<64x512xf32, #tpu.memory_space<vmem>>, vector<64x512xf32>
    tpu.vector_store %arg19[%c0_26, %c0_27], %29 {strides = array<i32>} : memref<64x512xf32, #tpu.memory_space<vmem>>, vector<64x512xf32>,
    %c0_28 = arith.constant 0 : index
    %c0_29 = arith.constant 0 : index
    %31 = vector.load %arg13[%c0_28, %c0_29] : memref<128x512xf32, #tpu.memory_space<vmem>>, vector<128x512xf32>
    %c0_30 = arith.constant 0 : index
    %c0_31 = arith.constant 0 : index
    %32 = vector.load %arg3[%c0_30, %c0_31] : memref<8x128xf32, #tpu.memory_space<vmem>>, vector<8x128xf32>
    %c0_32 = arith.constant 0 : index
    %c0_33 = arith.constant 0 : index
    %33 = vector.load %arg4[%c0_32, %c0_33] : memref<8x128xf32, #tpu.memory_space<vmem>>, vector<8x128xf32>
    %c0_i32 = arith.constant 0 : i32
    %c8_i32 = arith.constant 8 : i32
    %34 = arith.muli %c0_i32, %c8_i32 : i32
    %35 = tpu.assume_multiple %34, 8 : i32
    %36 = arith.index_cast %35 : i32 to index
    %c0_34 = arith.constant 0 : index
    %37 = vector.load %arg19[%36, %c0_34] : memref<64x512xf32, #tpu.memory_space<vmem>>, vector<8x512xf32>
    %cst_35 = arith.constant dense<0.000000e+00> : vector<8x512xf32>
    %38 = tpu.matmul %32, %31, %cst_35 {dimension_numbers = #tpu.dot_dimension_numbers<[1], [0], [0], [1], [0, 0, 1, 1], [], []>} : vector<8x128xf32>, vector<128x512xf32>, vector<8x512xf32> -> vector<8x512xf32>
    %39 = arith.addf %37, %38 : vector<8x512xf32>
    %40 = vector.extract_strided_slice %39 {offsets = [0, 0], sizes = [8, 128], strides = [1, 1]} : vector<8x512xf32> to vector<8x128xf32>
    %41 = arith.negf %40 : vector<8x128xf32>
    %42 = math.exp %41 : vector<8x128xf32>
    %cst_36 = arith.constant 1.000000e+00 : f32
    %43 = vector.broadcast %cst_36 : f32 to vector<8x128xf32>
    %44 = arith.addf %43, %42 : vector<8x128xf32>
    %45 = arith.divf %43, %44 : vector<8x128xf32>
    %46 = vector.extract_strided_slice %39 {offsets = [0, 128], sizes = [8, 128], strides = [1, 1]} : vector<8x512xf32> to vector<8x128xf32>
    %47 = arith.negf %46 : vector<8x128xf32>
    %48 = math.exp %47 : vector<8x128xf32>
    %cst_37 = arith.constant 1.000000e+00 : f32
    %49 = vector.broadcast %cst_37 : f32 to vector<8x128xf32>
    %50 = arith.addf %49, %48 : vector<8x128xf32>
    %51 = arith.divf %49, %50 : vector<8x128xf32>
    %52 = vector.extract_strided_slice %39 {offsets = [0, 256], sizes = [8, 128], strides = [1, 1]} : vector<8x512xf32> to vector<8x128xf32>
    %53 = math.tanh %52 : vector<8x128xf32>
    %54 = vector.extract_strided_slice %39 {offsets = [0, 384], sizes = [8, 128], strides = [1, 1]} : vector<8x512xf32> to vector<8x128xf32>
    %55 = arith.negf %54 : vector<8x128xf32>
    %56 = math.exp %55 : vector<8x128xf32>
    %cst_38 = arith.constant 1.000000e+00 : f32
    %57 = vector.broadcast %cst_38 : f32 to vector<8x128xf32>
    %58 = arith.addf %57, %56 : vector<8x128xf32>
    %59 = arith.divf %57, %58 : vector<8x128xf32>
    %60 = arith.mulf %51, %33 : vector<8x128xf32>
    %61 = arith.mulf %45, %53 : vector<8x128xf32>
    %62 = arith.addf %60, %61 : vector<8x128xf32>
    %63 = math.tanh %62 : vector<8x128xf32>
    %64 = arith.mulf %59, %63 : vector<8x128xf32>
    %65 = arith.index_cast %35 : i32 to index
    %c0_39 = arith.constant 0 : index
    %66 = vector.load %arg20[%65, %c0_39] : memref<64x128xf32, #tpu.memory_space<vmem>>, vector<8x128xf32>
    tpu.vector_store %arg20[%65, %c0_39], %64 {strides = array<i32>} : memref<64x128xf32, #tpu.memory_space<vmem>>, vector<8x128xf32>,
    %c1_i32 = arith.constant 1 : i32
    %c8_i32_40 = arith.constant 8 : i32
    %67 = arith.muli %c1_i32, %c8_i32_40 : i32
    %68 = tpu.assume_multiple %67, 8 : i32
    %69 = arith.index_cast %68 : i32 to index
    %c0_41 = arith.constant 0 : index
    %70 = vector.load %arg19[%69, %c0_41] : memref<64x512xf32, #tpu.memory_space<vmem>>, vector<8x512xf32>
    %cst_42 = arith.constant dense<0.000000e+00> : vector<8x512xf32>
    %71 = tpu.matmul %64, %31, %cst_42 {dimension_numbers = #tpu.dot_dimension_numbers<[1], [0], [0], [1], [0, 0, 1, 1], [], []>} : vector<8x128xf32>, vector<128x512xf32>, vector<8x512xf32> -> vector<8x512xf32>
    %72 = arith.addf %70, %71 : vector<8x512xf32>
    %73 = vector.extract_strided_slice %72 {offsets = [0, 0], sizes = [8, 128], strides = [1, 1]} : vector<8x512xf32> to vector<8x128xf32>
    %74 = arith.negf %73 : vector<8x128xf32>
    %75 = math.exp %74 : vector<8x128xf32>
    %cst_43 = arith.constant 1.000000e+00 : f32
    %76 = vector.broadcast %cst_43 : f32 to vector<8x128xf32>
    %77 = arith.addf %76, %75 : vector<8x128xf32>
    %78 = arith.divf %76, %77 : vector<8x128xf32>
    %79 = vector.extract_strided_slice %72 {offsets = [0, 128], sizes = [8, 128], strides = [1, 1]} : vector<8x512xf32> to vector<8x128xf32>
    %80 = arith.negf %79 : vector<8x128xf32>
    %81 = math.exp %80 : vector<8x128xf32>
    %cst_44 = arith.constant 1.000000e+00 : f32
    %82 = vector.broadcast %cst_44 : f32 to vector<8x128xf32>
    %83 = arith.addf %82, %81 : vector<8x128xf32>
    %84 = arith.divf %82, %83 : vector<8x128xf32>
    %85 = vector.extract_strided_slice %72 {offsets = [0, 256], sizes = [8, 128], strides = [1, 1]} : vector<8x512xf32> to vector<8x128xf32>
    %86 = math.tanh %85 : vector<8x128xf32>
    %87 = vector.extract_strided_slice %72 {offsets = [0, 384], sizes = [8, 128], strides = [1, 1]} : vector<8x512xf32> to vector<8x128xf32>
    %88 = arith.negf %87 : vector<8x128xf32>
    %89 = math.exp %88 : vector<8x128xf32>
    %cst_45 = arith.constant 1.000000e+00 : f32
    %90 = vector.broadcast %cst_45 : f32 to vector<8x128xf32>
    %91 = arith.addf %90, %89 : vector<8x128xf32>
    %92 = arith.divf %90, %91 : vector<8x128xf32>
    %93 = arith.mulf %84, %62 : vector<8x128xf32>
    %94 = arith.mulf %78, %86 : vector<8x128xf32>
    %95 = arith.addf %93, %94 : vector<8x128xf32>
    %96 = math.tanh %95 : vector<8x128xf32>
    %97 = arith.mulf %92, %96 : vector<8x128xf32>
    %98 = arith.index_cast %68 : i32 to index
    %c0_46 = arith.constant 0 : index
    %99 = vector.load %arg20[%98, %c0_46] : memref<64x128xf32, #tpu.memory_space<vmem>>, vector<8x128xf32>
    tpu.vector_store %arg20[%98, %c0_46], %97 {strides = array<i32>} : memref<64x128xf32, #tpu.memory_space<vmem>>, vector<8x128xf32>,
    %c2_i32 = arith.constant 2 : i32
    %c8_i32_47 = arith.constant 8 : i32
    %100 = arith.muli %c2_i32, %c8_i32_47 : i32
    %101 = tpu.assume_multiple %100, 8 : i32
    %102 = arith.index_cast %101 : i32 to index
    %c0_48 = arith.constant 0 : index
    %103 = vector.load %arg19[%102, %c0_48] : memref<64x512xf32, #tpu.memory_space<vmem>>, vector<8x512xf32>
    %cst_49 = arith.constant dense<0.000000e+00> : vector<8x512xf32>
    %104 = tpu.matmul %97, %31, %cst_49 {dimension_numbers = #tpu.dot_dimension_numbers<[1], [0], [0], [1], [0, 0, 1, 1], [], []>} : vector<8x128xf32>, vector<128x512xf32>, vector<8x512xf32> -> vector<8x512xf32>
    %105 = arith.addf %103, %104 : vector<8x512xf32>
    %106 = vector.extract_strided_slice %105 {offsets = [0, 0], sizes = [8, 128], strides = [1, 1]} : vector<8x512xf32> to vector<8x128xf32>
    %107 = arith.negf %106 : vector<8x128xf32>
    %108 = math.exp %107 : vector<8x128xf32>
    %cst_50 = arith.constant 1.000000e+00 : f32
    %109 = vector.broadcast %cst_50 : f32 to vector<8x128xf32>
    %110 = arith.addf %109, %108 : vector<8x128xf32>
    %111 = arith.divf %109, %110 : vector<8x128xf32>
    %112 = vector.extract_strided_slice %105 {offsets = [0, 128], sizes = [8, 128], strides = [1, 1]} : vector<8x512xf32> to vector<8x128xf32>
    %113 = arith.negf %112 : vector<8x128xf32>
    %114 = math.exp %113 : vector<8x128xf32>
    %cst_51 = arith.constant 1.000000e+00 : f32
    %115 = vector.broadcast %cst_51 : f32 to vector<8x128xf32>
    %116 = arith.addf %115, %114 : vector<8x128xf32>
    %117 = arith.divf %115, %116 : vector<8x128xf32>
    %118 = vector.extract_strided_slice %105 {offsets = [0, 256], sizes = [8, 128], strides = [1, 1]} : vector<8x512xf32> to vector<8x128xf32>
    %119 = math.tanh %118 : vector<8x128xf32>
    %120 = vector.extract_strided_slice %105 {offsets = [0, 384], sizes = [8, 128], strides = [1, 1]} : vector<8x512xf32> to vector<8x128xf32>
    %121 = arith.negf %120 : vector<8x128xf32>
    %122 = math.exp %121 : vector<8x128xf32>
    %cst_52 = arith.constant 1.000000e+00 : f32
    %123 = vector.broadcast %cst_52 : f32 to vector<8x128xf32>
    %124 = arith.addf %123, %122 : vector<8x128xf32>
    %125 = arith.divf %123, %124 : vector<8x128xf32>
    %126 = arith.mulf %117, %95 : vector<8x128xf32>
    %127 = arith.mulf %111, %119 : vector<8x128xf32>
    %128 = arith.addf %126, %127 : vector<8x128xf32>
    %129 = math.tanh %128 : vector<8x128xf32>
    %130 = arith.mulf %125, %129 : vector<8x128xf32>
    %131 = arith.index_cast %101 : i32 to index
    %c0_53 = arith.constant 0 : index
    %132 = vector.load %arg20[%131, %c0_53] : memref<64x128xf32, #tpu.memory_space<vmem>>, vector<8x128xf32>
    tpu.vector_store %arg20[%131, %c0_53], %130 {strides = array<i32>} : memref<64x128xf32, #tpu.memory_space<vmem>>, vector<8x128xf32>,
    %c3_i32 = arith.constant 3 : i32
    %c8_i32_54 = arith.constant 8 : i32
    %133 = arith.muli %c3_i32, %c8_i32_54 : i32
    %134 = tpu.assume_multiple %133, 8 : i32
    %135 = arith.index_cast %134 : i32 to index
    %c0_55 = arith.constant 0 : index
    %136 = vector.load %arg19[%135, %c0_55] : memref<64x512xf32, #tpu.memory_space<vmem>>, vector<8x512xf32>
    %cst_56 = arith.constant dense<0.000000e+00> : vector<8x512xf32>
    %137 = tpu.matmul %130, %31, %cst_56 {dimension_numbers = #tpu.dot_dimension_numbers<[1], [0], [0], [1], [0, 0, 1, 1], [], []>} : vector<8x128xf32>, vector<128x512xf32>, vector<8x512xf32> -> vector<8x512xf32>
    %138 = arith.addf %136, %137 : vector<8x512xf32>
    %139 = vector.extract_strided_slice %138 {offsets = [0, 0], sizes = [8, 128], strides = [1, 1]} : vector<8x512xf32> to vector<8x128xf32>
    %140 = arith.negf %139 : vector<8x128xf32>
    %141 = math.exp %140 : vector<8x128xf32>
    %cst_57 = arith.constant 1.000000e+00 : f32
    %142 = vector.broadcast %cst_57 : f32 to vector<8x128xf32>
    %143 = arith.addf %142, %141 : vector<8x128xf32>
    %144 = arith.divf %142, %143 : vector<8x128xf32>
    %145 = vector.extract_strided_slice %138 {offsets = [0, 128], sizes = [8, 128], strides = [1, 1]} : vector<8x512xf32> to vector<8x128xf32>
    %146 = arith.negf %145 : vector<8x128xf32>
    %147 = math.exp %146 : vector<8x128xf32>
    %cst_58 = arith.constant 1.000000e+00 : f32
    %148 = vector.broadcast %cst_58 : f32 to vector<8x128xf32>
    %149 = arith.addf %148, %147 : vector<8x128xf32>
    %150 = arith.divf %148, %149 : vector<8x128xf32>
    %151 = vector.extract_strided_slice %138 {offsets = [0, 256], sizes = [8, 128], strides = [1, 1]} : vector<8x512xf32> to vector<8x128xf32>
    %152 = math.tanh %151 : vector<8x128xf32>
    %153 = vector.extract_strided_slice %138 {offsets = [0, 384], sizes = [8, 128], strides = [1, 1]} : vector<8x512xf32> to vector<8x128xf32>
    %154 = arith.negf %153 : vector<8x128xf32>
    %155 = math.exp %154 : vector<8x128xf32>
    %cst_59 = arith.constant 1.000000e+00 : f32
    %156 = vector.broadcast %cst_59 : f32 to vector<8x128xf32>
    %157 = arith.addf %156, %155 : vector<8x128xf32>
    %158 = arith.divf %156, %157 : vector<8x128xf32>
    %159 = arith.mulf %150, %128 : vector<8x128xf32>
    %160 = arith.mulf %144, %152 : vector<8x128xf32>
    %161 = arith.addf %159, %160 : vector<8x128xf32>
    %162 = math.tanh %161 : vector<8x128xf32>
    %163 = arith.mulf %158, %162 : vector<8x128xf32>
    %164 = arith.index_cast %134 : i32 to index
    %c0_60 = arith.constant 0 : index
    %165 = vector.load %arg20[%164, %c0_60] : memref<64x128xf32, #tpu.memory_space<vmem>>, vector<8x128xf32>
    tpu.vector_store %arg20[%164, %c0_60], %163 {strides = array<i32>} : memref<64x128xf32, #tpu.memory_space<vmem>>, vector<8x128xf32>,
    %c4_i32 = arith.constant 4 : i32
    %c8_i32_61 = arith.constant 8 : i32
    %166 = arith.muli %c4_i32, %c8_i32_61 : i32
    %167 = tpu.assume_multiple %166, 8 : i32
    %168 = arith.index_cast %167 : i32 to index
    %c0_62 = arith.constant 0 : index
    %169 = vector.load %arg19[%168, %c0_62] : memref<64x512xf32, #tpu.memory_space<vmem>>, vector<8x512xf32>
    %cst_63 = arith.constant dense<0.000000e+00> : vector<8x512xf32>
    %170 = tpu.matmul %163, %31, %cst_63 {dimension_numbers = #tpu.dot_dimension_numbers<[1], [0], [0], [1], [0, 0, 1, 1], [], []>} : vector<8x128xf32>, vector<128x512xf32>, vector<8x512xf32> -> vector<8x512xf32>
    %171 = arith.addf %169, %170 : vector<8x512xf32>
    %172 = vector.extract_strided_slice %171 {offsets = [0, 0], sizes = [8, 128], strides = [1, 1]} : vector<8x512xf32> to vector<8x128xf32>
    %173 = arith.negf %172 : vector<8x128xf32>
    %174 = math.exp %173 : vector<8x128xf32>
    %cst_64 = arith.constant 1.000000e+00 : f32
    %175 = vector.broadcast %cst_64 : f32 to vector<8x128xf32>
    %176 = arith.addf %175, %174 : vector<8x128xf32>
    %177 = arith.divf %175, %176 : vector<8x128xf32>
    %178 = vector.extract_strided_slice %171 {offsets = [0, 128], sizes = [8, 128], strides = [1, 1]} : vector<8x512xf32> to vector<8x128xf32>
    %179 = arith.negf %178 : vector<8x128xf32>
    %180 = math.exp %179 : vector<8x128xf32>
    %cst_65 = arith.constant 1.000000e+00 : f32
    %181 = vector.broadcast %cst_65 : f32 to vector<8x128xf32>
    %182 = arith.addf %181, %180 : vector<8x128xf32>
    %183 = arith.divf %181, %182 : vector<8x128xf32>
    %184 = vector.extract_strided_slice %171 {offsets = [0, 256], sizes = [8, 128], strides = [1, 1]} : vector<8x512xf32> to vector<8x128xf32>
    %185 = math.tanh %184 : vector<8x128xf32>
    %186 = vector.extract_strided_slice %171 {offsets = [0, 384], sizes = [8, 128], strides = [1, 1]} : vector<8x512xf32> to vector<8x128xf32>
    %187 = arith.negf %186 : vector<8x128xf32>
    %188 = math.exp %187 : vector<8x128xf32>
    %cst_66 = arith.constant 1.000000e+00 : f32
    %189 = vector.broadcast %cst_66 : f32 to vector<8x128xf32>
    %190 = arith.addf %189, %188 : vector<8x128xf32>
    %191 = arith.divf %189, %190 : vector<8x128xf32>
    %192 = arith.mulf %183, %161 : vector<8x128xf32>
    %193 = arith.mulf %177, %185 : vector<8x128xf32>
    %194 = arith.addf %192, %193 : vector<8x128xf32>
    %195 = math.tanh %194 : vector<8x128xf32>
    %196 = arith.mulf %191, %195 : vector<8x128xf32>
    %197 = arith.index_cast %167 : i32 to index
    %c0_67 = arith.constant 0 : index
    %198 = vector.load %arg20[%197, %c0_67] : memref<64x128xf32, #tpu.memory_space<vmem>>, vector<8x128xf32>
    tpu.vector_store %arg20[%197, %c0_67], %196 {strides = array<i32>} : memref<64x128xf32, #tpu.memory_space<vmem>>, vector<8x128xf32>,
    %c5_i32 = arith.constant 5 : i32
    %c8_i32_68 = arith.constant 8 : i32
    %199 = arith.muli %c5_i32, %c8_i32_68 : i32
    %200 = tpu.assume_multiple %199, 8 : i32
    %201 = arith.index_cast %200 : i32 to index
    %c0_69 = arith.constant 0 : index
    %202 = vector.load %arg19[%201, %c0_69] : memref<64x512xf32, #tpu.memory_space<vmem>>, vector<8x512xf32>
    %cst_70 = arith.constant dense<0.000000e+00> : vector<8x512xf32>
    %203 = tpu.matmul %196, %31, %cst_70 {dimension_numbers = #tpu.dot_dimension_numbers<[1], [0], [0], [1], [0, 0, 1, 1], [], []>} : vector<8x128xf32>, vector<128x512xf32>, vector<8x512xf32> -> vector<8x512xf32>
    %204 = arith.addf %202, %203 : vector<8x512xf32>
    %205 = vector.extract_strided_slice %204 {offsets = [0, 0], sizes = [8, 128], strides = [1, 1]} : vector<8x512xf32> to vector<8x128xf32>
    %206 = arith.negf %205 : vector<8x128xf32>
    %207 = math.exp %206 : vector<8x128xf32>
    %cst_71 = arith.constant 1.000000e+00 : f32
    %208 = vector.broadcast %cst_71 : f32 to vector<8x128xf32>
    %209 = arith.addf %208, %207 : vector<8x128xf32>
    %210 = arith.divf %208, %209 : vector<8x128xf32>
    %211 = vector.extract_strided_slice %204 {offsets = [0, 128], sizes = [8, 128], strides = [1, 1]} : vector<8x512xf32> to vector<8x128xf32>
    %212 = arith.negf %211 : vector<8x128xf32>
    %213 = math.exp %212 : vector<8x128xf32>
    %cst_72 = arith.constant 1.000000e+00 : f32
    %214 = vector.broadcast %cst_72 : f32 to vector<8x128xf32>
    %215 = arith.addf %214, %213 : vector<8x128xf32>
    %216 = arith.divf %214, %215 : vector<8x128xf32>
    %217 = vector.extract_strided_slice %204 {offsets = [0, 256], sizes = [8, 128], strides = [1, 1]} : vector<8x512xf32> to vector<8x128xf32>
    %218 = math.tanh %217 : vector<8x128xf32>
    %219 = vector.extract_strided_slice %204 {offsets = [0, 384], sizes = [8, 128], strides = [1, 1]} : vector<8x512xf32> to vector<8x128xf32>
    %220 = arith.negf %219 : vector<8x128xf32>
    %221 = math.exp %220 : vector<8x128xf32>
    %cst_73 = arith.constant 1.000000e+00 : f32
    %222 = vector.broadcast %cst_73 : f32 to vector<8x128xf32>
    %223 = arith.addf %222, %221 : vector<8x128xf32>
    %224 = arith.divf %222, %223 : vector<8x128xf32>
    %225 = arith.mulf %216, %194 : vector<8x128xf32>
    %226 = arith.mulf %210, %218 : vector<8x128xf32>
    %227 = arith.addf %225, %226 : vector<8x128xf32>
    %228 = math.tanh %227 : vector<8x128xf32>
    %229 = arith.mulf %224, %228 : vector<8x128xf32>
    %230 = arith.index_cast %200 : i32 to index
    %c0_74 = arith.constant 0 : index
    %231 = vector.load %arg20[%230, %c0_74] : memref<64x128xf32, #tpu.memory_space<vmem>>, vector<8x128xf32>
    tpu.vector_store %arg20[%230, %c0_74], %229 {strides = array<i32>} : memref<64x128xf32, #tpu.memory_space<vmem>>, vector<8x128xf32>,
    %c6_i32 = arith.constant 6 : i32
    %c8_i32_75 = arith.constant 8 : i32
    %232 = arith.muli %c6_i32, %c8_i32_75 : i32
    %233 = tpu.assume_multiple %232, 8 : i32
    %234 = arith.index_cast %233 : i32 to index
    %c0_76 = arith.constant 0 : index
    %235 = vector.load %arg19[%234, %c0_76] : memref<64x512xf32, #tpu.memory_space<vmem>>, vector<8x512xf32>
    %cst_77 = arith.constant dense<0.000000e+00> : vector<8x512xf32>
    %236 = tpu.matmul %229, %31, %cst_77 {dimension_numbers = #tpu.dot_dimension_numbers<[1], [0], [0], [1], [0, 0, 1, 1], [], []>} : vector<8x128xf32>, vector<128x512xf32>, vector<8x512xf32> -> vector<8x512xf32>
    %237 = arith.addf %235, %236 : vector<8x512xf32>
    %238 = vector.extract_strided_slice %237 {offsets = [0, 0], sizes = [8, 128], strides = [1, 1]} : vector<8x512xf32> to vector<8x128xf32>
    %239 = arith.negf %238 : vector<8x128xf32>
    %240 = math.exp %239 : vector<8x128xf32>
    %cst_78 = arith.constant 1.000000e+00 : f32
    %241 = vector.broadcast %cst_78 : f32 to vector<8x128xf32>
    %242 = arith.addf %241, %240 : vector<8x128xf32>
    %243 = arith.divf %241, %242 : vector<8x128xf32>
    %244 = vector.extract_strided_slice %237 {offsets = [0, 128], sizes = [8, 128], strides = [1, 1]} : vector<8x512xf32> to vector<8x128xf32>
    %245 = arith.negf %244 : vector<8x128xf32>
    %246 = math.exp %245 : vector<8x128xf32>
    %cst_79 = arith.constant 1.000000e+00 : f32
    %247 = vector.broadcast %cst_79 : f32 to vector<8x128xf32>
    %248 = arith.addf %247, %246 : vector<8x128xf32>
    %249 = arith.divf %247, %248 : vector<8x128xf32>
    %250 = vector.extract_strided_slice %237 {offsets = [0, 256], sizes = [8, 128], strides = [1, 1]} : vector<8x512xf32> to vector<8x128xf32>
    %251 = math.tanh %250 : vector<8x128xf32>
    %252 = vector.extract_strided_slice %237 {offsets = [0, 384], sizes = [8, 128], strides = [1, 1]} : vector<8x512xf32> to vector<8x128xf32>
    %253 = arith.negf %252 : vector<8x128xf32>
    %254 = math.exp %253 : vector<8x128xf32>
    %cst_80 = arith.constant 1.000000e+00 : f32
    %255 = vector.broadcast %cst_80 : f32 to vector<8x128xf32>
    %256 = arith.addf %255, %254 : vector<8x128xf32>
    %257 = arith.divf %255, %256 : vector<8x128xf32>
    %258 = arith.mulf %249, %227 : vector<8x128xf32>
    %259 = arith.mulf %243, %251 : vector<8x128xf32>
    %260 = arith.addf %258, %259 : vector<8x128xf32>
    %261 = math.tanh %260 : vector<8x128xf32>
    %262 = arith.mulf %257, %261 : vector<8x128xf32>
    %263 = arith.index_cast %233 : i32 to index
    %c0_81 = arith.constant 0 : index
    %264 = vector.load %arg20[%263, %c0_81] : memref<64x128xf32, #tpu.memory_space<vmem>>, vector<8x128xf32>
    tpu.vector_store %arg20[%263, %c0_81], %262 {strides = array<i32>} : memref<64x128xf32, #tpu.memory_space<vmem>>, vector<8x128xf32>,
    %c7_i32 = arith.constant 7 : i32
    %c8_i32_82 = arith.constant 8 : i32
    %265 = arith.muli %c7_i32, %c8_i32_82 : i32
    %266 = tpu.assume_multiple %265, 8 : i32
    %267 = arith.index_cast %266 : i32 to index
    %c0_83 = arith.constant 0 : index
    %268 = vector.load %arg19[%267, %c0_83] : memref<64x512xf32, #tpu.memory_space<vmem>>, vector<8x512xf32>
    %cst_84 = arith.constant dense<0.000000e+00> : vector<8x512xf32>
    %269 = tpu.matmul %262, %31, %cst_84 {dimension_numbers = #tpu.dot_dimension_numbers<[1], [0], [0], [1], [0, 0, 1, 1], [], []>} : vector<8x128xf32>, vector<128x512xf32>, vector<8x512xf32> -> vector<8x512xf32>
    %270 = arith.addf %268, %269 : vector<8x512xf32>
    %271 = vector.extract_strided_slice %270 {offsets = [0, 0], sizes = [8, 128], strides = [1, 1]} : vector<8x512xf32> to vector<8x128xf32>
    %272 = arith.negf %271 : vector<8x128xf32>
    %273 = math.exp %272 : vector<8x128xf32>
    %cst_85 = arith.constant 1.000000e+00 : f32
    %274 = vector.broadcast %cst_85 : f32 to vector<8x128xf32>
    %275 = arith.addf %274, %273 : vector<8x128xf32>
    %276 = arith.divf %274, %275 : vector<8x128xf32>
    %277 = vector.extract_strided_slice %270 {offsets = [0, 128], sizes = [8, 128], strides = [1, 1]} : vector<8x512xf32> to vector<8x128xf32>
    %278 = arith.negf %277 : vector<8x128xf32>
    %279 = math.exp %278 : vector<8x128xf32>
    %cst_86 = arith.constant 1.000000e+00 : f32
    %280 = vector.broadcast %cst_86 : f32 to vector<8x128xf32>
    %281 = arith.addf %280, %279 : vector<8x128xf32>
    %282 = arith.divf %280, %281 : vector<8x128xf32>
    %283 = vector.extract_strided_slice %270 {offsets = [0, 256], sizes = [8, 128], strides = [1, 1]} : vector<8x512xf32> to vector<8x128xf32>
    %284 = math.tanh %283 : vector<8x128xf32>
    %285 = vector.extract_strided_slice %270 {offsets = [0, 384], sizes = [8, 128], strides = [1, 1]} : vector<8x512xf32> to vector<8x128xf32>
    %286 = arith.negf %285 : vector<8x128xf32>
    %287 = math.exp %286 : vector<8x128xf32>
    %cst_87 = arith.constant 1.000000e+00 : f32
    %288 = vector.broadcast %cst_87 : f32 to vector<8x128xf32>
    %289 = arith.addf %288, %287 : vector<8x128xf32>
    %290 = arith.divf %288, %289 : vector<8x128xf32>
    %291 = arith.mulf %282, %260 : vector<8x128xf32>
    %292 = arith.mulf %276, %284 : vector<8x128xf32>
    %293 = arith.addf %291, %292 : vector<8x128xf32>
    %294 = math.tanh %293 : vector<8x128xf32>
    %295 = arith.mulf %290, %294 : vector<8x128xf32>
    %296 = arith.index_cast %266 : i32 to index
    %c0_88 = arith.constant 0 : index
    %297 = vector.load %arg20[%296, %c0_88] : memref<64x128xf32, #tpu.memory_space<vmem>>, vector<8x128xf32>
    tpu.vector_store %arg20[%296, %c0_88], %295 {strides = array<i32>} : memref<64x128xf32, #tpu.memory_space<vmem>>, vector<8x128xf32>,
    %c8_i32_89 = arith.constant 8 : i32
    %c0_90 = arith.constant 0 : index
    %c0_91 = arith.constant 0 : index
    %298 = vector.load %arg17[%c0_90, %c0_91] : memref<8x128xf32, #tpu.memory_space<vmem>>, vector<8x128xf32>
    tpu.vector_store %arg17[%c0_90, %c0_91], %295 {strides = array<i32>} : memref<8x128xf32, #tpu.memory_space<vmem>>, vector<8x128xf32>,
    %c0_92 = arith.constant 0 : index
    %c0_93 = arith.constant 0 : index
    %299 = vector.load %arg18[%c0_92, %c0_93] : memref<8x128xf32, #tpu.memory_space<vmem>>, vector<8x128xf32>
    tpu.vector_store %arg18[%c0_92, %c0_93], %293 {strides = array<i32>} : memref<8x128xf32, #tpu.memory_space<vmem>>, vector<8x128xf32>,
    %c0_94 = arith.constant 0 : index
    %c0_95 = arith.constant 0 : index
    %300 = vector.load %arg20[%c0_94, %c0_95] : memref<64x128xf32, #tpu.memory_space<vmem>>, vector<64x128xf32>
    %c0_96 = arith.constant 0 : index
    %c0_97 = arith.constant 0 : index
    %301 = vector.load %arg14[%c0_96, %c0_97] : memref<128x128xf32, #tpu.memory_space<vmem>>, vector<128x128xf32>
    %cst_98 = arith.constant dense<0.000000e+00> : vector<64x128xf32>
    %302 = tpu.matmul %300, %301, %cst_98 {dimension_numbers = #tpu.dot_dimension_numbers<[1], [0], [0], [1], [0, 0, 1, 1], [], []>} : vector<64x128xf32>, vector<128x128xf32>, vector<64x128xf32> -> vector<64x128xf32>
    %c0_99 = arith.constant 0 : index
    %c0_100 = arith.constant 0 : index
    %303 = vector.load %arg15[%c0_99, %c0_100] : memref<1x128xf32, #tpu.memory_space<vmem>>, vector<1x128xf32>
    %304 = vector.broadcast %303 : vector<1x128xf32> to vector<64x128xf32>
    %305 = arith.addf %302, %304 : vector<64x128xf32>
    %306 = tpu.iota {dimensions = array<i32: 1>} : vector<64x128xi32>
    %c4_i32_101 = arith.constant 4 : i32
    %307 = vector.broadcast %c4_i32_101 : i32 to vector<64x128xi32>
    %308 = arith.cmpi slt, %306, %307 : vector<64x128xi32>
    %cst_102 = arith.constant -1.000000e+30 : f32
    %309 = vector.broadcast %cst_102 : f32 to vector<64x128xf32>
    %310 = arith.select %308, %305, %309 : vector<64x128xi1>, vector<64x128xf32>
    %cst_103 = arith.constant dense<0xFF800000> : vector<64xf32>
    %311 = vector.multi_reduction <maximumf>, %310, %cst_103 [1] : vector<64x128xf32> to vector<64xf32>
    %312 = vector.shape_cast %311 : vector<64xf32> to vector<64x1xf32>
    %313 = vector.broadcast %312 : vector<64x1xf32> to vector<64x128xf32>
    %314 = arith.subf %310, %313 : vector<64x128xf32>
    %315 = math.exp %314 : vector<64x128xf32>
    %cst_104 = arith.constant dense<0.000000e+00> : vector<64xf32>
    %316 = vector.multi_reduction <add>, %315, %cst_104 [1] : vector<64x128xf32> to vector<64xf32>
    %317 = vector.shape_cast %316 : vector<64xf32> to vector<64x1xf32>
    %318 = tpu.reciprocal %317 {approx = true} : vector<64x1xf32> -> vector<64x1xf32>
    %319 = vector.broadcast %318 : vector<64x1xf32> to vector<64x128xf32>
    %320 = arith.mulf %315, %319 : vector<64x128xf32>
    %c4_i32_105 = arith.constant 4 : i32
    %321 = vector.broadcast %c4_i32_105 : i32 to vector<64x128xi32>
    %322 = arith.cmpi eq, %306, %321 : vector<64x128xi32>
    %323 = arith.select %322, %305, %320 : vector<64x128xi1>, vector<64x128xf32>
    %c0_106 = arith.constant 0 : index
    %c0_107 = arith.constant 0 : index
    %324 = vector.load %arg16[%c0_106, %c0_107] : memref<64x128xf32, #tpu.memory_space<vmem>>, vector<64x128xf32>
    tpu.vector_store %arg16[%c0_106, %c0_107], %323 {strides = array<i32>} : memref<64x128xf32, #tpu.memory_space<vmem>>, vector<64x128xf32>,
    return
  }
}

</mosaic_0001>

<bundles_post_ra>
// kernel: squeeze.5
= control target key start
LH: loop header
LB: loop body
LE: loop exit
PB: predicated region body
PF: predicated region fallthrough
CT: control target
= control target key end

     0   :  { %s67_s8 = smov 104   ;;  %vm8_vm0 = vcmask 64512   ;;  %s68_s11 = smov 112   ;;  %s118_s0 = inlined_call_operand.vmem [shape: f32[64], index: 0, kind: input, shape index: {}]   ;;  %s119_s1 = inlined_call_operand.vmem [shape: f32[8,8], index: 1, kind: output, shape index: {}]  }
   0x1   :  { %v5_v0 = vld [vmem:[%s118_s0] sm:$0x1]  ;;  %s66_s0 = smov 120   ;;  %s69_s12 = smov 96  }
   0x2   :  { %6 = vst [vmem:[#allocation0] sm:$0x1] %v5_v0  ;;  %s70_s13 = smov 88   ;;  %s71_s14 = smov 80  }
   0x3   :  { %s72_s15 = smov 72  }
   0x9   :  { %v10_v1 = vld [vmem:[#allocation0] sm:$0x1]  }
   0xa   :  { %v22_v2 = vld [vmem:[#allocation0] sm:$0x1]   ;;  %11 = vrot.lane.b32.xlu0 %v10_v1, %s66_s0 }
   0xb   :  { %23 = vrot.lane.b32.xlu1 %v22_v2, %s67_s8  ;;  %v16_v3 = vld [vmem:[#allocation0] sm:$0x1]  }
   0xc   :  { %v28_v4 = vld [vmem:[#allocation0] sm:$0x1]  }
   0xd   :  { %v7_v5 = vld [vmem:[#allocation0] sm:$0x1]  }
   0xe   :  { %9 = vst.msk [vmem:[%s119_s1] sm:$0x1] %vm8_vm0, %v7_v5   ;;  %17 = vrot.lane.b32.xlu0 %v16_v3, %s68_s11  ;;  %v34_v6 = vld [vmem:[#allocation0] sm:$0x1]  }
   0xf   :  { %29 = vrot.lane.b32.xlu1 %v28_v4, %s69_s12  ;;  %v40_v7 = vld [vmem:[#allocation0] sm:$0x1]  }
  0x10   :  { %v46_v8 = vld [vmem:[#allocation0] sm:$0x1]  }
  0x12   :  { %35 = vrot.lane.b32.xlu0 %v34_v6, %s70_s13 }
  0x13   :  { %41 = vrot.lane.b32.xlu1 %v40_v7, %s71_s14 }
  0x16   :  { %47 = vrot.lane.b32.xlu0 %v46_v8, %s72_s15 }
  0x7c   :  { %v12_v9 = vpop.permute.xlu0 %11  }
  0x7d   :  { %v24_v10 = vpop.permute.xlu1 %23   ;;  %52 = vst.msk [vmem:[%s119_s1 + $0x1] sm:$0x1] %vm8_vm0, %v12_v9  }
  0x7e   :  { %54 = vst.msk [vmem:[%s119_s1 + $0x3] sm:$0x1] %vm8_vm0, %v24_v10  }
  0x80   :  { %v18_v11 = vpop.permute.xlu0 %17  }
  0x81   :  { %v30_v12 = vpop.permute.xlu1 %29   ;;  %53 = vst.msk [vmem:[%s119_s1 + $0x2] sm:$0x1] %vm8_vm0, %v18_v11  }
  0x82   :  { %55 = vst.msk [vmem:[%s119_s1 + $0x4] sm:$0x1] %vm8_vm0, %v30_v12  }
  0x84   :  { %v36_v13 = vpop.permute.xlu0 %35  }
  0x85   :  { %v42_v14 = vpop.permute.xlu1 %41   ;;  %56 = vst.msk [vmem:[%s119_s1 + $0x5] sm:$0x1] %vm8_vm0, %v36_v13  }
  0x86   :  { %57 = vst.msk [vmem:[%s119_s1 + $0x6] sm:$0x1] %vm8_vm0, %v42_v14  }
  0x88   :  { %v48_v15 = vpop.permute.xlu0 %47  }
  0x89   :  { %58 = vst.msk [vmem:[%s119_s1 + $0x7] sm:$0x1] %vm8_vm0, %v48_v15  }

// kernel: cwto_lstm_forward.1
= control target key start
LH: loop header
LB: loop body
LE: loop exit
PB: predicated region body
PF: predicated region fallthrough
CT: control target
= control target key end

     0   :  { %vm79_vm0 = vcmask 523264   ;;  %vm421_vm1 = vcmask 1043456   ;;  %v5404_v22 = vmov 0.0   ;;  %vm396_vm2 = vcmask 31744   ;;  %s5382_s5 = inlined_call_operand.vmem [shape: f32[64,32], index: 5, kind: input, shape index: {}]   ;;  %s5383_s0 = inlined_call_operand.vmem [shape: f32[64,64], index: 0, kind: input, shape index: {}]   ;;  %s5384_s7 = inlined_call_operand.vmem [shape: f32[32,32], index: 7, kind: input, shape index: {}]   ;;  %s5385_s10 = inlined_call_operand.vmem [shape: f32[4,512], index: 10, kind: input, shape index: {}]   ;;  %s5386_s1 = inlined_call_operand.vmem [shape: f32[64,4], index: 1, kind: input, shape index: {}]   ;;  %s5387_s9 = inlined_call_operand.vmem [shape: f32[32,512], index: 9, kind: input, shape index: {}]   ;;  %s5388_s6 = inlined_call_operand.vmem [shape: f32[1,32], index: 6, kind: input, shape index: {}]   ;;  %s5389_s13 = inlined_call_operand.vmem [shape: f32[128,512], index: 13, kind: input, shape index: {}]   ;;  %s5390_s2 = inlined_call_operand.vmem [shape: f32[64,1], index: 2, kind: input, shape index: {}]   ;;  %s5391_s8 = inlined_call_operand.vmem [shape: f32[1,32], index: 8, kind: input, shape index: {}]   ;;  %s5392_s3 = inlined_call_operand.vmem [shape: f32[8,128], index: 3, kind: input, shape index: {}]   ;;  %s5393_s11 = inlined_call_operand.vmem [shape: f32[1,512], index: 11, kind: input, shape index: {}]   ;;  %s5394_s12 = inlined_call_operand.vmem [shape: f32[1,512], index: 12, kind: input, shape index: {}]   ;;  %s5395_s4 = inlined_call_operand.vmem [shape: f32[8,128], index: 4, kind: input, shape index: {}]   ;;  %s5396_s14 = inlined_call_operand.vmem [shape: f32[128,128], index: 14, kind: input, shape index: {}]   ;;  %s5397_s15 = inlined_call_operand.vmem [shape: f32[1,128], index: 15, kind: input, shape index: {}]   ;;  %s5398_s18 = inlined_call_operand.vmem [shape: f32[8,128], index: 18, kind: output, shape index: {2}]   ;;  %s5399_s17 = inlined_call_operand.vmem [shape: f32[8,128], index: 17, kind: output, shape index: {1}]   ;;  %s5400_s16 = inlined_call_operand.vmem [shape: f32[64,128], index: 16, kind: output, shape index: {0}]  }
   0x1   :  { %5528 = sst [smem:[#allocation87_spill]] %s5382_s5  ;;  %v390_v20 = vld [vmem:[%s5385_s10] sm:$0xff]  ;;  %v3504_v21 = vld [vmem:[%s5385_s10 + $0x8] sm:$0xff]  ;;  %494 = vmatprep.mubr.f32.mxu1 %v5404_v22  ;;  %v3540_v30 = vld [vmem:[%s5386_s1 + $0x10] sm:$0xff]  ;;  %vm228_vm3 = vcmask 261120  }
   0x2   :  { %5529 = sst [smem:[#allocation88_spill]] %s5383_s0  ;;  %v394_v23 = vcombine.high %v390_v20, %v390_v20  ;;  %v395_v24 = vcombine.high %v3504_v21, %v3504_v21  ;;  %v3512_v25 = vld [vmem:[%s5386_s1] sm:$0xff]  ;;  %v379_v26 = vld [vmem:[%s5387_s9 + $0x68] sm:$0xff]  ;;  %v3551_v32 = vld [vmem:[%s5386_s1 + $0x18] sm:$0xff] }
   0x3   :  { %5530 = sst [smem:[#allocation89_spill]] %s5384_s7  ;;  %v378_v27 = vld [vmem:[%s5387_s9 + $0x60] sm:$0xff]  ;;  %v3529_v28 = vld [vmem:[%s5386_s1 + $0x8] sm:$0xff]  ;;  %v388_v38 = vld [vmem:[%s5386_s1 + $0x30] sm:$0xff] }
   0x4   :  { %s5531_s29 = sld [smem:[#allocation87_spill]]  ;;  %2898 = vmatprep.subr.msk.mxu1 %vm421_vm1, %v394_v23  ;;  %v375_v29 = vld [vmem:[%s5387_s9 + $0x48] sm:$0xff]  ;;  %v374_v31 = vld [vmem:[%s5387_s9 + $0x40] sm:$0xff]  ;;  %v381_v51 = vld [vmem:[%s5387_s9 + $0x78] sm:$0xff] }
   0x5   :  { %s5532_s22 = sld [smem:[#allocation88_spill]]  ;;  %2899 = vmatpush1.msk.msra.mxu1 %vm421_vm1, %v390_v20  ;;  %v371_v33 = vld [vmem:[%s5387_s9 + $0x28] sm:$0xff]  ;;  %v3562_v34 = vld [vmem:[%s5386_s1 + $0x20] sm:$0xff]  ;;  %v913_v20 = vld [vmem:[%s5390_s2 + $0x38] sm:$0xff] }
   0x6   :  { %s5533_s23 = sld [smem:[#allocation89_spill]]  ;;  %2900 = vmatmul.mubr.msk.f32.vlgmr.msra.gmra.mxu1 %vm396_vm2, %v3512_v25  ;;  %704 = vmatprep.subr.mxu1 %v379_v26  ;;  %v370_v35 = vld [vmem:[%s5387_s9 + $0x20] sm:$0xff]  ;;  %v387_v36 = vld [vmem:[%s5386_s1 + $0x28] sm:$0xff] }
   0x7   :  { %705 = vmatpush1.msra.mxu1 %v378_v27  ;;  %500 = vmatprep.mubr.f32.mxu1 %v5404_v22  ;;  %v367_v37 = vld [vmem:[%s5387_s9 + $0x8] sm:$0xff]  ;;  %v366_v39 = vld [vmem:[%s5387_s9] sm:$0xff] }
   0x8   :  { %706 = vmatprep.subr.mxu1 %v375_v29  ;;  %v2880_v40 = vld [vmem:[%s5388_s6] ss:$0 sm:$0xff]  ;;  %v3700_v29 = vld [vmem:[%s5389_s13 + $0x1f0] sm:$0xff] }
   0x9   :  { %707 = vmatpush1.msra.mxu1 %v374_v31  ;;  %v3689_v23 = vld [vmem:[%s5391_s8] ss:$0 sm:$0xff]  ;;  %5535 = vst [vmem:[#allocation5_spill] sm:$0xff] %v3700_v29  ;;  %v3706_v31 = vld [vmem:[%s5389_s13 + $0x1c8] sm:$0xff] }
   0xa   :  { %v71_v0 = vld [vmem:[%s5531_s29 + $0x38] sm:$0xff]  ;;  %v70_v1 = vld [vmem:[%s5531_s29 + $0x30] sm:$0xff]  ;;  %v69_v2 = vld [vmem:[%s5531_s29 + $0x28] sm:$0xff]  ;;  %2901 = vmatmul.mubr.msk.f32.gmra.mxu1 %vm396_vm2, %v3529_v28  ;;  %708 = vmatprep.subr.mxu1 %v371_v33  ;;  %5536 = vst [vmem:[#allocation6_spill] sm:$0xff] %v3706_v31 }
   0xb   :  { %3011 = vmatprep.subr.mxu0 %v71_v0  ;;  %v56_v3 = vld [vmem:[%s5532_s22] sm:$0xff]  ;;  %v67_v5 = vld [vmem:[%s5531_s29 + $0x18] sm:$0xff]  ;;  %v66_v6 = vld [vmem:[%s5531_s29 + $0x10] sm:$0xff]  ;;  %506 = vmatprep.mubr.f32.mxu1 %v5404_v22 }
   0xc   :  { %3012 = vmatpush3.msra.mxu0 %v71_v0  ;;  %3027 = vmatprep.mubr.msk.f32.mxu0 %vm79_vm0, %v56_v3  ;;  %v68_v4 = vld [vmem:[%s5531_s29 + $0x20] sm:$0xff]  ;;  %v65_v7 = vld [vmem:[%s5531_s29 + $0x8] sm:$0xff]  ;;  %v220_v10 = vld [vmem:[%s5533_s23 + $0x18] sm:$0xff] }
   0xd   :  { %3013 = vmatprep.subr.mxu0 %v70_v1  ;;  %v64_v8 = vld [vmem:[%s5531_s29] sm:$0xff]  ;;  %v57_v9 = vld [vmem:[%s5532_s22 + $0x8] sm:$0xff]  ;;  %v58_v11 = vld [vmem:[%s5532_s22 + $0x10] sm:$0xff]  ;;  %709 = vmatpush1.msra.mxu1 %v370_v35 }
   0xe   :  { %3014 = vmatpush3.msra.mxu0 %v70_v1  ;;  %v219_v12 = vld [vmem:[%s5533_s23 + $0x10] sm:$0xff]  ;;  %v59_v13 = vld [vmem:[%s5532_s22 + $0x18] sm:$0xff]  ;;  %v218_v14 = vld [vmem:[%s5533_s23 + $0x8] sm:$0xff]  ;;  %2902 = vmatmul.mubr.msk.f32.gmra.mxu1 %vm396_vm2, %v3540_v30 }
   0xf   :  { %3015 = vmatprep.subr.mxu0 %v69_v2  ;;  %v60_v15 = vld [vmem:[%s5532_s22 + $0x20] sm:$0xff]  ;;  %v61_v16 = vld [vmem:[%s5532_s22 + $0x28] sm:$0xff]  ;;  %v62_v17 = vld [vmem:[%s5532_s22 + $0x30] sm:$0xff]  ;;  %512 = vmatprep.mubr.f32.mxu1 %v5404_v22 }
  0x10   :  { %3016 = vmatpush3.msra.mxu0 %v69_v2  ;;  %v63_v18 = vld [vmem:[%s5532_s22 + $0x38] sm:$0xff]  ;;  %v217_v19 = vld [vmem:[%s5533_s23] sm:$0xff]  ;;  %710 = vmatprep.subr.mxu1 %v367_v37  ;;  %v380_v2 = vld [vmem:[%s5387_s9 + $0x70] sm:$0xff] }
  0x11   :  { %3017 = vmatprep.subr.mxu0 %v68_v4  ;;  %711 = vmatpush1.msra.mxu1 %v366_v39  ;;  %v377_v3 = vld [vmem:[%s5387_s9 + $0x58] sm:$0xff]  ;;  %v3718_v33 = vld [vmem:[%s5389_s13 + $0x1c0] sm:$0xff] }
  0x12   :  { %3018 = vmatpush3.msra.mxu0 %v68_v4  ;;  %2903 = vmatmul.mubr.msk.f32.gmra.mxu1 %vm396_vm2, %v3551_v32  ;;  %v389_v4 = vld [vmem:[%s5386_s1 + $0x38] sm:$0xff]  ;;  %5538 = vst [vmem:[#allocation8_spill] sm:$0xff] %v3718_v33 }
  0x13   :  { %3019 = vmatprep.subr.mxu0 %v67_v5  ;;  %518 = vmatprep.mubr.f32.mxu1 %v5404_v22  ;;  %v3746_v39 = vld [vmem:[%s5389_s13 + $0x1b8] sm:$0xff] }
  0x14   :  { %3020 = vmatpush3.msra.mxu0 %v67_v5  ;;  %v376_v5 = vld [vmem:[%s5387_s9 + $0x50] sm:$0xff]  ;;  %5542 = vst [vmem:[#allocation12_spill] sm:$0xff] %v3746_v39 }
  0x15   :  { %3021 = vmatprep.subr.mxu0 %v66_v6 }
  0x16   :  { %3022 = vmatpush3.msra.mxu0 %v66_v6  ;;  %2904 = vmatmul.mubr.msk.f32.gmra.mxu1 %vm396_vm2, %v3562_v34  ;;  %v373_v6 = vld [vmem:[%s5387_s9 + $0x38] sm:$0xff] }
  0x17   :  { %3023 = vmatprep.subr.mxu0 %v65_v7  ;;  %524 = vmatprep.mubr.f32.mxu1 %v5404_v22 }
  0x18   :  { %3024 = vmatpush3.msra.mxu0 %v65_v7  ;;  %v372_v7 = vld [vmem:[%s5387_s9 + $0x30] sm:$0xff] }
  0x19   :  { %3025 = vmatprep.subr.mxu0 %v64_v8 }
  0x1a   :  { %3026 = vmatpush3.msra.mxu0 %v64_v8  ;;  %2905 = vmatmul.mubr.msk.f32.gmra.mxu1 %vm396_vm2, %v387_v36  ;;  %v369_v8 = vld [vmem:[%s5387_s9 + $0x18] sm:$0xff] }
  0x1b   :  { %3028 = vmatmul.mubr.msk.f32.vlgmr.msra.gmra.mxu0 %vm79_vm0, %v57_v9  ;;  %3039 = vmatprep.subr.mxu0 %v220_v10  ;;  %v368_v9 = vld [vmem:[%s5387_s9 + $0x10] sm:$0xff] }
  0x1c   :  { %3030 = vmatprep.mubr.msk.f32.mxu0 %vm79_vm0, %v58_v11  ;;  %3040 = vmatpush3.msra.mxu0 %v220_v10  ;;  %v3653_v10 = vld [vmem:[%s5389_s13 + $0x1e8] sm:$0xff]  ;;  %v3658_v11 = vld [vmem:[%s5389_s13 + $0x1f8] sm:$0xff] }
  0x1d   :  { %3041 = vmatprep.subr.mxu0 %v219_v12  ;;  %530 = vmatprep.mubr.f32.mxu1 %v5404_v22 }
  0x1e   :  { %3042 = vmatpush3.msra.mxu0 %v219_v12  ;;  %2906 = vmatmul.mubr.msk.f32.gmra.mxu1 %vm396_vm2, %v388_v38  ;;  %v3334_v12 = vmov 0  }
  0x1f   :  { %3031 = vmatmul.mubr.msk.f32.gmra.mxu0 %vm79_vm0, %v59_v13  ;;  %3043 = vmatprep.subr.mxu0 %v218_v14  ;;  %v906_v13 = vld [vmem:[%s5390_s2] sm:$0xff] }
  0x20   :  { %3033 = vmatprep.mubr.msk.f32.mxu0 %vm79_vm0, %v60_v15  ;;  %3044 = vmatpush3.msra.mxu0 %v218_v14  ;;  %v908_v14 = vld [vmem:[%s5390_s2 + $0x10] sm:$0xff]  ;;  %v907_v15 = vld [vmem:[%s5390_s2 + $0x8] sm:$0xff] }
  0x21   :  { %3045 = vmatprep.subr.mxu0 %v217_v19  ;;  %536 = vmatprep.mubr.f32.mxu1 %v5404_v22 }
  0x22   :  { %3046 = vmatpush3.msra.mxu0 %v217_v19  ;;  %2907 = vmatmul.mubr.msk.f32.gmra.mxu1 %vm396_vm2, %v389_v4  ;;  %v912_v19 = vld [vmem:[%s5390_s2 + $0x30] sm:$0xff] }
  0x23   :  { %3034 = vmatmul.mubr.msk.f32.gmra.mxu0 %vm79_vm0, %v61_v16  ;;  %2908 = vmatprep.subr.msk.mxu0 %vm421_vm1, %v395_v24  ;;  %v909_v16 = vld [vmem:[%s5390_s2 + $0x18] sm:$0xff] }
  0x24   :  { %3036 = vmatprep.mubr.msk.f32.mxu0 %vm79_vm0, %v62_v17  ;;  %744 = vmatprep.mubr.f32.mxu1 %v5404_v22  ;;  %v910_v17 = vld [vmem:[%s5390_s2 + $0x20] sm:$0xff] }
  0x25   :  { %1199 = vmatprep.subr.mxu1 %v3653_v10  ;;  %3105 = vset.pattern.permute.xlu0 %v3334_v12 }
  0x26   :  { %3106 = vset.pattern.permute.xlu1 %v3334_v12  ;;  %917 = vperm.xlu0 %3105, %v906_v13   ;;  %v3918_v13 = vld [vmem:[%s5389_s13 + $0xf0] sm:$0xff] }
  0x27   :  { %3037 = vmatmul.mubr.msk.f32.gmra.mxu0 %vm79_vm0, %v63_v18  ;;  %927 = vperm.xlu1 %3106, %v908_v14   ;;  %v911_v18 = vld [vmem:[%s5390_s2 + $0x28] sm:$0xff]  ;;  %5568 = vst [vmem:[#allocation38_spill] sm:$0xff] %v3918_v13  ;;  %v3923_v14 = vld [vmem:[%s5389_s13 + $0xc0] sm:$0xff] }
  0x28   :  { %5569 = vst [vmem:[#allocation39_spill] sm:$0xff] %v3923_v14 }
  0x2a   :  { %922 = vperm.xlu0 %3105, %v907_v15   ;;  %v3930_v15 = vld [vmem:[%s5389_s13 + $0xd8] sm:$0xff] }
  0x2b   :  { %932 = vperm.xlu1 %3106, %v909_v16   ;;  %5570 = vst [vmem:[#allocation40_spill] sm:$0xff] %v3930_v15  ;;  %v3937_v16 = vld [vmem:[%s5389_s13 + $0xa8] sm:$0xff] }
  0x2c   :  { %5571 = vst [vmem:[#allocation41_spill] sm:$0xff] %v3937_v16 }
  0x2e   :  { %937 = vperm.xlu0 %3105, %v910_v17  }
  0x2f   :  { %942 = vperm.xlu1 %3106, %v911_v18   ;;  %v3944_v18 = vld [vmem:[%s5389_s13 + $0xd0] sm:$0xff] }
  0x30   :  { %5572 = vst [vmem:[#allocation42_spill] sm:$0xff] %v3944_v18 }
  0x32   :  { %947 = vperm.xlu0 %3105, %v912_v19  }
  0x33   :  { %952 = vperm.xlu1 %3106, %v913_v20   ;;  %v3951_v20 = vld [vmem:[%s5389_s13 + $0xa0] sm:$0xff] }
  0x34   :  { %5573 = vst [vmem:[#allocation43_spill] sm:$0xff] %v3951_v20 }
  0xdb   :  { %v3029_v41 = vpop.f32.mrf.mxu0 }
  0xdc   :  { %v176_v42 = vadd.f32 %v3029_v41, %v2880_v40 }
  0xdd   :  { %v170_v43 = vpop.f32.mrf.mxu0 }
  0xde   :  { %v171_v44 = vadd.f32 %v2880_v40, %v170_v43  ;;  %v210_v48 = vmax.f32 %v176_v42, 0.0  ;;  %v3759_v42 = vld [vmem:[%s5389_s13 + $0x1b0] sm:$0xff]  ;;  %v3764_v43 = vld [vmem:[%s5389_s13 + $0x180] sm:$0xff] }
  0xdf   :  { %v3032_v45 = vpop.f32.mrf.mxu0  ;;  %5544 = vst [vmem:[#allocation14_spill] sm:$0xff] %v3759_v42  ;;  %5545 = vst [vmem:[#allocation15_spill] sm:$0xff] %v3764_v43 }
  0xe0   :  { %v209_v46 = vmax.f32 %v171_v44, 0.0  ;;  %v186_v47 = vadd.f32 %v3032_v45, %v2880_v40  ;;  %v3771_v44 = vld [vmem:[%s5389_s13 + $0x198] sm:$0xff]  ;;  %v3778_v45 = vld [vmem:[%s5389_s13 + $0x168] sm:$0xff] }
  0xe1   :  { %v180_v49 = vpop.f32.mrf.mxu0  ;;  %5546 = vst [vmem:[#allocation16_spill] sm:$0xff] %v3771_v44  ;;  %5547 = vst [vmem:[#allocation17_spill] sm:$0xff] %v3778_v45 }
  0xe2   :  { %v181_v50 = vadd.f32 %v2880_v40, %v180_v49  ;;  %3047 = vmatprep.mubr.msk.f32.mxu0 %vm228_vm3, %v209_v46  ;;  %v212_v52 = vmax.f32 %v186_v47, 0.0  ;;  %v3785_v46 = vld [vmem:[%s5389_s13 + $0x190] sm:$0xff] }
  0xe3   :  { %3048 = vmatmul.mubr.msk.f32.vlgmr.msra.gmra.mxu0 %vm228_vm3, %v210_v48  ;;  %v3035_v53 = vpop.f32.mrf.mxu0  ;;  %5548 = vst [vmem:[#allocation18_spill] sm:$0xff] %v3785_v46  ;;  %v3792_v48 = vld [vmem:[%s5389_s13 + $0x160] sm:$0xff] }
  0xe4   :  { %v211_v54 = vmax.f32 %v181_v50, 0.0  ;;  %v196_v55 = vadd.f32 %v3035_v53, %v2880_v40  ;;  %2909 = vmatpush1.msk.msra.mxu0 %vm421_vm1, %v3504_v21  ;;  %5549 = vst [vmem:[#allocation19_spill] sm:$0xff] %v3792_v48  ;;  %v3799_v50 = vld [vmem:[%s5389_s13 + $0x178] sm:$0xff]  ;;  %v3812_v53 = vld [vmem:[%s5389_s13 + $0x170] sm:$0xff] }
  0xe5   :  { %v190_v56 = vpop.f32.mrf.mxu0  ;;  %817 = vmatprep.subr.mxu0 %v381_v51  ;;  %5550 = vst [vmem:[#allocation20_spill] sm:$0xff] %v3799_v50  ;;  %v3804_v51 = vld [vmem:[%s5389_s13 + $0x148] sm:$0xff]  ;;  %5552 = vst [vmem:[#allocation22_spill] sm:$0xff] %v3812_v53 }
  0xe6   :  { %3050 = vmatprep.mubr.msk.f32.mxu0 %vm228_vm3, %v211_v54  ;;  %v191_v57 = vadd.f32 %v2880_v40, %v190_v56  ;;  %v214_v58 = vmax.f32 %v196_v55, 0.0  ;;  %5551 = vst [vmem:[#allocation21_spill] sm:$0xff] %v3804_v51  ;;  %v3817_v54 = vld [vmem:[%s5389_s13 + $0x140] sm:$0xff]  ;;  %v3824_v55 = vld [vmem:[%s5389_s13 + $0x158] sm:$0xff]  ;;  %v3831_v56 = vld [vmem:[%s5389_s13 + $0x128] sm:$0xff] }
  0xe7   :  { %3051 = vmatmul.mubr.msk.f32.gmra.mxu0 %vm228_vm3, %v212_v52  ;;  %v3038_v59 = vpop.f32.mrf.mxu0  ;;  %5553 = vst [vmem:[#allocation23_spill] sm:$0xff] %v3817_v54  ;;  %5554 = vst [vmem:[#allocation24_spill] sm:$0xff] %v3824_v55 }
  0xe8   :  { %v213_v60 = vmax.f32 %v191_v57, 0.0  ;;  %v206_v61 = vadd.f32 %v3038_v59, %v2880_v40  ;;  %5555 = vst [vmem:[#allocation25_spill] sm:$0xff] %v3831_v56 }
  0xe9   :  { %v200_v62 = vpop.f32.mrf.mxu0 }
  0xea   :  { %3053 = vmatprep.mubr.msk.f32.mxu0 %vm228_vm3, %v213_v60  ;;  %v201_v63 = vadd.f32 %v2880_v40, %v200_v62  ;;  %v216_v0 = vmax.f32 %v206_v61, 0.0  ;;  %v3751_v40 = vld [vmem:[%s5389_s13 + $0x188] sm:$0xff]  ;;  %v3845_v60 = vld [vmem:[%s5389_s13 + $0x120] sm:$0xff]  ;;  %v3852_v61 = vld [vmem:[%s5389_s13 + $0x138] sm:$0xff] }
  0xeb   :  { %3054 = vmatmul.mubr.msk.f32.gmra.mxu0 %vm228_vm3, %v214_v58  ;;  %5543 = vst [vmem:[#allocation13_spill] sm:$0xff] %v3751_v40  ;;  %v3838_v58 = vld [vmem:[%s5389_s13 + $0x150] sm:$0xff]  ;;  %5557 = vst [vmem:[#allocation27_spill] sm:$0xff] %v3845_v60  ;;  %v3857_v62 = vld [vmem:[%s5389_s13 + $0x108] sm:$0xff] }
  0xec   :  { %v215_v1 = vmax.f32 %v201_v63, 0.0  ;;  %5556 = vst [vmem:[#allocation26_spill] sm:$0xff] %v3838_v58  ;;  %5558 = vst [vmem:[#allocation28_spill] sm:$0xff] %v3852_v61 }
  0xed   :  { %5559 = vst [vmem:[#allocation29_spill] sm:$0xff] %v3857_v62 }
  0xee   :  { %3056 = vmatprep.mubr.msk.f32.mxu0 %vm228_vm3, %v215_v1  ;;  %v3870_v1 = vld [vmem:[%s5389_s13 + $0x100] sm:$0xff] }
  0xef   :  { %3057 = vmatmul.mubr.msk.f32.gmra.mxu0 %vm228_vm3, %v216_v0  ;;  %v3865_v0 = vld [vmem:[%s5389_s13 + $0x130] sm:$0xff]  ;;  %5561 = vst [vmem:[#allocation31_spill] sm:$0xff] %v3870_v1 }
  0xf0   :  { %607 = vmatprep.mubr.f32.mxu0 %v5404_v22  ;;  %5560 = vst [vmem:[#allocation30_spill] sm:$0xff] %v3865_v0 }
  0xf3   :  { %2910 = vmatmul.mubr.msk.f32.vlgmr.msra.gmra.mxu0 %vm396_vm2, %v3512_v25 }
  0xf4   :  { %613 = vmatprep.mubr.f32.mxu0 %v5404_v22  ;;  %818 = vmatpush1.msra.mxu0 %v380_v2  ;;  %v3877_v2 = vld [vmem:[%s5389_s13 + $0x118] sm:$0xff] }
  0xf5   :  { %819 = vmatprep.subr.mxu0 %v377_v3  ;;  %5562 = vst [vmem:[#allocation32_spill] sm:$0xff] %v3877_v2  ;;  %v3884_v3 = vld [vmem:[%s5389_s13 + $0xe8] sm:$0xff] }
  0xf6   :  { %820 = vmatpush1.msra.mxu0 %v376_v5  ;;  %5563 = vst [vmem:[#allocation33_spill] sm:$0xff] %v3884_v3 }
  0xf7   :  { %2911 = vmatmul.mubr.msk.f32.gmra.mxu0 %vm396_vm2, %v3529_v28  ;;  %821 = vmatprep.subr.mxu0 %v373_v6  ;;  %v3695_v28 = vld [vmem:[%s5389_s13 + $0x1e0] sm:$0xff] }
  0xf8   :  { %619 = vmatprep.mubr.f32.mxu0 %v5404_v22  ;;  %822 = vmatpush1.msra.mxu0 %v372_v7  ;;  %5534 = vst [vmem:[#allocation4_spill] sm:$0xff] %v3695_v28  ;;  %v3898_v6 = vld [vmem:[%s5389_s13 + $0xe0] sm:$0xff] }
  0xf9   :  { %823 = vmatprep.subr.mxu0 %v369_v8  ;;  %5565 = vst [vmem:[#allocation35_spill] sm:$0xff] %v3898_v6  ;;  %v3905_v8 = vld [vmem:[%s5389_s13 + $0xf8] sm:$0xff] }
  0xfa   :  { %824 = vmatpush1.msra.mxu0 %v368_v9  ;;  %5566 = vst [vmem:[#allocation36_spill] sm:$0xff] %v3905_v8  ;;  %v3910_v9 = vld [vmem:[%s5389_s13 + $0xc8] sm:$0xff] }
  0xfb   :  { %2912 = vmatmul.mubr.msk.f32.gmra.mxu0 %vm396_vm2, %v3540_v30  ;;  %1270 = vmatprep.subr.mxu0 %v3658_v11  ;;  %5567 = vst [vmem:[#allocation37_spill] sm:$0xff] %v3910_v9 }
  0xfc   :  { %625 = vmatprep.mubr.f32.mxu0 %v5404_v22 }
  0xff   :  { %2913 = vmatmul.mubr.msk.f32.gmra.mxu0 %vm396_vm2, %v3551_v32  ;;  %v3711_v32 = vld [vmem:[%s5389_s13 + $0x1d8] sm:$0xff] }
 0x100   :  { %631 = vmatprep.mubr.f32.mxu0 %v5404_v22  ;;  %5537 = vst [vmem:[#allocation7_spill] sm:$0xff] %v3711_v32 }
 0x103   :  { %2914 = vmatmul.mubr.msk.f32.gmra.mxu0 %vm396_vm2, %v3562_v34  ;;  %v3725_v34 = vld [vmem:[%s5389_s13 + $0x1a8] sm:$0xff] }
 0x104   :  { %637 = vmatprep.mubr.f32.mxu0 %v5404_v22  ;;  %5539 = vst [vmem:[#allocation9_spill] sm:$0xff] %v3725_v34 }
 0x107   :  { %2915 = vmatmul.mubr.msk.f32.gmra.mxu0 %vm396_vm2, %v387_v36  ;;  %v3732_v36 = vld [vmem:[%s5389_s13 + $0x1d0] sm:$0xff] }
 0x108   :  { %643 = vmatprep.mubr.f32.mxu0 %v5404_v22  ;;  %5540 = vst [vmem:[#allocation10_spill] sm:$0xff] %v3732_v36 }
 0x10b   :  { %2916 = vmatmul.mubr.msk.f32.gmra.mxu0 %vm396_vm2, %v388_v38  ;;  %v3739_v38 = vld [vmem:[%s5389_s13 + $0x1a0] sm:$0xff] }
 0x10c   :  { %649 = vmatprep.mubr.f32.mxu0 %v5404_v22  ;;  %5541 = vst [vmem:[#allocation11_spill] sm:$0xff] %v3739_v38 }
 0x10f   :  { %2917 = vmatmul.mubr.msk.f32.gmra.mxu0 %vm396_vm2, %v389_v4  ;;  %v3891_v4 = vld [vmem:[%s5389_s13 + $0x110] sm:$0xff] }
 0x110   :  { %857 = vmatprep.mubr.f32.mxu0 %v5404_v22  ;;  %5564 = vst [vmem:[#allocation34_spill] sm:$0xff] %v3891_v4 }
 0x1a3   :  { %v3049_v21 = vpop.f32.mrf.mxu0 }
 0x1a4   :  { %v325_v30 = vadd.f32 %v3049_v21, %v3689_v23  ;;  %v3958_v21 = vld [vmem:[%s5389_s13 + $0xb8] sm:$0xff] }
 0x1a5   :  { %v319_v24 = vpop.f32.mrf.mxu0  ;;  %5574 = vst [vmem:[#allocation44_spill] sm:$0xff] %v3958_v21 }
 0x1a6   :  { %v320_v25 = vadd.f32 %v3689_v23, %v319_v24  ;;  %v359_v37 = vmax.f32 %v325_v30, 0.0  ;;  %v3963_v24 = vld [vmem:[%s5389_s13 + $0x88] sm:$0xff]  ;;  %v3983_v30 = vld [vmem:[%s5389_s13 + $0x98] sm:$0xff] }
 0x1a7   :  { %v3052_v27 = vpop.f32.mrf.mxu0  ;;  %5575 = vst [vmem:[#allocation45_spill] sm:$0xff] %v3963_v24  ;;  %5578 = vst [vmem:[#allocation48_spill] sm:$0xff] %v3983_v30 }
 0x1a8   :  { %v358_v26 = vmax.f32 %v320_v25, 0.0  ;;  %v335_v52 = vadd.f32 %v3052_v27, %v3689_v23  ;;  %v3976_v27 = vld [vmem:[%s5389_s13 + $0x80] sm:$0xff] }
 0x1a9   :  { %v329_v35 = vpop.f32.mrf.mxu0  ;;  %5577 = vst [vmem:[#allocation47_spill] sm:$0xff] %v3976_v27 }
 0x1aa   :  { %2918 = vmatmul.mubr.msk.f32.vlgmr.msra.gmra.mxu1 %vm228_vm3, %v358_v26  ;;  %2926 = vmatmul.mubr.msk.f32.vlgmr.msra.gmra.mxu0 %vm228_vm3, %v358_v26  ;;  %v330_v41 = vadd.f32 %v3689_v23, %v329_v35  ;;  %v361_v59 = vmax.f32 %v335_v52, 0.0  ;;  %v3971_v26 = vld [vmem:[%s5389_s13 + $0xb0] sm:$0xff]  ;;  %v3990_v35 = vld [vmem:[%s5389_s13 + $0x68] sm:$0xff] }
 0x1ab   :  { %1200 = vmatpush1.msra.mxu1 %v3695_v28  ;;  %1271 = vmatpush1.msra.mxu0 %v3700_v29  ;;  %v3055_v49 = vpop.f32.mrf.mxu0  ;;  %5576 = vst [vmem:[#allocation46_spill] sm:$0xff] %v3971_v26  ;;  %5579 = vst [vmem:[#allocation49_spill] sm:$0xff] %v3990_v35  ;;  %v4016_v52 = vld [vmem:[%s5389_s13 + $0x48] sm:$0xff] }
 0x1ac   :  { %1201 = vmatprep.subr.mxu1 %v3706_v31  ;;  %1272 = vmatprep.subr.mxu0 %v3711_v32  ;;  %v360_v47 = vmax.f32 %v330_v41, 0.0  ;;  %v345_v12 = vadd.f32 %v3055_v49, %v3689_v23  ;;  %v4011_v49 = vld [vmem:[%s5389_s13 + $0x78] sm:$0xff]  ;;  %5583 = vst [vmem:[#allocation53_spill] sm:$0xff] %v4016_v52 }
 0x1ad   :  { %1202 = vmatpush1.msra.mxu1 %v3718_v33  ;;  %750 = vmatprep.mubr.f32.mxu1 %v5404_v22  ;;  %v339_v57 = vpop.f32.mrf.mxu0  ;;  %5582 = vst [vmem:[#allocation52_spill] sm:$0xff] %v4011_v49 }
 0x1ae   :  { %863 = vmatprep.mubr.f32.mxu0 %v5404_v22  ;;  %1203 = vmatprep.subr.mxu1 %v3725_v34  ;;  %v340_v63 = vadd.f32 %v3689_v23, %v339_v57  ;;  %v363_v19 = vmax.f32 %v345_v12, 0.0 }
 0x1af   :  { %1273 = vmatpush1.msra.mxu0 %v3732_v36  ;;  %2919 = vmatmul.mubr.msk.f32.gmra.mxu1 %vm228_vm3, %v359_v37  ;;  %v3058_v7 = vpop.f32.mrf.mxu0 }
 0x1b0   :  { %2927 = vmatmul.mubr.msk.f32.gmra.mxu0 %vm228_vm3, %v359_v37  ;;  %1204 = vmatpush1.msra.mxu1 %v3739_v38  ;;  %v362_v5 = vmax.f32 %v340_v63, 0.0  ;;  %v3997_v37 = vld [vmem:[%s5389_s13 + $0x90] sm:$0xff]  ;;  %v355_v57 = vadd.f32 %v3058_v7, %v3689_v23  ;;  %v4029_v63 = vld [vmem:[%s5389_s13 + $0x40] sm:$0xff] }
 0x1b1   :  { %1274 = vmatprep.subr.mxu0 %v3746_v39  ;;  %1205 = vmatprep.subr.mxu1 %v3751_v40  ;;  %v349_v17 = vpop.f32.mrf.mxu0  ;;  %5580 = vst [vmem:[#allocation50_spill] sm:$0xff] %v3997_v37  ;;  %5585 = vst [vmem:[#allocation55_spill] sm:$0xff] %v4029_v63  ;;  %v4050_v7 = vld [vmem:[%s5389_s13 + $0x50] sm:$0xff] }
 0x1b2   :  { %1275 = vmatpush1.msra.mxu0 %v3759_v42  ;;  %1206 = vmatpush1.msra.mxu1 %v3764_v43  ;;  %v350_v25 = vadd.f32 %v3689_v23, %v349_v17  ;;  %v4036_v23 = vld [vmem:[%s5389_s13 + $0x58] sm:$0xff]  ;;  %5588 = vst [vmem:[#allocation58_spill] sm:$0xff] %v4050_v7  ;;  %v365_v12 = vmax.f32 %v355_v57, 0.0  ;;  %v4057_v17 = vld [vmem:[%s5389_s13 + $0x20] sm:$0xff] }
 0x1b3   :  { %1276 = vmatprep.subr.mxu0 %v3771_v44  ;;  %756 = vmatprep.mubr.f32.mxu1 %v5404_v22  ;;  %5586 = vst [vmem:[#allocation56_spill] sm:$0xff] %v4036_v23  ;;  %5589 = vst [vmem:[#allocation59_spill] sm:$0xff] %v4057_v17  ;;  %v4081_v57 = vld [vmem:[%s5389_s13] sm:$0xff] }
 0x1b4   :  { %869 = vmatprep.mubr.f32.mxu0 %v5404_v22  ;;  %1207 = vmatprep.subr.mxu1 %v3778_v45  ;;  %v364_v41 = vmax.f32 %v350_v25, 0.0  ;;  %v4069_v25 = vld [vmem:[%s5389_s13 + $0x8] sm:$0xff]  ;;  %5593 = vst [vmem:[#allocation63_spill] sm:$0xff] %v4081_v57 }
 0x1b5   :  { %1277 = vmatpush1.msra.mxu0 %v3785_v46  ;;  %2920 = vmatmul.mubr.msk.f32.gmra.mxu1 %vm228_vm3, %v360_v47  ;;  %5591 = vst [vmem:[#allocation61_spill] sm:$0xff] %v4069_v25 }
 0x1b6   :  { %2928 = vmatmul.mubr.msk.f32.gmra.mxu0 %vm228_vm3, %v360_v47  ;;  %1208 = vmatpush1.msra.mxu1 %v3792_v48  ;;  %v4004_v47 = vld [vmem:[%s5389_s13 + $0x60] sm:$0xff] }
 0x1b7   :  { %1278 = vmatprep.subr.mxu0 %v3799_v50  ;;  %1209 = vmatprep.subr.mxu1 %v3804_v51  ;;  %5581 = vst [vmem:[#allocation51_spill] sm:$0xff] %v4004_v47 }
 0x1b8   :  { %1279 = vmatpush1.msra.mxu0 %v3812_v53  ;;  %1210 = vmatpush1.msra.mxu1 %v3817_v54 }
 0x1b9   :  { %1280 = vmatprep.subr.mxu0 %v3824_v55  ;;  %762 = vmatprep.mubr.f32.mxu1 %v5404_v22 }
 0x1ba   :  { %875 = vmatprep.mubr.f32.mxu0 %v5404_v22  ;;  %1211 = vmatprep.subr.mxu1 %v3831_v56 }
 0x1bb   :  { %1281 = vmatpush1.msra.mxu0 %v3838_v58  ;;  %2921 = vmatmul.mubr.msk.f32.gmra.mxu1 %vm228_vm3, %v361_v59 }
 0x1bc   :  { %2929 = vmatmul.mubr.msk.f32.gmra.mxu0 %vm228_vm3, %v361_v59  ;;  %1212 = vmatpush1.msra.mxu1 %v3845_v60  ;;  %v4024_v59 = vld [vmem:[%s5389_s13 + $0x70] sm:$0xff] }
 0x1bd   :  { %1282 = vmatprep.subr.mxu0 %v3852_v61  ;;  %1213 = vmatprep.subr.mxu1 %v3857_v62  ;;  %5584 = vst [vmem:[#allocation54_spill] sm:$0xff] %v4024_v59 }
 0x1be   :  { %1283 = vmatpush1.msra.mxu0 %v3865_v0  ;;  %1214 = vmatpush1.msra.mxu1 %v3870_v1 }
 0x1bf   :  { %1284 = vmatprep.subr.mxu0 %v3877_v2  ;;  %768 = vmatprep.mubr.f32.mxu1 %v5404_v22 }
 0x1c0   :  { %881 = vmatprep.mubr.f32.mxu0 %v5404_v22  ;;  %1215 = vmatprep.subr.mxu1 %v3884_v3 }
 0x1c1   :  { %1285 = vmatpush1.msra.mxu0 %v3891_v4  ;;  %2922 = vmatmul.mubr.msk.f32.gmra.mxu1 %vm228_vm3, %v362_v5 }
 0x1c2   :  { %2930 = vmatmul.mubr.msk.f32.gmra.mxu0 %vm228_vm3, %v362_v5  ;;  %1216 = vmatpush1.msra.mxu1 %v3898_v6  ;;  %v4043_v5 = vld [vmem:[%s5389_s13 + $0x28] sm:$0xff] }
 0x1c3   :  { %1286 = vmatprep.subr.mxu0 %v3905_v8  ;;  %1217 = vmatprep.subr.mxu1 %v3910_v9  ;;  %5587 = vst [vmem:[#allocation57_spill] sm:$0xff] %v4043_v5 }
 0x1c4   :  { %1287 = vmatpush1.msra.mxu0 %v3918_v13  ;;  %1218 = vmatpush1.msra.mxu1 %v3923_v14 }
 0x1c5   :  { %1288 = vmatprep.subr.mxu0 %v3930_v15  ;;  %774 = vmatprep.mubr.f32.mxu1 %v5404_v22 }
 0x1c6   :  { %887 = vmatprep.mubr.f32.mxu0 %v5404_v22  ;;  %1219 = vmatprep.subr.mxu1 %v3937_v16 }
 0x1c7   :  { %1289 = vmatpush1.msra.mxu0 %v3944_v18  ;;  %2923 = vmatmul.mubr.msk.f32.gmra.mxu1 %vm228_vm3, %v363_v19 }
 0x1c8   :  { %2931 = vmatmul.mubr.msk.f32.gmra.mxu0 %vm228_vm3, %v363_v19  ;;  %1220 = vmatpush1.msra.mxu1 %v3951_v20  ;;  %v4064_v19 = vld [vmem:[%s5389_s13 + $0x38] sm:$0xff] }
 0x1c9   :  { %1290 = vmatprep.subr.mxu0 %v3958_v21  ;;  %1221 = vmatprep.subr.mxu1 %v3963_v24  ;;  %5590 = vst [vmem:[#allocation60_spill] sm:$0xff] %v4064_v19 }
 0x1ca   :  { %1291 = vmatpush1.msra.mxu0 %v3971_v26  ;;  %1222 = vmatpush1.msra.mxu1 %v3976_v27 }
 0x1cb   :  { %1292 = vmatprep.subr.mxu0 %v3983_v30  ;;  %780 = vmatprep.mubr.f32.mxu1 %v5404_v22 }
 0x1cc   :  { %893 = vmatprep.mubr.f32.mxu0 %v5404_v22  ;;  %1223 = vmatprep.subr.mxu1 %v3990_v35 }
 0x1cd   :  { %1293 = vmatpush1.msra.mxu0 %v3997_v37  ;;  %2924 = vmatmul.mubr.msk.f32.gmra.mxu1 %vm228_vm3, %v364_v41 }
 0x1ce   :  { %2932 = vmatmul.mubr.msk.f32.gmra.mxu0 %vm228_vm3, %v364_v41  ;;  %1224 = vmatpush1.msra.mxu1 %v4004_v47  ;;  %v4076_v41 = vld [vmem:[%s5389_s13 + $0x30] sm:$0xff] }
 0x1cf   :  { %1294 = vmatprep.subr.mxu0 %v4011_v49  ;;  %1225 = vmatprep.subr.mxu1 %v4016_v52  ;;  %5592 = vst [vmem:[#allocation62_spill] sm:$0xff] %v4076_v41 }
 0x1d0   :  { %1295 = vmatpush1.msra.mxu0 %v4024_v59  ;;  %1226 = vmatpush1.msra.mxu1 %v4029_v63 }
 0x1d1   :  { %1296 = vmatprep.subr.mxu0 %v4036_v23  ;;  %786 = vmatprep.mubr.f32.mxu1 %v5404_v22 }
 0x1d2   :  { %899 = vmatprep.mubr.f32.mxu0 %v5404_v22  ;;  %1227 = vmatprep.subr.mxu1 %v4043_v5  ;;  %v4088_v22 = vld [vmem:[%s5389_s13 + $0x18] sm:$0xff]  ;;  %v4095_v5 = vld [vmem:[%s5389_s13 + $0x10] sm:$0xff] }
 0x1d3   :  { %1297 = vmatpush1.msra.mxu0 %v4050_v7  ;;  %2925 = vmatmul.mubr.msk.f32.gmra.mxu1 %vm228_vm3, %v365_v12  ;;  %5594 = vst [vmem:[#allocation64_spill] sm:$0xff] %v4088_v22  ;;  %5595 = vst [vmem:[#allocation65_spill] sm:$0xff] %v4095_v5 }
 0x1d4   :  { %2933 = vmatmul.mubr.msk.f32.gmra.mxu0 %vm228_vm3, %v365_v12  ;;  %1228 = vmatpush1.msra.mxu1 %v4057_v17  ;;  %v1190_v12 = vld [vmem:[%s5392_s3] sm:$0xff]  ;;  %v5596_v17 = vmov 0.0  }
 0x1d5   :  { %1298 = vmatprep.subr.mxu0 %v4064_v19  ;;  %1229 = vmatprep.subr.mxu1 %v4069_v25 }
 0x1d6   :  { %1299 = vmatpush1.msra.mxu0 %v4076_v41  ;;  %1230 = vmatpush1.msra.mxu1 %v4081_v57 }
 0x1d7   :  { %1300 = vmatprep.subr.mxu0 %v4088_v22  ;;  %1263 = vmatprep.mubr.f32.mxu1 %v5596_v17 }
 0x1d8   :  { %1301 = vmatpush1.msra.mxu0 %v4095_v5  ;;  %1334 = vmatprep.mubr.f32.mxu0 %v5596_v17 }
 0x1d9   :  { %1264 = vmatmul.mubr.f32.vlgmr.msra.gmra.mxu1 %v1190_v12  ;;  %1335 = vmatmul.mubr.f32.vlgmr.msra.gmra.mxu0 %v1190_v12  ;;  %v5597_v12 = vld [vmem:[#allocation57_spill] sm:$0xff] }
 0x1da   :  { %1377 = vmatprep.subr.mxu1 %v3653_v10  ;;  %1448 = vmatprep.subr.mxu0 %v3658_v11 }
 0x1db   :  { %1378 = vmatpush1.msra.mxu1 %v3695_v28  ;;  %1449 = vmatpush1.msra.mxu0 %v3700_v29 }
 0x1dc   :  { %1379 = vmatprep.subr.mxu1 %v3706_v31  ;;  %1450 = vmatprep.subr.mxu0 %v3711_v32 }
 0x1dd   :  { %1380 = vmatpush1.msra.mxu1 %v3718_v33  ;;  %1451 = vmatpush1.msra.mxu0 %v3732_v36 }
 0x1de   :  { %1381 = vmatprep.subr.mxu1 %v3725_v34  ;;  %1452 = vmatprep.subr.mxu0 %v3746_v39  ;;  %v928_v34 = vpop.permute.xlu1 %927 }
 0x1df   :  { %1382 = vmatpush1.msra.mxu1 %v3739_v38  ;;  %1453 = vmatpush1.msra.mxu0 %v3759_v42 }
 0x1e0   :  { %1383 = vmatprep.subr.mxu1 %v3751_v40  ;;  %1454 = vmatprep.subr.mxu0 %v3771_v44 }
 0x1e1   :  { %1384 = vmatpush1.msra.mxu1 %v3764_v43  ;;  %1455 = vmatpush1.msra.mxu0 %v3785_v46 }
 0x1e2   :  { %1385 = vmatprep.subr.mxu1 %v3778_v45  ;;  %1456 = vmatprep.subr.mxu0 %v3799_v50 }
 0x1e3   :  { %1386 = vmatpush1.msra.mxu1 %v3792_v48  ;;  %1457 = vmatpush1.msra.mxu0 %v3812_v53 }
 0x1e4   :  { %1387 = vmatprep.subr.mxu1 %v3804_v51  ;;  %1458 = vmatprep.subr.mxu0 %v3824_v55 }
 0x1e5   :  { %1388 = vmatpush1.msra.mxu1 %v3817_v54  ;;  %1459 = vmatpush1.msra.mxu0 %v3838_v58 }
 0x1e6   :  { %1389 = vmatprep.subr.mxu1 %v3831_v56  ;;  %1460 = vmatprep.subr.mxu0 %v3852_v61 }
 0x1e7   :  { %1390 = vmatpush1.msra.mxu1 %v3845_v60  ;;  %1461 = vmatpush1.msra.mxu0 %v3865_v0 }
 0x1e8   :  { %1391 = vmatprep.subr.mxu1 %v3857_v62  ;;  %1462 = vmatprep.subr.mxu0 %v3877_v2  ;;  %v914_v2 = vld [vmem:[%s5393_s11] sm:$0xf] }
 0x1e9   :  { %1392 = vmatpush1.msra.mxu1 %v3870_v1  ;;  %1463 = vmatpush1.msra.mxu0 %v3891_v4 }
 0x1ea   :  { %1393 = vmatprep.subr.mxu1 %v3884_v3  ;;  %1464 = vmatprep.subr.mxu0 %v3905_v8  ;;  %v4227_v8 = vpop.permute.xlu0 %917 }
 0x1eb   :  { %1394 = vmatpush1.msra.mxu1 %v3898_v6  ;;  %1465 = vmatpush1.msra.mxu0 %v3918_v13 }
 0x1ec   :  { %1395 = vmatprep.subr.mxu1 %v3910_v9  ;;  %1466 = vmatprep.subr.mxu0 %v3930_v15  ;;  %v5457_v15 = vlaneseq }
 0x1ed   :  { %1396 = vmatpush1.msra.mxu1 %v3923_v14  ;;  %1467 = vmatpush1.msra.mxu0 %v3944_v18 }
 0x1ee   :  { %1397 = vmatprep.subr.mxu1 %v3937_v16  ;;  %1468 = vmatprep.subr.mxu0 %v3958_v21  ;;  %v957_v6 = vshrl.u32 %v5457_v15, 7  ;;  %v923_v58 = vpop.permute.xlu0 %922 }
 0x1ef   :  { %1398 = vmatpush1.msra.mxu1 %v3951_v20  ;;  %1469 = vmatpush1.msra.mxu0 %v3971_v26 }
 0x1f0   :  { %1399 = vmatprep.subr.mxu1 %v3963_v24  ;;  %1470 = vmatprep.subr.mxu0 %v3983_v30  ;;  %v958_v1 = vsub.s32 0, %v957_v6  ;;  %v966_v62 = vsub.s32 2, %v957_v6  ;;  %v962_v61 = vsub.s32 1, %v957_v6  ;;  %v970_v56 = vsub.s32 3, %v957_v6  ;;  %v1040_v6 = vld [vmem:[%s5394_s12] sm:$0xf] }
 0x1f1   :  { %1400 = vmatpush1.msra.mxu1 %v3976_v27  ;;  %1471 = vmatpush1.msra.mxu0 %v3997_v37  ;;  %v5598_v37 = vld [vmem:[#allocation59_spill] sm:$0xff] }
 0x1f2   :  { %1401 = vmatprep.subr.mxu1 %v3990_v35  ;;  %1472 = vmatprep.subr.mxu0 %v4011_v49  ;;  %v4240_v15 = vrot.slane %v914_v2, %v958_v1  ;;  %v4246_v51 = vrot.slane %v914_v2, %v966_v62  ;;  %v4248_v53 = vrot.slane %v914_v2, %v962_v61 }
 0x1f3   :  { %1402 = vmatpush1.msra.mxu1 %v4004_v47  ;;  %1473 = vmatpush1.msra.mxu0 %v4024_v59  ;;  %v4251_v50 = vrot.slane %v914_v2, %v970_v56  ;;  %v4259_v32 = vrot.slane %v1040_v6, %v958_v1  ;;  %v4261_v28 = vrot.slane %v1040_v6, %v966_v62 }
 0x1f4   :  { %1403 = vmatprep.subr.mxu1 %v4016_v52  ;;  %1474 = vmatprep.subr.mxu0 %v4036_v23  ;;  %v980_v48 = vmul.f32 %v4240_v15, %v923_v58  ;;  %v982_v46 = vmul.f32 %v4246_v51, %v923_v58  ;;  %v981_v40 = vmul.f32 %v4248_v53, %v923_v58 }
 0x1f5   :  { %1404 = vmatpush1.msra.mxu1 %v4029_v63  ;;  %1475 = vmatpush1.msra.mxu0 %v4050_v7  ;;  %v983_v39 = vmul.f32 %v4251_v50, %v923_v58 }
 0x1f6   :  { %1405 = vmatprep.subr.mxu1 %v5597_v12  ;;  %1476 = vmatprep.subr.mxu0 %v4064_v19  ;;  %v4174_v19 = vpop.f32.mrf.mxu0 }
 0x1f7   :  { %1406 = vmatpush1.msra.mxu1 %v5598_v37  ;;  %1477 = vmatpush1.msra.mxu0 %v4076_v41  ;;  %v4176_v37 = vpop.f32.mrf.mxu1 }
 0x1f8   :  { %1407 = vmatprep.subr.mxu1 %v4069_v25  ;;  %1478 = vmatprep.subr.mxu0 %v4088_v22  ;;  %v4178_v41 = vpop.f32.mrf.mxu0 }
 0x1f9   :  { %1408 = vmatpush1.msra.mxu1 %v4081_v57  ;;  %1441 = vmatprep.mubr.f32.mxu1 %v5596_v17  ;;  %v4180_v25 = vpop.f32.mrf.mxu1 }
 0x1fa   :  { %1479 = vmatpush1.msra.mxu0 %v4095_v5  ;;  %1512 = vmatprep.mubr.f32.mxu0 %v5596_v17  ;;  %v615_v22 = vpop.f32.mrf.mxu0 }
 0x1fb   :  { %1556 = vmatprep.subr.mxu1 %v3653_v10  ;;  %1627 = vmatprep.subr.mxu0 %v3658_v11  ;;  %v502_v57 = vpop.f32.mrf.mxu1 }
 0x1fc   :  { %v617_v12 = vpop.f32.mrf.mxu0 }
 0x1fd   :  { %v504_v7 = vpop.f32.mrf.mxu1 }
 0x1fe   :  { %v4182_v63 = vpop.f32.mrf.mxu0 }
 0x1ff   :  { %v4184_v5 = vpop.f32.mrf.mxu1 }
 0x200   :  { %v4186_v17 = vpop.f32.mrf.mxu0 }
 0x201   :  { %v4188_v10 = vpop.f32.mrf.mxu1 }
 0x202   :  { %v4190_v11 = vpop.f32.mrf.mxu0 }
 0x203   :  { %v4192_v23 = vpop.f32.mrf.mxu1 }
 0x204   :  { %v4194_v52 = vpop.f32.mrf.mxu0 }
 0x205   :  { %v4196_v59 = vpop.f32.mrf.mxu1 }
 0x206   :  { %v4198_v47 = vpop.f32.mrf.mxu0 }
 0x207   :  { %v4200_v49 = vpop.f32.mrf.mxu1 }
 0x208   :  { %v4202_v35 = vpop.f32.mrf.mxu0 }
 0x209   :  { %v4204_v27 = vpop.f32.mrf.mxu1 }
 0x20a   :  { %v4206_v30 = vpop.f32.mrf.mxu0 }
 0x20b   :  { %v4208_v24 = vpop.f32.mrf.mxu1 }
 0x20c   :  { %v4210_v26 = vpop.f32.mrf.mxu0 }
 0x20d   :  { %v4212_v20 = vpop.f32.mrf.mxu1 }
 0x20e   :  { %v4214_v21 = vpop.f32.mrf.mxu0 }
 0x20f   :  { %v4216_v16 = vpop.f32.mrf.mxu1 }
 0x210   :  { %v4218_v18 = vpop.f32.mrf.mxu0 }
 0x211   :  { %v4220_v14 = vpop.f32.mrf.mxu1 }
 0x212   :  { %v4222_v9 = vpop.f32.mrf.mxu0 }
 0x213   :  { %v4224_v13 = vpop.f32.mrf.mxu1 }
 0x214   :  { %v4229_v3 = vpop.f32.mrf.mxu0 }
 0x215   :  { %v4231_v4 = vpop.f32.mrf.mxu1 }
 0x26a   :  { %v4236_v0 = vpop.f32.mrf.mxu1  ;;  %v4238_v60 = vpop.f32.mrf.mxu0 }
 0x26b   :  { %5599 = vst [vmem:[#allocation66_spill] sm:$0xff] %v4238_v60 }
 0x26c   :  { %v4242_v54 = vpop.f32.mrf.mxu1  ;;  %v4244_v55 = vpop.f32.mrf.mxu0 }
 0x26f   :  { %v752_v45 = vpop.f32.mrf.mxu1 }
 0x270   :  { %v753_v43 = vadd.f32 %v752_v45, %v502_v57  ;;  %v865_v44 = vpop.f32.mrf.mxu0  ;;  %v984_v45 = vmul.f32 %v4240_v15, %v928_v34  ;;  %v4264_v57 = vrot.slane %v1040_v6, %v962_v61 }
 0x271   :  { %v866_v42 = vadd.f32 %v865_v44, %v615_v22  ;;  %v754_v38 = vpop.f32.mrf.mxu1 }
 0x272   :  { %v1012_v36 = vadd.f32 %v980_v48, %v753_v43  ;;  %v755_v33 = vadd.f32 %v754_v38, %v504_v7  ;;  %v867_v2 = vpop.f32.mrf.mxu0  ;;  %v986_v43 = vmul.f32 %v4246_v51, %v928_v34  ;;  %v4270_v38 = vrot.slane %v1040_v6, %v970_v56 }
 0x273   :  { %v1014_v31 = vadd.f32 %v982_v46, %v866_v42  ;;  %v868_v29 = vadd.f32 %v867_v2, %v617_v12 }
 0x274   :  { %v1013_v60 = vadd.f32 %v981_v40, %v755_v33  ;;  %v4267_v22 = vadd.f32 %v4259_v32, %v1012_v36  ;;  %v985_v33 = vmul.f32 %v4248_v53, %v928_v34 }
 0x275   :  { %v1015_v44 = vadd.f32 %v983_v39, %v868_v29  ;;  %v758_v58 = vpop.f32.mrf.mxu1  ;;  %v4273_v48 = vadd.f32 %v4261_v28, %v1014_v31  ;;  %v987_v29 = vmul.f32 %v4251_v50, %v928_v34  ;;  %v933_v39 = vpop.permute.xlu1 %932 }
 0x276   :  { %v759_v42 = vadd.f32 %v758_v58, %v4184_v5  ;;  %v871_v46 = vpop.f32.mrf.mxu0  ;;  %v4278_v40 = vadd.f32 %v4264_v57, %v1013_v60  ;;  %v988_v60 = vmul.f32 %v4240_v15, %v933_v39  ;;  %v990_v34 = vmul.f32 %v4246_v51, %v933_v39 }
 0x277   :  { %v872_v36 = vadd.f32 %v871_v46, %v4182_v63  ;;  %v760_v61 = vpop.f32.mrf.mxu1  ;;  %v4283_v56 = vadd.f32 %v4270_v38, %v1015_v44  ;;  %v989_v58 = vmul.f32 %v4248_v53, %v933_v39  ;;  %v991_v46 = vmul.f32 %v4251_v50, %v933_v39 }
 0x278   :  { %v1016_v62 = vadd.f32 %v984_v45, %v759_v42  ;;  %v761_v31 = vadd.f32 %v760_v61, %v4188_v10  ;;  %v873_v1 = vpop.f32.mrf.mxu0 }
 0x279   :  { %v1018_v5 = vadd.f32 %v986_v43, %v872_v36  ;;  %v874_v7 = vadd.f32 %v873_v1, %v4186_v17 }
 0x27a   :  { %v1017_v12 = vadd.f32 %v985_v33, %v761_v31  ;;  %v4289_v6 = vadd.f32 %v4259_v32, %v1016_v62  ;;  %v938_v33 = vpop.permute.xlu0 %937 }
 0x27b   :  { %v1019_v63 = vadd.f32 %v987_v29, %v874_v7  ;;  %v764_v2 = vpop.f32.mrf.mxu1  ;;  %v4293_v44 = vadd.f32 %v4261_v28, %v1018_v5  ;;  %v992_v5 = vmul.f32 %v4240_v15, %v938_v33  ;;  %v994_v39 = vmul.f32 %v4246_v51, %v938_v33 }
 0x27c   :  { %v765_v45 = vadd.f32 %v764_v2, %v4192_v23  ;;  %v877_v10 = vpop.f32.mrf.mxu0  ;;  %v4298_v17 = vadd.f32 %v4264_v57, %v1017_v12  ;;  %v993_v2 = vmul.f32 %v4248_v53, %v938_v33 }
 0x27d   :  { %v878_v43 = vadd.f32 %v877_v10, %v4190_v11  ;;  %v766_v42 = vpop.f32.mrf.mxu1  ;;  %v4303_v36 = vadd.f32 %v4270_v38, %v1019_v63  ;;  %v995_v10 = vmul.f32 %v4251_v50, %v938_v33 }
 0x27e   :  { %v1020_v61 = vadd.f32 %v988_v60, %v765_v45  ;;  %v767_v29 = vadd.f32 %v766_v42, %v4196_v59  ;;  %v879_v62 = vpop.f32.mrf.mxu0 }
 0x27f   :  { %v1022_v23 = vadd.f32 %v990_v34, %v878_v43  ;;  %v880_v31 = vadd.f32 %v879_v62, %v4194_v52 }
 0x280   :  { %v1021_v1 = vadd.f32 %v989_v58, %v767_v29  ;;  %v4309_v7 = vadd.f32 %v4259_v32, %v1020_v61  ;;  %v943_v58 = vpop.permute.xlu1 %942 }
 0x281   :  { %v1023_v11 = vadd.f32 %v991_v46, %v880_v31  ;;  %v770_v12 = vpop.f32.mrf.mxu1  ;;  %v4313_v63 = vadd.f32 %v4261_v28, %v1022_v23  ;;  %v996_v23 = vmul.f32 %v4240_v15, %v943_v58  ;;  %v998_v33 = vmul.f32 %v4246_v51, %v943_v58 }
 0x282   :  { %5600 = vst [vmem:[#allocation67_spill] sm:$0xff] %v4309_v7  ;;  %v771_v60 = vadd.f32 %v770_v12, %v4200_v49  ;;  %v883_v59 = vpop.f32.mrf.mxu0  ;;  %v4318_v52 = vadd.f32 %v4264_v57, %v1021_v1  ;;  %v997_v12 = vmul.f32 %v4248_v53, %v943_v58  ;;  %v4802_v7 = vld [vmem:[%s5389_s13 + $0x78] sm:$0xff] }
 0x283   :  { %5601 = vst [vmem:[#allocation68_spill] sm:$0xff] %v4313_v63  ;;  %v884_v34 = vadd.f32 %v883_v59, %v4198_v47  ;;  %v772_v45 = vpop.f32.mrf.mxu1  ;;  %v4323_v43 = vadd.f32 %v4270_v38, %v1023_v11  ;;  %v999_v59 = vmul.f32 %v4251_v50, %v943_v58  ;;  %v4784_v63 = vld [vmem:[%s5389_s13 + $0x80] sm:$0xff] }
 0x284   :  { %5602 = vst [vmem:[#allocation69_spill] sm:$0xff] %v4318_v52  ;;  %v1024_v42 = vadd.f32 %v992_v5, %v771_v60  ;;  %v773_v46 = vadd.f32 %v772_v45, %v4204_v27  ;;  %v885_v61 = vpop.f32.mrf.mxu0  ;;  %v4796_v52 = vld [vmem:[%s5389_s13 + $0x68] sm:$0xff] }
 0x285   :  { %5603 = vst [vmem:[#allocation70_spill] sm:$0xff] %v4323_v43  ;;  %v1026_v49 = vadd.f32 %v994_v39, %v884_v34  ;;  %v886_v29 = vadd.f32 %v885_v61, %v4202_v35  ;;  %v4790_v43 = vld [vmem:[%s5389_s13 + $0x90] sm:$0xff] }
 0x286   :  { %v1025_v62 = vadd.f32 %v993_v2, %v773_v46  ;;  %v4329_v31 = vadd.f32 %v4259_v32, %v1024_v42  ;;  %v948_v2 = vpop.permute.xlu0 %947 }
 0x287   :  { %v1027_v47 = vadd.f32 %v995_v10, %v886_v29  ;;  %v776_v1 = vpop.f32.mrf.mxu1  ;;  %v4333_v11 = vadd.f32 %v4261_v28, %v1026_v49  ;;  %v1000_v49 = vmul.f32 %v4240_v15, %v948_v2  ;;  %v1002_v58 = vmul.f32 %v4246_v51, %v948_v2 }
 0x288   :  { %5604 = vst [vmem:[#allocation71_spill] sm:$0xff] %v4329_v31  ;;  %v777_v5 = vadd.f32 %v776_v1, %v4208_v24  ;;  %v889_v27 = vpop.f32.mrf.mxu0  ;;  %v4338_v35 = vadd.f32 %v4264_v57, %v1025_v62  ;;  %v1001_v1 = vmul.f32 %v4248_v53, %v948_v2  ;;  %v4778_v31 = vld [vmem:[%s5389_s13 + $0x98] sm:$0xff] }
 0x289   :  { %5605 = vst [vmem:[#allocation72_spill] sm:$0xff] %v4333_v11  ;;  %v890_v39 = vadd.f32 %v889_v27, %v4206_v30  ;;  %v778_v60 = vpop.f32.mrf.mxu1  ;;  %v4343_v34 = vadd.f32 %v4270_v38, %v1027_v47  ;;  %v1003_v27 = vmul.f32 %v4251_v50, %v948_v2  ;;  %v4760_v11 = vld [vmem:[%s5389_s13 + $0xa0] sm:$0xff] }
 0x28a   :  { %5606 = vst [vmem:[#allocation73_spill] sm:$0xff] %v4338_v35  ;;  %v1028_v45 = vadd.f32 %v996_v23, %v777_v5  ;;  %v779_v10 = vadd.f32 %v778_v60, %v4212_v20  ;;  %v891_v42 = vpop.f32.mrf.mxu0  ;;  %v747_v60 = vadd.f32 %v4236_v0, %v4176_v37  ;;  %v4772_v35 = vld [vmem:[%s5389_s13 + $0x88] sm:$0xff] }
 0x28b   :  { %5607 = vst [vmem:[#allocation74_spill] sm:$0xff] %v4343_v34  ;;  %v1030_v24 = vadd.f32 %v998_v33, %v890_v39  ;;  %v892_v46 = vadd.f32 %v891_v42, %v4210_v26  ;;  %v4766_v34 = vld [vmem:[%s5389_s13 + $0xb0] sm:$0xff] }
 0x28c   :  { %v1029_v61 = vadd.f32 %v997_v12, %v779_v10  ;;  %v4349_v29 = vadd.f32 %v4259_v32, %v1028_v45  ;;  %v953_v12 = vpop.permute.xlu1 %952 }
 0x28d   :  { %v1031_v30 = vadd.f32 %v999_v59, %v892_v46  ;;  %v782_v62 = vpop.f32.mrf.mxu1  ;;  %v4353_v47 = vadd.f32 %v4261_v28, %v1030_v24  ;;  %v749_v24 = vadd.f32 %v4242_v54, %v4180_v25 }
 0x28e   :  { %5608 = vst [vmem:[#allocation75_spill] sm:$0xff] %v4349_v29  ;;  %v783_v23 = vadd.f32 %v782_v62, %v4216_v16  ;;  %v895_v20 = vpop.f32.mrf.mxu0  ;;  %v4358_v26 = vadd.f32 %v4264_v57, %v1029_v61  ;;  %v976_v16 = vmul.f32 %v4240_v15, %v4227_v8  ;;  %v1004_v61 = vmul.f32 %v4240_v15, %v953_v12  ;;  %v4754_v29 = vld [vmem:[%s5389_s13 + $0xb8] sm:$0xff] }
 0x28f   :  { %5609 = vst [vmem:[#allocation76_spill] sm:$0xff] %v4353_v47  ;;  %v896_v33 = vadd.f32 %v895_v20, %v4214_v21  ;;  %v784_v5 = vpop.f32.mrf.mxu1  ;;  %v4363_v39 = vadd.f32 %v4270_v38, %v1031_v30  ;;  %v977_v21 = vmul.f32 %v4248_v53, %v4227_v8  ;;  %v1007_v20 = vmul.f32 %v4251_v50, %v953_v12  ;;  %v4736_v47 = vld [vmem:[%s5389_s13 + $0xc0] sm:$0xff] }
 0x290   :  { %5610 = vst [vmem:[#allocation77_spill] sm:$0xff] %v4358_v26  ;;  %v1032_v59 = vadd.f32 %v1000_v49, %v783_v23  ;;  %v785_v45 = vadd.f32 %v784_v5, %v4220_v14  ;;  %v897_v10 = vpop.f32.mrf.mxu0  ;;  %v1006_v14 = vmul.f32 %v4246_v51, %v953_v12  ;;  %v1008_v62 = vadd.f32 %v976_v16, %v747_v60  ;;  %v4748_v26 = vld [vmem:[%s5389_s13 + $0xa8] sm:$0xff] }
 0x291   :  { %5611 = vst [vmem:[#allocation78_spill] sm:$0xff] %v4363_v39  ;;  %v1034_v42 = vadd.f32 %v1002_v58, %v896_v33  ;;  %v898_v2 = vadd.f32 %v897_v10, %v4218_v18  ;;  %v1005_v23 = vmul.f32 %v4248_v53, %v953_v12  ;;  %v1009_v33 = vadd.f32 %v977_v21, %v749_v24  ;;  %v4742_v39 = vld [vmem:[%s5389_s13 + $0xd0] sm:$0xff] }
 0x292   :  { %v1033_v46 = vadd.f32 %v1001_v1, %v785_v45  ;;  %v4377_v0 = vadd.f32 %v4259_v32, %v1032_v59  ;;  %v1062_v59 = vadd.f32 %v4259_v32, %v1008_v62 }
 0x293   :  { %v1035_v37 = vadd.f32 %v1003_v27, %v898_v2  ;;  %v788_v49 = vpop.f32.mrf.mxu1  ;;  %v4381_v30 = vadd.f32 %v4261_v28, %v1034_v42  ;;  %v1063_v21 = vadd.f32 %v4264_v57, %v1009_v33  ;;  %v979_v2 = vmul.f32 %v4251_v50, %v4227_v8 }
 0x294   :  { %5612 = vst [vmem:[#allocation79_spill] sm:$0xff] %v4377_v0  ;;  %v789_v58 = vadd.f32 %v788_v49, %v4224_v13  ;;  %v901_v18 = vpop.f32.mrf.mxu0  ;;  %v4386_v54 = vadd.f32 %v4264_v57, %v1033_v46  ;;  %v4730_v0 = vld [vmem:[%s5389_s13 + $0xd8] sm:$0xff] }
 0x295   :  { %5613 = vst [vmem:[#allocation80_spill] sm:$0xff] %v4381_v30  ;;  %v902_v15 = vadd.f32 %v901_v18, %v4222_v9  ;;  %v790_v25 = vpop.f32.mrf.mxu1  ;;  %v4391_v1 = vadd.f32 %v4270_v38, %v1035_v37  ;;  %v4712_v30 = vld [vmem:[%s5389_s13 + $0xe0] sm:$0xff] }
 0x296   :  { %5614 = vst [vmem:[#allocation81_spill] sm:$0xff] %v4386_v54  ;;  %v1036_v5 = vadd.f32 %v1004_v61, %v789_v58  ;;  %v791_v27 = vadd.f32 %v790_v25, %v4231_v4  ;;  %v903_v60 = vpop.f32.mrf.mxu0  ;;  %v4724_v54 = vld [vmem:[%s5389_s13 + $0xc8] sm:$0xff] }
 0x297   :  { %5615 = vst [vmem:[#allocation82_spill] sm:$0xff] %v4391_v1  ;;  %v1038_v13 = vadd.f32 %v1006_v14, %v902_v15  ;;  %v904_v16 = vadd.f32 %v903_v60, %v4229_v3  ;;  %v862_v3 = vadd.f32 %v4244_v55, %v4178_v41  ;;  %v978_v55 = vmul.f32 %v4246_v51, %v4227_v8  ;;  %v1191_v51 = vld [vmem:[%s5395_s4] sm:$0xff]  ;;  %v4718_v1 = vld [vmem:[%s5389_s13 + $0xf0] sm:$0xff] }
 0x298   :  { %v1037_v53 = vadd.f32 %v1005_v23, %v791_v27  ;;  %v4397_v45 = vadd.f32 %v4259_v32, %v1036_v5 }
 0x299   :  { %v1039_v9 = vadd.f32 %v1007_v20, %v904_v16  ;;  %v1265_v10 = vpop.f32.mrf.mxu1  ;;  %v4400_v12 = vadd.f32 %v4261_v28, %v1038_v13  ;;  %v1336_v37 = vpop.f32.mrf.mxu0  ;;  %v1011_v14 = vadd.f32 %v979_v2, %v862_v3  ;;  %v5624_v3 = vld [vmem:[#allocation6_spill] sm:$0xff]  ;;  %v5625_v2 = vld [vmem:[#allocation7_spill] sm:$0xff] }
 0x29a   :  { %5616 = vst [vmem:[#allocation83_spill] sm:$0xff] %v4397_v45  ;;  %v1341_v42 = vadd.f32 %v1265_v10, %v1062_v59  ;;  %v4404_v4 = vadd.f32 %v4264_v57, %v1037_v53  ;;  %v5620_v57 = vld [vmem:[#allocation66_spill] sm:$0xff]  ;;  %5688 = vst [vmem:[#allocation7_spill] sm:$0xff] %v4784_v63 }
 0x29b   :  { %5617 = vst [vmem:[#allocation84_spill] sm:$0xff] %v4400_v12  ;;  %v1267_v24 = vpop.f32.mrf.mxu1  ;;  %v4411_v32 = vadd.f32 %v4270_v38, %v1039_v9  ;;  %v860_v62 = vadd.f32 %v5620_v57, %v4174_v19  ;;  %v1338_v41 = vpop.f32.mrf.mxu0  ;;  %v1065_v50 = vadd.f32 %v4270_v38, %v1011_v14  ;;  %v5631_v14 = vld [vmem:[#allocation14_spill] sm:$0xff]  ;;  %v5632_v57 = vld [vmem:[#allocation13_spill] sm:$0xff] }
 0x29c   :  { %5618 = vst [vmem:[#allocation85_spill] sm:$0xff] %v4404_v4  ;;  %v2934_v46 = vmul.f32 -1.442695, %v1341_v42  ;;  %v1342_v61 = vadd.f32 %v1267_v24, %v1063_v21  ;;  %v5622_v42 = vld [vmem:[#allocation4_spill] sm:$0xff]  ;;  %v5623_v21 = vld [vmem:[#allocation5_spill] sm:$0xff]  ;;  %v4694_v45 = vld [vmem:[%s5389_s13 + $0x110] sm:$0xff] }
 0x29d   :  { %5619 = vst [vmem:[#allocation86_spill] sm:$0xff] %v4411_v32  ;;  %v1010_v58 = vadd.f32 %v978_v55, %v860_v62  ;;  %v1344_v18 = vadd.f32 %v1338_v41, %v1065_v50  ;;  %v5626_v24 = vld [vmem:[#allocation8_spill] sm:$0xff]  ;;  %v5634_v55 = vld [vmem:[#allocation15_spill] sm:$0xff]  ;;  %v5635_v41 = vld [vmem:[#allocation18_spill] sm:$0xff] }
 0x29e   :  { %3109 = vpow2.f32 %v2934_v46  ;;  %v2935_v49 = vmul.f32 -1.442695, %v1342_v61  ;;  %v5627_v46 = vld [vmem:[#allocation10_spill] sm:$0xff]  ;;  %v5628_v61 = vld [vmem:[#allocation9_spill] sm:$0xff]  ;;  %v5633_v62 = vld [vmem:[#allocation16_spill] sm:$0xff]  ;;  %5689 = vst [vmem:[#allocation8_spill] sm:$0xff] %v4790_v43 }
 0x29f   :  { %v1064_v23 = vadd.f32 %v4261_v28, %v1010_v58  ;;  %v2936_v15 = vmul.f32 -1.442695, %v1344_v18  ;;  %v5636_v50 = vld [vmem:[#allocation17_spill] sm:$0xff]  ;;  %v5637_v58 = vld [vmem:[#allocation20_spill] sm:$0xff]  ;;  %v5638_v18 = vld [vmem:[#allocation19_spill] sm:$0xff]  ;;  %5690 = vst [vmem:[#allocation10_spill] sm:$0xff] %v4796_v52 }
 0x2a0   :  { %3111 = vpow2.f32 %v2935_v49  ;;  %v5630_v49 = vld [vmem:[#allocation11_spill] sm:$0xff]  ;;  %v4676_v12 = vld [vmem:[%s5389_s13 + $0x108] sm:$0xff]  ;;  %v4688_v4 = vld [vmem:[%s5389_s13 + $0x100] sm:$0xff]  ;;  %5691 = vst [vmem:[#allocation9_spill] sm:$0xff] %v4802_v7 }
 0x2a1   :  { %v1343_v20 = vadd.f32 %v1336_v37, %v1064_v23  ;;  %3113 = vpow2.f32 %v2936_v15  ;;  %v5629_v37 = vld [vmem:[#allocation12_spill] sm:$0xff]  ;;  %v5639_v23 = vld [vmem:[#allocation22_spill] sm:$0xff]  ;;  %v5640_v15 = vld [vmem:[#allocation21_spill] sm:$0xff] }
 0x2a2   :  { %v4682_v32 = vld [vmem:[%s5389_s13 + $0x118] sm:$0xff] }
 0x2ab   :  { %v3110_v25 = vpop.eup %3109 }
 0x2ac   :  { %v1348_v33 = vadd.f32 1.0, %v3110_v25  ;;  %v5641_v25 = vld [vmem:[#allocation24_spill] sm:$0xff] }
 0x2ad   :  { %v3112_v5 = vpop.eup %3111 }
 0x2ae   :  { %3115 = vrcp.f32 %v1348_v33  ;;  %v1354_v27 = vadd.f32 1.0, %v3112_v5  ;;  %v3114_v19 = vpop.eup %3113  ;;  %v5643_v33 = vld [vmem:[#allocation26_spill] sm:$0xff]  ;;  %v5644_v5 = vld [vmem:[#allocation25_spill] sm:$0xff] }
 0x2af   :  { %3117 = vtanh.f32 %v1343_v20  ;;  %v1361_v13 = vadd.f32 1.0, %v3114_v19  ;;  %v5642_v20 = vld [vmem:[#allocation23_spill] sm:$0xff] }
 0x2b0   :  { %3119 = vrcp.f32 %v1354_v27  ;;  %v5645_v27 = vld [vmem:[#allocation28_spill] sm:$0xff]  ;;  %v5646_v19 = vld [vmem:[#allocation27_spill] sm:$0xff] }
 0x2b1   :  { %3121 = vrcp.f32 %v1361_v13  ;;  %v5651_v13 = vld [vmem:[#allocation34_spill] sm:$0xff] }
 0x2bb   :  { %v3116_v60 = vpop.eup %3115 }
 0x2bc   :  { %v3118_v8 = vpop.eup %3117 }
 0x2bd   :  { %v3120_v38 = vpop.eup %3119  ;;  %v1365_v28 = vmul.f32 %v3118_v8, %v3116_v60  ;;  %v5647_v60 = vld [vmem:[#allocation30_spill] sm:$0xff]  ;;  %v5649_v8 = vld [vmem:[#allocation32_spill] sm:$0xff] }
 0x2be   :  { %v1364_v16 = vmul.f32 %v3120_v38, %v1191_v51  ;;  %v3122_v59 = vpop.eup %3121  ;;  %v5648_v51 = vld [vmem:[#allocation29_spill] sm:$0xff]  ;;  %v5650_v38 = vld [vmem:[#allocation31_spill] sm:$0xff] }
 0x2c0   :  { %v4422_v53 = vadd.f32 %v1365_v28, %v1364_v16  ;;  %v5652_v28 = vld [vmem:[#allocation33_spill] sm:$0xff]  ;;  %v5653_v16 = vld [vmem:[#allocation36_spill] sm:$0xff] }
 0x2c2   :  { %3123 = vtanh.f32 %v4422_v53 }
 0x2cf   :  { %v3124_v9 = vpop.eup %3123 }
 0x2d0   :  { %v4425_v10 = vmul.f32 %v3124_v9, %v3122_v59  ;;  %v5654_v59 = vld [vmem:[#allocation35_spill] sm:$0xff]  ;;  %v5655_v9 = vld [vmem:[#allocation38_spill] sm:$0xff] }
 0x2d2   :  { %5621 = vst [vmem:[#allocation66_spill] sm:$0xff] %v4425_v10  ;;  %1442 = vmatmul.mubr.f32.vlgmr.msra.gmra.mxu1 %v4425_v10  ;;  %1513 = vmatmul.mubr.f32.vlgmr.msra.gmra.mxu0 %v4425_v10  ;;  %v4706_v10 = vld [vmem:[%s5389_s13 + $0xf8] sm:$0xff] }
 0x2d3   :  { %1557 = vmatpush1.msra.mxu1 %v5622_v42  ;;  %1628 = vmatpush1.msra.mxu0 %v5623_v21  ;;  %v5656_v42 = vld [vmem:[#allocation37_spill] sm:$0xff]  ;;  %v5657_v21 = vld [vmem:[#allocation40_spill] sm:$0xff] }
 0x2d4   :  { %1558 = vmatprep.subr.mxu1 %v5624_v3  ;;  %1629 = vmatprep.subr.mxu0 %v5625_v2  ;;  %v5658_v3 = vld [vmem:[#allocation39_spill] sm:$0xff]  ;;  %v5659_v2 = vld [vmem:[#allocation42_spill] sm:$0xff] }
 0x2d5   :  { %1559 = vmatpush1.msra.mxu1 %v5626_v24  ;;  %1630 = vmatpush1.msra.mxu0 %v5627_v46  ;;  %v5660_v24 = vld [vmem:[#allocation41_spill] sm:$0xff]  ;;  %v5661_v46 = vld [vmem:[#allocation44_spill] sm:$0xff] }
 0x2d6   :  { %1560 = vmatprep.subr.mxu1 %v5628_v61  ;;  %1631 = vmatprep.subr.mxu0 %v5629_v37  ;;  %v5662_v61 = vld [vmem:[#allocation43_spill] sm:$0xff]  ;;  %v5663_v37 = vld [vmem:[#allocation46_spill] sm:$0xff] }
 0x2d7   :  { %1561 = vmatpush1.msra.mxu1 %v5630_v49  ;;  %1632 = vmatpush1.msra.mxu0 %v5631_v14  ;;  %v5664_v49 = vld [vmem:[#allocation45_spill] sm:$0xff]  ;;  %v5665_v14 = vld [vmem:[#allocation48_spill] sm:$0xff] }
 0x2d8   :  { %1562 = vmatprep.subr.mxu1 %v5632_v57  ;;  %1633 = vmatprep.subr.mxu0 %v5633_v62  ;;  %v5666_v57 = vld [vmem:[#allocation47_spill] sm:$0xff]  ;;  %v5667_v62 = vld [vmem:[#allocation50_spill] sm:$0xff] }
 0x2d9   :  { %1563 = vmatpush1.msra.mxu1 %v5634_v55  ;;  %1634 = vmatpush1.msra.mxu0 %v5635_v41  ;;  %v5668_v55 = vld [vmem:[#allocation49_spill] sm:$0xff]  ;;  %v5669_v41 = vld [vmem:[#allocation52_spill] sm:$0xff] }
 0x2da   :  { %1564 = vmatprep.subr.mxu1 %v5636_v50  ;;  %1635 = vmatprep.subr.mxu0 %v5637_v58  ;;  %v5670_v50 = vld [vmem:[#allocation51_spill] sm:$0xff]  ;;  %v5671_v58 = vld [vmem:[#allocation54_spill] sm:$0xff] }
 0x2db   :  { %1565 = vmatpush1.msra.mxu1 %v5638_v18  ;;  %1636 = vmatpush1.msra.mxu0 %v5639_v23  ;;  %v5672_v18 = vld [vmem:[#allocation53_spill] sm:$0xff]  ;;  %v5673_v23 = vld [vmem:[#allocation56_spill] sm:$0xff] }
 0x2dc   :  { %1566 = vmatprep.subr.mxu1 %v5640_v15  ;;  %1637 = vmatprep.subr.mxu0 %v5641_v25  ;;  %v5674_v15 = vld [vmem:[#allocation55_spill] sm:$0xff]  ;;  %v5675_v25 = vld [vmem:[#allocation58_spill] sm:$0xff] }
 0x2dd   :  { %1567 = vmatpush1.msra.mxu1 %v5642_v20  ;;  %1638 = vmatpush1.msra.mxu0 %v5643_v33  ;;  %v5676_v20 = vld [vmem:[#allocation57_spill] sm:$0xff]  ;;  %v5677_v33 = vld [vmem:[#allocation60_spill] sm:$0xff] }
 0x2de   :  { %1568 = vmatprep.subr.mxu1 %v5644_v5  ;;  %1639 = vmatprep.subr.mxu0 %v5645_v27  ;;  %v5678_v5 = vld [vmem:[#allocation59_spill] sm:$0xff]  ;;  %v5679_v27 = vld [vmem:[#allocation62_spill] sm:$0xff] }
 0x2df   :  { %1569 = vmatpush1.msra.mxu1 %v5646_v19  ;;  %1640 = vmatpush1.msra.mxu0 %v5647_v60  ;;  %v5680_v19 = vld [vmem:[#allocation61_spill] sm:$0xff]  ;;  %v5681_v60 = vld [vmem:[#allocation64_spill] sm:$0xff] }
 0x2e0   :  { %1570 = vmatprep.subr.mxu1 %v5648_v51  ;;  %1641 = vmatprep.subr.mxu0 %v5649_v8  ;;  %v5682_v51 = vld [vmem:[#allocation63_spill] sm:$0xff]  ;;  %v5683_v8 = vmov 0.0  }
 0x2e1   :  { %1571 = vmatpush1.msra.mxu1 %v5650_v38  ;;  %1642 = vmatpush1.msra.mxu0 %v5651_v13  ;;  %v5684_v38 = vld [vmem:[#allocation65_spill] sm:$0xff] }
 0x2e2   :  { %1572 = vmatprep.subr.mxu1 %v5652_v28  ;;  %1643 = vmatprep.subr.mxu0 %v5653_v16  ;;  %v4496_v13 = vld [vmem:[%s5389_s13 + $0x1e8] sm:$0xff]  ;;  %v4502_v28 = vld [vmem:[%s5389_s13 + $0x1f8] sm:$0xff] }
 0x2e3   :  { %1573 = vmatpush1.msra.mxu1 %v5654_v59  ;;  %1644 = vmatpush1.msra.mxu0 %v5655_v9  ;;  %5685 = vst [vmem:[#allocation4_spill] sm:$0xff] %v4496_v13  ;;  %5686 = vst [vmem:[#allocation5_spill] sm:$0xff] %v4502_v28 }
 0x2e4   :  { %1574 = vmatprep.subr.mxu1 %v5656_v42  ;;  %1645 = vmatprep.subr.mxu0 %v5657_v21 }
 0x2e5   :  { %1575 = vmatpush1.msra.mxu1 %v5658_v3  ;;  %1646 = vmatpush1.msra.mxu0 %v5659_v2 }
 0x2e6   :  { %1576 = vmatprep.subr.mxu1 %v5660_v24  ;;  %1647 = vmatprep.subr.mxu0 %v5661_v46 }
 0x2e7   :  { %1577 = vmatpush1.msra.mxu1 %v5662_v61  ;;  %1648 = vmatpush1.msra.mxu0 %v5663_v37 }
 0x2e8   :  { %1578 = vmatprep.subr.mxu1 %v5664_v49  ;;  %1649 = vmatprep.subr.mxu0 %v5665_v14 }
 0x2e9   :  { %1579 = vmatpush1.msra.mxu1 %v5666_v57  ;;  %1650 = vmatpush1.msra.mxu0 %v5667_v62 }
 0x2ea   :  { %1580 = vmatprep.subr.mxu1 %v5668_v55  ;;  %1651 = vmatprep.subr.mxu0 %v5669_v41 }
 0x2eb   :  { %1581 = vmatpush1.msra.mxu1 %v5670_v50  ;;  %1652 = vmatpush1.msra.mxu0 %v5671_v58 }
 0x2ec   :  { %1582 = vmatprep.subr.mxu1 %v5672_v18  ;;  %1653 = vmatprep.subr.mxu0 %v5673_v23 }
 0x2ed   :  { %1583 = vmatpush1.msra.mxu1 %v5674_v15  ;;  %1654 = vmatpush1.msra.mxu0 %v5675_v25 }
 0x2ee   :  { %1584 = vmatprep.subr.mxu1 %v5676_v20  ;;  %1655 = vmatprep.subr.mxu0 %v5677_v33  ;;  %v4520_v20 = vld [vmem:[%s5389_s13 + $0x1e0] sm:$0xff] }
 0x2ef   :  { %1585 = vmatpush1.msra.mxu1 %v5678_v5  ;;  %1656 = vmatpush1.msra.mxu0 %v5679_v27 }
 0x2f0   :  { %1586 = vmatprep.subr.mxu1 %v5680_v19  ;;  %1657 = vmatprep.subr.mxu0 %v5681_v60 }
 0x2f1   :  { %1587 = vmatpush1.msra.mxu1 %v5682_v51  ;;  %1620 = vmatprep.mubr.f32.mxu1 %v5683_v8 }
 0x2f2   :  { %1658 = vmatpush1.msra.mxu0 %v5684_v38  ;;  %1691 = vmatprep.mubr.f32.mxu0 %v5683_v8 }
 0x2f3   :  { %1735 = vmatprep.subr.mxu1 %v4496_v13  ;;  %1806 = vmatprep.subr.mxu0 %v4502_v28 }
 0x392   :  { %v1443_v16 = vpop.f32.mrf.mxu1  ;;  %v1514_v3 = vpop.f32.mrf.mxu0 }
 0x393   :  { %v1519_v59 = vadd.f32 %v1443_v16, %v4267_v22  ;;  %v1521_v61 = vadd.f32 %v1514_v3, %v4273_v48  ;;  %v4532_v16 = vld [vmem:[%s5389_s13 + $0x1c8] sm:$0xff]  ;;  %v4562_v3 = vld [vmem:[%s5389_s13 + $0x1b8] sm:$0xff] }
 0x394   :  { %v1445_v9 = vpop.f32.mrf.mxu1  ;;  %v1516_v24 = vpop.f32.mrf.mxu0 }
 0x395   :  { %v2937_v42 = vmul.f32 -1.442695, %v1519_v59  ;;  %v1520_v21 = vadd.f32 %v1445_v9, %v4278_v40  ;;  %v1522_v46 = vadd.f32 %v1516_v24, %v4283_v56  ;;  %v4538_v59 = vld [vmem:[%s5389_s13 + $0x1d8] sm:$0xff]  ;;  %v4544_v9 = vld [vmem:[%s5389_s13 + $0x1c0] sm:$0xff]  ;;  %v4574_v24 = vld [vmem:[%s5389_s13 + $0x1b0] sm:$0xff] }
 0x397   :  { %3125 = vpow2.f32 %v2937_v42  ;;  %v2938_v2 = vmul.f32 -1.442695, %v1520_v21  ;;  %v2939_v37 = vmul.f32 -1.442695, %v1522_v46  ;;  %v4550_v42 = vld [vmem:[%s5389_s13 + $0x1d0] sm:$0xff]  ;;  %v4556_v21 = vld [vmem:[%s5389_s13 + $0x1a8] sm:$0xff] }
 0x398   :  { %v4580_v46 = vld [vmem:[%s5389_s13 + $0x188] sm:$0xff] }
 0x399   :  { %3127 = vpow2.f32 %v2938_v2  ;;  %v4568_v2 = vld [vmem:[%s5389_s13 + $0x1a0] sm:$0xff] }
 0x39a   :  { %3129 = vtanh.f32 %v1521_v61  ;;  %v4586_v61 = vld [vmem:[%s5389_s13 + $0x198] sm:$0xff] }
 0x39b   :  { %3131 = vpow2.f32 %v2939_v37  ;;  %v4592_v37 = vld [vmem:[%s5389_s13 + $0x180] sm:$0xff] }
 0x3a4   :  { %v3126_v49 = vpop.eup %3125 }
 0x3a5   :  { %v1526_v14 = vadd.f32 1.0, %v3126_v49  ;;  %v4598_v49 = vld [vmem:[%s5389_s13 + $0x190] sm:$0xff] }
 0x3a6   :  { %v3128_v57 = vpop.eup %3127 }
 0x3a7   :  { %3133 = vrcp.f32 %v1526_v14  ;;  %v1532_v22 = vadd.f32 1.0, %v3128_v57  ;;  %v3130_v62 = vpop.eup %3129  ;;  %v4604_v14 = vld [vmem:[%s5389_s13 + $0x168] sm:$0xff]  ;;  %v4610_v57 = vld [vmem:[%s5389_s13 + $0x178] sm:$0xff] }
 0x3a8   :  { %v3132_v40 = vpop.eup %3131 }
 0x3a9   :  { %3135 = vrcp.f32 %v1532_v22  ;;  %v1539_v58 = vadd.f32 1.0, %v3132_v40  ;;  %v4616_v22 = vld [vmem:[%s5389_s13 + $0x160] sm:$0xff]  ;;  %v4628_v40 = vld [vmem:[%s5389_s13 + $0x148] sm:$0xff] }
 0x3ab   :  { %3137 = vrcp.f32 %v1539_v58  ;;  %v4652_v58 = vld [vmem:[%s5389_s13 + $0x128] sm:$0xff] }
 0x3b4   :  { %v3134_v55 = vpop.eup %3133 }
 0x3b5   :  { %v1543_v41 = vmul.f32 %v3134_v55, %v3130_v62  ;;  %v4622_v62 = vld [vmem:[%s5389_s13 + $0x170] sm:$0xff]  ;;  %v4634_v55 = vld [vmem:[%s5389_s13 + $0x158] sm:$0xff] }
 0x3b6   :  { %v3136_v50 = vpop.eup %3135 }
 0x3b7   :  { %v1542_v18 = vmul.f32 %v3136_v50, %v4422_v53  ;;  %v4526_v53 = vld [vmem:[%s5389_s13 + $0x1f0] sm:$0xff] }
 0x3b8   :  { %v3138_v48 = vpop.eup %3137  ;;  %v4646_v50 = vld [vmem:[%s5389_s13 + $0x150] sm:$0xff] }
 0x3b9   :  { %v4510_v56 = vadd.f32 %v1543_v41, %v1542_v18  ;;  %v4640_v41 = vld [vmem:[%s5389_s13 + $0x140] sm:$0xff]  ;;  %v4658_v18 = vld [vmem:[%s5389_s13 + $0x138] sm:$0xff] }
 0x3bb   :  { %3139 = vtanh.f32 %v4510_v56 }
 0x3c8   :  { %v3140_v23 = vpop.eup %3139 }
 0x3c9   :  { %v4513_v15 = vmul.f32 %v3140_v23, %v3138_v48  ;;  %v4664_v48 = vld [vmem:[%s5389_s13 + $0x120] sm:$0xff]  ;;  %v4670_v23 = vld [vmem:[%s5389_s13 + $0x130] sm:$0xff] }
 0x3cb   :  { %5687 = vst [vmem:[#allocation6_spill] sm:$0xff] %v4513_v15  ;;  %1621 = vmatmul.mubr.f32.vlgmr.msra.gmra.mxu1 %v4513_v15  ;;  %1692 = vmatmul.mubr.f32.vlgmr.msra.gmra.mxu0 %v4513_v15  ;;  %v4700_v15 = vld [vmem:[%s5389_s13 + $0xe8] sm:$0xff] }
 0x3cc   :  { %1736 = vmatpush1.msra.mxu1 %v4520_v20  ;;  %1807 = vmatpush1.msra.mxu0 %v4526_v53 }
 0x3cd   :  { %1737 = vmatprep.subr.mxu1 %v4532_v16  ;;  %1808 = vmatprep.subr.mxu0 %v4538_v59 }
 0x3ce   :  { %1738 = vmatpush1.msra.mxu1 %v4544_v9  ;;  %1809 = vmatpush1.msra.mxu0 %v4550_v42 }
 0x3cf   :  { %1739 = vmatprep.subr.mxu1 %v4556_v21  ;;  %1810 = vmatprep.subr.mxu0 %v4562_v3 }
 0x3d0   :  { %1740 = vmatpush1.msra.mxu1 %v4568_v2  ;;  %1811 = vmatpush1.msra.mxu0 %v4574_v24 }
 0x3d1   :  { %1741 = vmatprep.subr.mxu1 %v4580_v46  ;;  %1812 = vmatprep.subr.mxu0 %v4586_v61 }
 0x3d2   :  { %1742 = vmatpush1.msra.mxu1 %v4592_v37  ;;  %1813 = vmatpush1.msra.mxu0 %v4598_v49 }
 0x3d3   :  { %1743 = vmatprep.subr.mxu1 %v4604_v14  ;;  %1814 = vmatprep.subr.mxu0 %v4610_v57 }
 0x3d4   :  { %1744 = vmatpush1.msra.mxu1 %v4616_v22  ;;  %1815 = vmatpush1.msra.mxu0 %v4622_v62 }
 0x3d5   :  { %1745 = vmatprep.subr.mxu1 %v4628_v40  ;;  %1816 = vmatprep.subr.mxu0 %v4634_v55 }
 0x3d6   :  { %1746 = vmatpush1.msra.mxu1 %v4640_v41  ;;  %1817 = vmatpush1.msra.mxu0 %v4646_v50 }
 0x3d7   :  { %1747 = vmatprep.subr.mxu1 %v4652_v58  ;;  %1818 = vmatprep.subr.mxu0 %v4658_v18 }
 0x3d8   :  { %1748 = vmatpush1.msra.mxu1 %v4664_v48  ;;  %1819 = vmatpush1.msra.mxu0 %v4670_v23 }
 0x3d9   :  { %1749 = vmatprep.subr.mxu1 %v4676_v12  ;;  %1820 = vmatprep.subr.mxu0 %v4682_v32 }
 0x3da   :  { %1750 = vmatpush1.msra.mxu1 %v4688_v4  ;;  %1821 = vmatpush1.msra.mxu0 %v4694_v45 }
 0x3db   :  { %1751 = vmatprep.subr.mxu1 %v4700_v15  ;;  %1822 = vmatprep.subr.mxu0 %v4706_v10 }
 0x3dc   :  { %1752 = vmatpush1.msra.mxu1 %v4712_v30  ;;  %1823 = vmatpush1.msra.mxu0 %v4718_v1 }
 0x3dd   :  { %1753 = vmatprep.subr.mxu1 %v4724_v54  ;;  %1824 = vmatprep.subr.mxu0 %v4730_v0 }
 0x3de   :  { %1754 = vmatpush1.msra.mxu1 %v4736_v47  ;;  %1825 = vmatpush1.msra.mxu0 %v4742_v39 }
 0x3df   :  { %1755 = vmatprep.subr.mxu1 %v4748_v26  ;;  %1826 = vmatprep.subr.mxu0 %v4754_v29 }
 0x3e0   :  { %1756 = vmatpush1.msra.mxu1 %v4760_v11  ;;  %1827 = vmatpush1.msra.mxu0 %v4766_v34 }
 0x3e1   :  { %1757 = vmatprep.subr.mxu1 %v4772_v35  ;;  %1828 = vmatprep.subr.mxu0 %v4778_v31 }
 0x3e2   :  { %1758 = vmatpush1.msra.mxu1 %v4784_v63  ;;  %1829 = vmatpush1.msra.mxu0 %v4790_v43  ;;  %v4808_v63 = vld [vmem:[%s5389_s13 + $0x60] sm:$0xff]  ;;  %v4814_v43 = vld [vmem:[%s5389_s13 + $0x70] sm:$0xff] }
 0x3e3   :  { %1759 = vmatprep.subr.mxu1 %v4796_v52  ;;  %1830 = vmatprep.subr.mxu0 %v4802_v7  ;;  %5692 = vst [vmem:[#allocation12_spill] sm:$0xff] %v4808_v63  ;;  %5693 = vst [vmem:[#allocation11_spill] sm:$0xff] %v4814_v43  ;;  %v4820_v52 = vld [vmem:[%s5389_s13 + $0x48] sm:$0xff]  ;;  %v4826_v7 = vld [vmem:[%s5389_s13 + $0x58] sm:$0xff] }
 0x3e4   :  { %1760 = vmatpush1.msra.mxu1 %v4808_v63  ;;  %1831 = vmatpush1.msra.mxu0 %v4814_v43  ;;  %5694 = vst [vmem:[#allocation14_spill] sm:$0xff] %v4820_v52  ;;  %5695 = vst [vmem:[#allocation13_spill] sm:$0xff] %v4826_v7  ;;  %v4832_v63 = vld [vmem:[%s5389_s13 + $0x40] sm:$0xff] }
 0x3e5   :  { %1761 = vmatprep.subr.mxu1 %v4820_v52  ;;  %1832 = vmatprep.subr.mxu0 %v4826_v7  ;;  %5696 = vst [vmem:[#allocation16_spill] sm:$0xff] %v4832_v63  ;;  %v4839_v52 = vld [vmem:[%s5389_s13 + $0x28] sm:$0xff] }
 0x3e6   :  { %1762 = vmatpush1.msra.mxu1 %v4832_v63  ;;  %1833 = vmatpush1.msra.mxu0 %v5675_v25  ;;  %5697 = vst [vmem:[#allocation15_spill] sm:$0xff] %v4839_v52 }
 0x3e7   :  { %1763 = vmatprep.subr.mxu1 %v4839_v52  ;;  %1834 = vmatprep.subr.mxu0 %v5677_v33 }
 0x3e8   :  { %1764 = vmatpush1.msra.mxu1 %v5678_v5  ;;  %1835 = vmatpush1.msra.mxu0 %v5679_v27 }
 0x3e9   :  { %1765 = vmatprep.subr.mxu1 %v5680_v19  ;;  %1836 = vmatprep.subr.mxu0 %v5681_v60 }
 0x3ea   :  { %1766 = vmatpush1.msra.mxu1 %v5682_v51  ;;  %1799 = vmatprep.mubr.f32.mxu1 %v5683_v8 }
 0x3eb   :  { %1837 = vmatpush1.msra.mxu0 %v5684_v38  ;;  %1870 = vmatprep.mubr.f32.mxu0 %v5683_v8 }
 0x3ec   :  { %1914 = vmatprep.subr.mxu1 %v4496_v13  ;;  %1985 = vmatprep.subr.mxu0 %v4502_v28 }
 0x48b   :  { %v1622_v25 = vpop.f32.mrf.mxu1  ;;  %v1693_v60 = vpop.f32.mrf.mxu0 }
 0x48c   :  { %v1698_v33 = vadd.f32 %v1622_v25, %v4289_v6  ;;  %v1700_v8 = vadd.f32 %v1693_v60, %v4293_v44  ;;  %v5704_v60 = vld [vmem:[#allocation14_spill] sm:$0xff] }
 0x48d   :  { %v1624_v5 = vpop.f32.mrf.mxu1  ;;  %v1695_v52 = vpop.f32.mrf.mxu0 }
 0x48e   :  { %v2940_v27 = vmul.f32 -1.442695, %v1698_v33  ;;  %v1699_v19 = vadd.f32 %v1624_v5, %v4298_v17  ;;  %v1701_v38 = vadd.f32 %v1695_v52, %v4303_v36 }
 0x490   :  { %3141 = vpow2.f32 %v2940_v27  ;;  %v2941_v51 = vmul.f32 -1.442695, %v1699_v19  ;;  %v2942_v63 = vmul.f32 -1.442695, %v1701_v38  ;;  %v5705_v38 = vld [vmem:[#allocation13_spill] sm:$0xff] }
 0x492   :  { %3143 = vpow2.f32 %v2941_v51 }
 0x493   :  { %3145 = vtanh.f32 %v1700_v8 }
 0x494   :  { %3147 = vpow2.f32 %v2942_v63  ;;  %v5700_v63 = vld [vmem:[#allocation8_spill] sm:$0xff] }
 0x49d   :  { %v3142_v13 = vpop.eup %3141 }
 0x49e   :  { %v1705_v7 = vadd.f32 1.0, %v3142_v13  ;;  %v5701_v13 = vld [vmem:[#allocation10_spill] sm:$0xff] }
 0x49f   :  { %v3144_v28 = vpop.eup %3143 }
 0x4a0   :  { %3149 = vrcp.f32 %v1705_v7  ;;  %v1711_v6 = vadd.f32 1.0, %v3144_v28  ;;  %v3146_v25 = vpop.eup %3145  ;;  %v5699_v7 = vld [vmem:[#allocation7_spill] sm:$0xff]  ;;  %v5702_v28 = vld [vmem:[#allocation9_spill] sm:$0xff] }
 0x4a1   :  { %v3148_v17 = vpop.eup %3147 }
 0x4a2   :  { %3151 = vrcp.f32 %v1711_v6  ;;  %v1718_v19 = vadd.f32 1.0, %v3148_v17  ;;  %v5706_v6 = vld [vmem:[#allocation16_spill] sm:$0xff]  ;;  %v5708_v17 = vld [vmem:[#allocation15_spill] sm:$0xff] }
 0x4a4   :  { %3153 = vrcp.f32 %v1718_v19  ;;  %v4946_v19 = vld [vmem:[%s5389_s13 + $0x8] sm:$0xff] }
 0x4a5   :  { %5712 = vst [vmem:[#allocation21_spill] sm:$0xff] %v4946_v19 }
 0x4ad   :  { %v3150_v33 = vpop.eup %3149 }
 0x4ae   :  { %v1722_v5 = vmul.f32 %v3150_v33, %v3146_v25  ;;  %v4921_v25 = vld [vmem:[%s5389_s13 + $0x50] sm:$0xff]  ;;  %v4928_v33 = vld [vmem:[%s5389_s13 + $0x38] sm:$0xff] }
 0x4af   :  { %v3152_v27 = vpop.eup %3151  ;;  %5707 = vst [vmem:[#allocation17_spill] sm:$0xff] %v4921_v25  ;;  %5709 = vst [vmem:[#allocation20_spill] sm:$0xff] %v4928_v33 }
 0x4b0   :  { %v1721_v51 = vmul.f32 %v3152_v27, %v4510_v56  ;;  %v5703_v56 = vld [vmem:[#allocation12_spill] sm:$0xff]  ;;  %v4940_v27 = vld [vmem:[%s5389_s13 + $0x30] sm:$0xff] }
 0x4b1   :  { %v3154_v44 = vpop.eup %3153  ;;  %5711 = vst [vmem:[#allocation22_spill] sm:$0xff] %v4940_v27 }
 0x4b2   :  { %v4858_v36 = vadd.f32 %v1722_v5, %v1721_v51  ;;  %v4934_v5 = vld [vmem:[%s5389_s13 + $0x20] sm:$0xff]  ;;  %v4952_v51 = vld [vmem:[%s5389_s13 + $0x18] sm:$0xff] }
 0x4b3   :  { %5710 = vst [vmem:[#allocation19_spill] sm:$0xff] %v4934_v5  ;;  %5713 = vst [vmem:[#allocation24_spill] sm:$0xff] %v4952_v51 }
 0x4b4   :  { %3155 = vtanh.f32 %v4858_v36 }
 0x4c1   :  { %v3156_v52 = vpop.eup %3155 }
 0x4c2   :  { %v4861_v8 = vmul.f32 %v3156_v52, %v3154_v44  ;;  %v4958_v44 = vld [vmem:[%s5389_s13] sm:$0xff]  ;;  %v5715_v52 = vmov 0.0  }
 0x4c3   :  { %5714 = vst [vmem:[#allocation23_spill] sm:$0xff] %v4958_v44 }
 0x4c4   :  { %5698 = vst [vmem:[#allocation18_spill] sm:$0xff] %v4861_v8  ;;  %1800 = vmatmul.mubr.f32.vlgmr.msra.gmra.mxu1 %v4861_v8  ;;  %1871 = vmatmul.mubr.f32.vlgmr.msra.gmra.mxu0 %v4861_v8  ;;  %v4965_v8 = vld [vmem:[%s5389_s13 + $0x10] sm:$0xff] }
 0x4c5   :  { %1915 = vmatpush1.msra.mxu1 %v4520_v20  ;;  %1986 = vmatpush1.msra.mxu0 %v4526_v53  ;;  %5716 = vst [vmem:[#allocation26_spill] sm:$0xff] %v4965_v8 }
 0x4c6   :  { %1916 = vmatprep.subr.mxu1 %v4532_v16  ;;  %1987 = vmatprep.subr.mxu0 %v4538_v59 }
 0x4c7   :  { %1917 = vmatpush1.msra.mxu1 %v4544_v9  ;;  %1988 = vmatpush1.msra.mxu0 %v4550_v42 }
 0x4c8   :  { %1918 = vmatprep.subr.mxu1 %v4556_v21  ;;  %1989 = vmatprep.subr.mxu0 %v4562_v3 }
 0x4c9   :  { %1919 = vmatpush1.msra.mxu1 %v4568_v2  ;;  %1990 = vmatpush1.msra.mxu0 %v4574_v24 }
 0x4ca   :  { %1920 = vmatprep.subr.mxu1 %v4580_v46  ;;  %1991 = vmatprep.subr.mxu0 %v4586_v61 }
 0x4cb   :  { %1921 = vmatpush1.msra.mxu1 %v4592_v37  ;;  %1992 = vmatpush1.msra.mxu0 %v4598_v49 }
 0x4cc   :  { %1922 = vmatprep.subr.mxu1 %v4604_v14  ;;  %1993 = vmatprep.subr.mxu0 %v4610_v57 }
 0x4cd   :  { %1923 = vmatpush1.msra.mxu1 %v4616_v22  ;;  %1994 = vmatpush1.msra.mxu0 %v4622_v62 }
 0x4ce   :  { %1924 = vmatprep.subr.mxu1 %v4628_v40  ;;  %1995 = vmatprep.subr.mxu0 %v4634_v55 }
 0x4cf   :  { %1925 = vmatpush1.msra.mxu1 %v4640_v41  ;;  %1996 = vmatpush1.msra.mxu0 %v4646_v50 }
 0x4d0   :  { %1926 = vmatprep.subr.mxu1 %v4652_v58  ;;  %1997 = vmatprep.subr.mxu0 %v4658_v18 }
 0x4d1   :  { %1927 = vmatpush1.msra.mxu1 %v4664_v48  ;;  %1998 = vmatpush1.msra.mxu0 %v4670_v23 }
 0x4d2   :  { %1928 = vmatprep.subr.mxu1 %v4676_v12  ;;  %1999 = vmatprep.subr.mxu0 %v4682_v32 }
 0x4d3   :  { %1929 = vmatpush1.msra.mxu1 %v4688_v4  ;;  %2000 = vmatpush1.msra.mxu0 %v4694_v45 }
 0x4d4   :  { %1930 = vmatprep.subr.mxu1 %v4700_v15  ;;  %2001 = vmatprep.subr.mxu0 %v4706_v10 }
 0x4d5   :  { %1931 = vmatpush1.msra.mxu1 %v4712_v30  ;;  %2002 = vmatpush1.msra.mxu0 %v4718_v1 }
 0x4d6   :  { %1932 = vmatprep.subr.mxu1 %v4724_v54  ;;  %2003 = vmatprep.subr.mxu0 %v4730_v0 }
 0x4d7   :  { %1933 = vmatpush1.msra.mxu1 %v4736_v47  ;;  %2004 = vmatpush1.msra.mxu0 %v4742_v39 }
 0x4d8   :  { %1934 = vmatprep.subr.mxu1 %v4748_v26  ;;  %2005 = vmatprep.subr.mxu0 %v4754_v29 }
 0x4d9   :  { %1935 = vmatpush1.msra.mxu1 %v4760_v11  ;;  %2006 = vmatpush1.msra.mxu0 %v4766_v34 }
 0x4da   :  { %1936 = vmatprep.subr.mxu1 %v4772_v35  ;;  %2007 = vmatprep.subr.mxu0 %v4778_v31 }
 0x4db   :  { %1937 = vmatpush1.msra.mxu1 %v5699_v7  ;;  %2008 = vmatpush1.msra.mxu0 %v5700_v63 }
 0x4dc   :  { %1938 = vmatprep.subr.mxu1 %v5701_v13  ;;  %2009 = vmatprep.subr.mxu0 %v5702_v28  ;;  %v5722_v28 = vld [vmem:[#allocation68_spill] sm:$0xff] }
 0x4dd   :  { %1939 = vmatpush1.msra.mxu1 %v5703_v56  ;;  %2010 = vmatpush1.msra.mxu0 %v4814_v43  ;;  %v5721_v56 = vld [vmem:[#allocation70_spill] sm:$0xff] }
 0x4de   :  { %1940 = vmatprep.subr.mxu1 %v5704_v60  ;;  %2011 = vmatprep.subr.mxu0 %v5705_v38 }
 0x4df   :  { %1941 = vmatpush1.msra.mxu1 %v5706_v6  ;;  %2012 = vmatpush1.msra.mxu0 %v4921_v25  ;;  %v5720_v25 = vld [vmem:[#allocation69_spill] sm:$0xff] }
 0x4e0   :  { %1942 = vmatprep.subr.mxu1 %v5708_v17  ;;  %2013 = vmatprep.subr.mxu0 %v4928_v33 }
 0x4e1   :  { %1943 = vmatpush1.msra.mxu1 %v4934_v5  ;;  %2014 = vmatpush1.msra.mxu0 %v4940_v27  ;;  %v5719_v5 = vld [vmem:[#allocation67_spill] sm:$0xff] }
 0x4e2   :  { %1944 = vmatprep.subr.mxu1 %v4946_v19  ;;  %2015 = vmatprep.subr.mxu0 %v4952_v51  ;;  %v5717_v19 = vld [vmem:[#allocation4_spill] sm:$0xff]  ;;  %v5718_v51 = vld [vmem:[#allocation5_spill] sm:$0xff] }
 0x4e3   :  { %1945 = vmatpush1.msra.mxu1 %v4958_v44  ;;  %1978 = vmatprep.mubr.f32.mxu1 %v5715_v52 }
 0x4e4   :  { %2016 = vmatpush1.msra.mxu0 %v4965_v8  ;;  %2049 = vmatprep.mubr.f32.mxu0 %v5715_v52 }
 0x4e5   :  { %2093 = vmatprep.subr.mxu1 %v5717_v19  ;;  %2164 = vmatprep.subr.mxu0 %v5718_v51 }
 0x584   :  { %v1801_v27 = vpop.f32.mrf.mxu1  ;;  %v1872_v38 = vpop.f32.mrf.mxu0 }
 0x585   :  { %v1877_v33 = vadd.f32 %v1801_v27, %v5719_v5  ;;  %v1879_v52 = vadd.f32 %v1872_v38, %v5722_v28  ;;  %v5727_v38 = vld [vmem:[#allocation12_spill] sm:$0xff] }
 0x586   :  { %v1803_v17 = vpop.f32.mrf.mxu1  ;;  %v1874_v43 = vpop.f32.mrf.mxu0 }
 0x587   :  { %v2943_v44 = vmul.f32 -1.442695, %v1877_v33  ;;  %v1878_v6 = vadd.f32 %v1803_v17, %v5720_v25  ;;  %v1880_v8 = vadd.f32 %v1874_v43, %v5721_v56 }
 0x589   :  { %3157 = vpow2.f32 %v2943_v44  ;;  %v2944_v60 = vmul.f32 -1.442695, %v1878_v6  ;;  %v2945_v13 = vmul.f32 -1.442695, %v1880_v8 }
 0x58b   :  { %3159 = vpow2.f32 %v2944_v60 }
 0x58c   :  { %3161 = vtanh.f32 %v1879_v52  ;;  %v5730_v52 = vld [vmem:[#allocation13_spill] sm:$0xff] }
 0x58d   :  { %3163 = vpow2.f32 %v2945_v13  ;;  %v5726_v13 = vld [vmem:[#allocation9_spill] sm:$0xff] }
 0x596   :  { %v3158_v19 = vpop.eup %3157 }
 0x597   :  { %v1884_v63 = vadd.f32 1.0, %v3158_v19  ;;  %v5728_v19 = vld [vmem:[#allocation11_spill] sm:$0xff] }
 0x598   :  { %v3160_v51 = vpop.eup %3159 }
 0x599   :  { %3165 = vrcp.f32 %v1884_v63  ;;  %v1890_v5 = vadd.f32 1.0, %v3160_v51  ;;  %v3162_v33 = vpop.eup %3161  ;;  %v5725_v63 = vld [vmem:[#allocation10_spill] sm:$0xff] }
 0x59a   :  { %v3164_v25 = vpop.eup %3163  ;;  %v5729_v51 = vld [vmem:[#allocation14_spill] sm:$0xff] }
 0x59b   :  { %3167 = vrcp.f32 %v1890_v5  ;;  %v1897_v60 = vadd.f32 1.0, %v3164_v25  ;;  %v5731_v5 = vld [vmem:[#allocation16_spill] sm:$0xff]  ;;  %v5733_v25 = vld [vmem:[#allocation15_spill] sm:$0xff] }
 0x59d   :  { %3169 = vrcp.f32 %v1897_v60  ;;  %v5737_v60 = vld [vmem:[#allocation21_spill] sm:$0xff] }
 0x5a6   :  { %v3166_v17 = vpop.eup %3165 }
 0x5a7   :  { %v1901_v27 = vmul.f32 %v3166_v17, %v3162_v33  ;;  %v5732_v33 = vld [vmem:[#allocation17_spill] sm:$0xff]  ;;  %v5734_v17 = vld [vmem:[#allocation20_spill] sm:$0xff] }
 0x5a8   :  { %v3168_v6 = vpop.eup %3167 }
 0x5a9   :  { %v1900_v44 = vmul.f32 %v3168_v6, %v4858_v36  ;;  %v5724_v36 = vld [vmem:[#allocation8_spill] sm:$0xff]  ;;  %v5736_v6 = vld [vmem:[#allocation22_spill] sm:$0xff] }
 0x5aa   :  { %v3170_v8 = vpop.eup %3169 }
 0x5ab   :  { %v4976_v43 = vadd.f32 %v1901_v27, %v1900_v44  ;;  %v5735_v27 = vld [vmem:[#allocation19_spill] sm:$0xff]  ;;  %v5738_v44 = vld [vmem:[#allocation24_spill] sm:$0xff] }
 0x5ad   :  { %3171 = vtanh.f32 %v4976_v43 }
 0x5ba   :  { %v3172_v28 = vpop.eup %3171 }
 0x5bb   :  { %v4979_v56 = vmul.f32 %v3172_v28, %v3170_v8  ;;  %v5739_v8 = vld [vmem:[#allocation23_spill] sm:$0xff]  ;;  %v5740_v28 = vmov 0.0  }
 0x5bd   :  { %5723 = vst [vmem:[#allocation25_spill] sm:$0xff] %v4979_v56  ;;  %1979 = vmatmul.mubr.f32.vlgmr.msra.gmra.mxu1 %v4979_v56  ;;  %2050 = vmatmul.mubr.f32.vlgmr.msra.gmra.mxu0 %v4979_v56  ;;  %v5741_v56 = vld [vmem:[#allocation26_spill] sm:$0xff] }
 0x5be   :  { %2094 = vmatpush1.msra.mxu1 %v4520_v20  ;;  %2165 = vmatpush1.msra.mxu0 %v4526_v53 }
 0x5bf   :  { %2095 = vmatprep.subr.mxu1 %v4532_v16  ;;  %2166 = vmatprep.subr.mxu0 %v4538_v59 }
 0x5c0   :  { %2096 = vmatpush1.msra.mxu1 %v4544_v9  ;;  %2167 = vmatpush1.msra.mxu0 %v4550_v42 }
 0x5c1   :  { %2097 = vmatprep.subr.mxu1 %v4556_v21  ;;  %2168 = vmatprep.subr.mxu0 %v4562_v3 }
 0x5c2   :  { %2098 = vmatpush1.msra.mxu1 %v4568_v2  ;;  %2169 = vmatpush1.msra.mxu0 %v4574_v24 }
 0x5c3   :  { %2099 = vmatprep.subr.mxu1 %v4580_v46  ;;  %2170 = vmatprep.subr.mxu0 %v4586_v61 }
 0x5c4   :  { %2100 = vmatpush1.msra.mxu1 %v4592_v37  ;;  %2171 = vmatpush1.msra.mxu0 %v4598_v49 }
 0x5c5   :  { %2101 = vmatprep.subr.mxu1 %v4604_v14  ;;  %2172 = vmatprep.subr.mxu0 %v4610_v57 }
 0x5c6   :  { %2102 = vmatpush1.msra.mxu1 %v4616_v22  ;;  %2173 = vmatpush1.msra.mxu0 %v4622_v62 }
 0x5c7   :  { %2103 = vmatprep.subr.mxu1 %v4628_v40  ;;  %2174 = vmatprep.subr.mxu0 %v4634_v55 }
 0x5c8   :  { %2104 = vmatpush1.msra.mxu1 %v4640_v41  ;;  %2175 = vmatpush1.msra.mxu0 %v4646_v50 }
 0x5c9   :  { %2105 = vmatprep.subr.mxu1 %v4652_v58  ;;  %2176 = vmatprep.subr.mxu0 %v4658_v18 }
 0x5ca   :  { %2106 = vmatpush1.msra.mxu1 %v4664_v48  ;;  %2177 = vmatpush1.msra.mxu0 %v4670_v23 }
 0x5cb   :  { %2107 = vmatprep.subr.mxu1 %v4676_v12  ;;  %2178 = vmatprep.subr.mxu0 %v4682_v32 }
 0x5cc   :  { %2108 = vmatpush1.msra.mxu1 %v4688_v4  ;;  %2179 = vmatpush1.msra.mxu0 %v4694_v45 }
 0x5cd   :  { %2109 = vmatprep.subr.mxu1 %v4700_v15  ;;  %2180 = vmatprep.subr.mxu0 %v4706_v10 }
 0x5ce   :  { %2110 = vmatpush1.msra.mxu1 %v4712_v30  ;;  %2181 = vmatpush1.msra.mxu0 %v4718_v1 }
 0x5cf   :  { %2111 = vmatprep.subr.mxu1 %v4724_v54  ;;  %2182 = vmatprep.subr.mxu0 %v4730_v0 }
 0x5d0   :  { %2112 = vmatpush1.msra.mxu1 %v4736_v47  ;;  %2183 = vmatpush1.msra.mxu0 %v4742_v39 }
 0x5d1   :  { %2113 = vmatprep.subr.mxu1 %v4748_v26  ;;  %2184 = vmatprep.subr.mxu0 %v4754_v29 }
 0x5d2   :  { %2114 = vmatpush1.msra.mxu1 %v4760_v11  ;;  %2185 = vmatpush1.msra.mxu0 %v4766_v34 }
 0x5d3   :  { %2115 = vmatprep.subr.mxu1 %v4772_v35  ;;  %2186 = vmatprep.subr.mxu0 %v4778_v31 }
 0x5d4   :  { %2116 = vmatpush1.msra.mxu1 %v5699_v7  ;;  %2187 = vmatpush1.msra.mxu0 %v5724_v36 }
 0x5d5   :  { %2117 = vmatprep.subr.mxu1 %v5725_v63  ;;  %2188 = vmatprep.subr.mxu0 %v5726_v13  ;;  %v5747_v13 = vld [vmem:[#allocation72_spill] sm:$0xff] }
 0x5d6   :  { %2118 = vmatpush1.msra.mxu1 %v5727_v38  ;;  %2189 = vmatpush1.msra.mxu0 %v5728_v19  ;;  %v5746_v38 = vld [vmem:[#allocation74_spill] sm:$0xff] }
 0x5d7   :  { %2119 = vmatprep.subr.mxu1 %v5729_v51  ;;  %2190 = vmatprep.subr.mxu0 %v5730_v52 }
 0x5d8   :  { %2120 = vmatpush1.msra.mxu1 %v5731_v5  ;;  %2191 = vmatpush1.msra.mxu0 %v5732_v33  ;;  %v5742_v33 = vld [vmem:[#allocation4_spill] sm:$0xff] }
 0x5d9   :  { %2121 = vmatprep.subr.mxu1 %v5733_v25  ;;  %2192 = vmatprep.subr.mxu0 %v5734_v17  ;;  %v5743_v25 = vld [vmem:[#allocation5_spill] sm:$0xff] }
 0x5da   :  { %2122 = vmatpush1.msra.mxu1 %v5735_v27  ;;  %2193 = vmatpush1.msra.mxu0 %v5736_v6  ;;  %v5744_v27 = vld [vmem:[#allocation71_spill] sm:$0xff] }
 0x5db   :  { %2123 = vmatprep.subr.mxu1 %v5737_v60  ;;  %2194 = vmatprep.subr.mxu0 %v5738_v44  ;;  %v5745_v60 = vld [vmem:[#allocation73_spill] sm:$0xff] }
 0x5dc   :  { %2124 = vmatpush1.msra.mxu1 %v5739_v8  ;;  %2157 = vmatprep.mubr.f32.mxu1 %v5740_v28 }
 0x5dd   :  { %2195 = vmatpush1.msra.mxu0 %v5741_v56  ;;  %2228 = vmatprep.mubr.f32.mxu0 %v5740_v28 }
 0x5de   :  { %2272 = vmatprep.subr.mxu1 %v5742_v33  ;;  %2343 = vmatprep.subr.mxu0 %v5743_v25 }
 0x67d   :  { %v1980_v17 = vpop.f32.mrf.mxu1  ;;  %v2051_v44 = vpop.f32.mrf.mxu0 }
 0x67e   :  { %v2056_v5 = vadd.f32 %v1980_v17, %v5744_v27  ;;  %v2058_v28 = vadd.f32 %v2051_v44, %v5747_v13  ;;  %v5754_v44 = vld [vmem:[#allocation14_spill] sm:$0xff] }
 0x67f   :  { %v1982_v6 = vpop.f32.mrf.mxu1  ;;  %v2053_v19 = vpop.f32.mrf.mxu0 }
 0x680   :  { %v2946_v52 = vmul.f32 -1.442695, %v2056_v5  ;;  %v2057_v51 = vadd.f32 %v1982_v6, %v5745_v60  ;;  %v2059_v56 = vadd.f32 %v2053_v19, %v5746_v38 }
 0x682   :  { %3173 = vpow2.f32 %v2946_v52  ;;  %v2947_v8 = vmul.f32 -1.442695, %v2057_v51  ;;  %v2948_v63 = vmul.f32 -1.442695, %v2059_v56 }
 0x684   :  { %3175 = vpow2.f32 %v2947_v8 }
 0x685   :  { %3177 = vtanh.f32 %v2058_v28  ;;  %v5755_v28 = vld [vmem:[#allocation13_spill] sm:$0xff] }
 0x686   :  { %3179 = vpow2.f32 %v2948_v63  ;;  %v5751_v63 = vld [vmem:[#allocation9_spill] sm:$0xff] }
 0x68f   :  { %v3174_v33 = vpop.eup %3173 }
 0x690   :  { %v2063_v36 = vadd.f32 1.0, %v3174_v33  ;;  %v5752_v33 = vld [vmem:[#allocation12_spill] sm:$0xff] }
 0x691   :  { %v3176_v25 = vpop.eup %3175 }
 0x692   :  { %3181 = vrcp.f32 %v2063_v36  ;;  %v2069_v17 = vadd.f32 1.0, %v3176_v25  ;;  %v3178_v5 = vpop.eup %3177  ;;  %v5750_v36 = vld [vmem:[#allocation10_spill] sm:$0xff]  ;;  %v5753_v25 = vld [vmem:[#allocation11_spill] sm:$0xff] }
 0x693   :  { %v3180_v27 = vpop.eup %3179 }
 0x694   :  { %3183 = vrcp.f32 %v2069_v17  ;;  %v2076_v60 = vadd.f32 1.0, %v3180_v27  ;;  %v5756_v17 = vld [vmem:[#allocation16_spill] sm:$0xff]  ;;  %v5758_v27 = vld [vmem:[#allocation15_spill] sm:$0xff] }
 0x696   :  { %3185 = vrcp.f32 %v2076_v60  ;;  %v5762_v60 = vld [vmem:[#allocation21_spill] sm:$0xff] }
 0x69f   :  { %v3182_v52 = vpop.eup %3181 }
 0x6a0   :  { %v2080_v6 = vmul.f32 %v3182_v52, %v3178_v5  ;;  %v5757_v5 = vld [vmem:[#allocation17_spill] sm:$0xff]  ;;  %v5759_v52 = vld [vmem:[#allocation20_spill] sm:$0xff] }
 0x6a1   :  { %v3184_v51 = vpop.eup %3183 }
 0x6a2   :  { %v2079_v8 = vmul.f32 %v3184_v51, %v4976_v43  ;;  %v5749_v43 = vld [vmem:[#allocation8_spill] sm:$0xff]  ;;  %v5761_v51 = vld [vmem:[#allocation22_spill] sm:$0xff] }
 0x6a3   :  { %v3186_v56 = vpop.eup %3185 }
 0x6a4   :  { %v5054_v38 = vadd.f32 %v2080_v6, %v2079_v8  ;;  %v5760_v6 = vld [vmem:[#allocation19_spill] sm:$0xff]  ;;  %v5763_v8 = vld [vmem:[#allocation24_spill] sm:$0xff] }
 0x6a6   :  { %3187 = vtanh.f32 %v5054_v38 }
 0x6b3   :  { %v3188_v13 = vpop.eup %3187 }
 0x6b4   :  { %v5057_v19 = vmul.f32 %v3188_v13, %v3186_v56  ;;  %v5764_v56 = vld [vmem:[#allocation23_spill] sm:$0xff]  ;;  %v5765_v13 = vmov 0.0  }
 0x6b6   :  { %5748 = vst [vmem:[#allocation28_spill] sm:$0xff] %v5057_v19  ;;  %2158 = vmatmul.mubr.f32.vlgmr.msra.gmra.mxu1 %v5057_v19  ;;  %2229 = vmatmul.mubr.f32.vlgmr.msra.gmra.mxu0 %v5057_v19  ;;  %v5766_v19 = vld [vmem:[#allocation26_spill] sm:$0xff] }
 0x6b7   :  { %2273 = vmatpush1.msra.mxu1 %v4520_v20  ;;  %2344 = vmatpush1.msra.mxu0 %v4526_v53 }
 0x6b8   :  { %2274 = vmatprep.subr.mxu1 %v4532_v16  ;;  %2345 = vmatprep.subr.mxu0 %v4538_v59 }
 0x6b9   :  { %2275 = vmatpush1.msra.mxu1 %v4544_v9  ;;  %2346 = vmatpush1.msra.mxu0 %v4550_v42 }
 0x6ba   :  { %2276 = vmatprep.subr.mxu1 %v4556_v21  ;;  %2347 = vmatprep.subr.mxu0 %v4562_v3 }
 0x6bb   :  { %2277 = vmatpush1.msra.mxu1 %v4568_v2  ;;  %2348 = vmatpush1.msra.mxu0 %v4574_v24 }
 0x6bc   :  { %2278 = vmatprep.subr.mxu1 %v4580_v46  ;;  %2349 = vmatprep.subr.mxu0 %v4586_v61 }
 0x6bd   :  { %2279 = vmatpush1.msra.mxu1 %v4592_v37  ;;  %2350 = vmatpush1.msra.mxu0 %v4598_v49 }
 0x6be   :  { %2280 = vmatprep.subr.mxu1 %v4604_v14  ;;  %2351 = vmatprep.subr.mxu0 %v4610_v57 }
 0x6bf   :  { %2281 = vmatpush1.msra.mxu1 %v4616_v22  ;;  %2352 = vmatpush1.msra.mxu0 %v4622_v62 }
 0x6c0   :  { %2282 = vmatprep.subr.mxu1 %v4628_v40  ;;  %2353 = vmatprep.subr.mxu0 %v4634_v55 }
 0x6c1   :  { %2283 = vmatpush1.msra.mxu1 %v4640_v41  ;;  %2354 = vmatpush1.msra.mxu0 %v4646_v50 }
 0x6c2   :  { %2284 = vmatprep.subr.mxu1 %v4652_v58  ;;  %2355 = vmatprep.subr.mxu0 %v4658_v18 }
 0x6c3   :  { %2285 = vmatpush1.msra.mxu1 %v4664_v48  ;;  %2356 = vmatpush1.msra.mxu0 %v4670_v23 }
 0x6c4   :  { %2286 = vmatprep.subr.mxu1 %v4676_v12  ;;  %2357 = vmatprep.subr.mxu0 %v4682_v32 }
 0x6c5   :  { %2287 = vmatpush1.msra.mxu1 %v4688_v4  ;;  %2358 = vmatpush1.msra.mxu0 %v4694_v45 }
 0x6c6   :  { %2288 = vmatprep.subr.mxu1 %v4700_v15  ;;  %2359 = vmatprep.subr.mxu0 %v4706_v10 }
 0x6c7   :  { %2289 = vmatpush1.msra.mxu1 %v4712_v30  ;;  %2360 = vmatpush1.msra.mxu0 %v4718_v1 }
 0x6c8   :  { %2290 = vmatprep.subr.mxu1 %v4724_v54  ;;  %2361 = vmatprep.subr.mxu0 %v4730_v0 }
 0x6c9   :  { %2291 = vmatpush1.msra.mxu1 %v4736_v47  ;;  %2362 = vmatpush1.msra.mxu0 %v4742_v39 }
 0x6ca   :  { %2292 = vmatprep.subr.mxu1 %v4748_v26  ;;  %2363 = vmatprep.subr.mxu0 %v4754_v29 }
 0x6cb   :  { %2293 = vmatpush1.msra.mxu1 %v4760_v11  ;;  %2364 = vmatpush1.msra.mxu0 %v4766_v34 }
 0x6cc   :  { %2294 = vmatprep.subr.mxu1 %v4772_v35  ;;  %2365 = vmatprep.subr.mxu0 %v4778_v31 }
 0x6cd   :  { %2295 = vmatpush1.msra.mxu1 %v5699_v7  ;;  %2366 = vmatpush1.msra.mxu0 %v5749_v43 }
 0x6ce   :  { %2296 = vmatprep.subr.mxu1 %v5750_v36  ;;  %2367 = vmatprep.subr.mxu0 %v5751_v63  ;;  %v5772_v63 = vld [vmem:[#allocation76_spill] sm:$0xff] }
 0x6cf   :  { %2297 = vmatpush1.msra.mxu1 %v5752_v33  ;;  %2368 = vmatpush1.msra.mxu0 %v5753_v25  ;;  %v5771_v33 = vld [vmem:[#allocation78_spill] sm:$0xff] }
 0x6d0   :  { %2298 = vmatprep.subr.mxu1 %v5754_v44  ;;  %2369 = vmatprep.subr.mxu0 %v5755_v28 }
 0x6d1   :  { %2299 = vmatpush1.msra.mxu1 %v5756_v17  ;;  %2370 = vmatpush1.msra.mxu0 %v5757_v5  ;;  %v5767_v5 = vld [vmem:[#allocation4_spill] sm:$0xff] }
 0x6d2   :  { %2300 = vmatprep.subr.mxu1 %v5758_v27  ;;  %2371 = vmatprep.subr.mxu0 %v5759_v52  ;;  %v5768_v27 = vld [vmem:[#allocation5_spill] sm:$0xff] }
 0x6d3   :  { %2301 = vmatpush1.msra.mxu1 %v5760_v6  ;;  %2372 = vmatpush1.msra.mxu0 %v5761_v51  ;;  %v5769_v6 = vld [vmem:[#allocation75_spill] sm:$0xff] }
 0x6d4   :  { %2302 = vmatprep.subr.mxu1 %v5762_v60  ;;  %2373 = vmatprep.subr.mxu0 %v5763_v8  ;;  %v5770_v60 = vld [vmem:[#allocation77_spill] sm:$0xff] }
 0x6d5   :  { %2303 = vmatpush1.msra.mxu1 %v5764_v56  ;;  %2336 = vmatprep.mubr.f32.mxu1 %v5765_v13 }
 0x6d6   :  { %2374 = vmatpush1.msra.mxu0 %v5766_v19  ;;  %2407 = vmatprep.mubr.f32.mxu0 %v5765_v13 }
 0x6d7   :  { %2451 = vmatprep.subr.mxu1 %v5767_v5  ;;  %2522 = vmatprep.subr.mxu0 %v5768_v27 }
 0x776   :  { %v2159_v52 = vpop.f32.mrf.mxu1  ;;  %v2230_v8 = vpop.f32.mrf.mxu0 }
 0x777   :  { %v2235_v17 = vadd.f32 %v2159_v52, %v5769_v6  ;;  %v2237_v13 = vadd.f32 %v2230_v8, %v5772_v63 }
 0x778   :  { %v2161_v51 = vpop.f32.mrf.mxu1  ;;  %v2232_v25 = vpop.f32.mrf.mxu0 }
 0x779   :  { %v2949_v28 = vmul.f32 -1.442695, %v2235_v17  ;;  %v2236_v44 = vadd.f32 %v2161_v51, %v5770_v60  ;;  %v2238_v19 = vadd.f32 %v2232_v25, %v5771_v33 }
 0x77b   :  { %3189 = vpow2.f32 %v2949_v28  ;;  %v2950_v56 = vmul.f32 -1.442695, %v2236_v44  ;;  %v2951_v36 = vmul.f32 -1.442695, %v2238_v19 }
 0x77d   :  { %3191 = vpow2.f32 %v2950_v56 }
 0x77e   :  { %3193 = vtanh.f32 %v2237_v13  ;;  %v2647_v13 = vld [vmem:[%s5396_s14 + $0x70] sm:$0xff] }
 0x77f   :  { %3195 = vpow2.f32 %v2951_v36 }
 0x788   :  { %v3190_v5 = vpop.eup %3189 }
 0x789   :  { %v2242_v43 = vadd.f32 1.0, %v3190_v5  ;;  %v5795_v5 = vld [vmem:[#allocation66_spill] sm:$0xff] }
 0x78a   :  { %v3192_v27 = vpop.eup %3191 }
 0x78b   :  { %3197 = vrcp.f32 %v2242_v43  ;;  %v2248_v52 = vadd.f32 1.0, %v3192_v27  ;;  %v3194_v17 = vpop.eup %3193  ;;  %v2646_v27 = vld [vmem:[%s5396_s14 + $0x68] sm:$0xff] }
 0x78c   :  { %v3196_v6 = vpop.eup %3195 }
 0x78d   :  { %3199 = vrcp.f32 %v2248_v52  ;;  %v2255_v60 = vadd.f32 1.0, %v3196_v6  ;;  %v2645_v52 = vld [vmem:[%s5396_s14 + $0x60] sm:$0xff]  ;;  %v2643_v6 = vld [vmem:[%s5396_s14 + $0x50] sm:$0xff] }
 0x78f   :  { %3201 = vrcp.f32 %v2255_v60  ;;  %v2639_v60 = vld [vmem:[%s5396_s14 + $0x30] sm:$0xff] }
 0x798   :  { %v3198_v28 = vpop.eup %3197 }
 0x799   :  { %v2259_v51 = vmul.f32 %v3198_v28, %v3194_v17  ;;  %v2644_v17 = vld [vmem:[%s5396_s14 + $0x58] sm:$0xff]  ;;  %v2642_v28 = vld [vmem:[%s5396_s14 + $0x48] sm:$0xff] }
 0x79a   :  { %v3200_v44 = vpop.eup %3199 }
 0x79b   :  { %v2258_v56 = vmul.f32 %v3200_v44, %v5054_v38  ;;  %v2640_v44 = vld [vmem:[%s5396_s14 + $0x38] sm:$0xff] }
 0x79c   :  { %v3202_v19 = vpop.eup %3201 }
 0x79d   :  { %v5132_v33 = vadd.f32 %v2259_v51, %v2258_v56  ;;  %v2641_v51 = vld [vmem:[%s5396_s14 + $0x40] sm:$0xff]  ;;  %v2638_v56 = vld [vmem:[%s5396_s14 + $0x28] sm:$0xff] }
 0x79f   :  { %3203 = vtanh.f32 %v5132_v33 }
 0x7ac   :  { %v3204_v63 = vpop.eup %3203 }
 0x7ad   :  { %v5135_v25 = vmul.f32 %v3204_v63, %v3202_v19  ;;  %v2636_v19 = vld [vmem:[%s5396_s14 + $0x18] sm:$0xff]  ;;  %v2635_v63 = vld [vmem:[%s5396_s14 + $0x10] sm:$0xff] }
 0x7af   :  { %2337 = vmatmul.mubr.f32.vlgmr.msra.gmra.mxu1 %v5135_v25  ;;  %2408 = vmatmul.mubr.f32.vlgmr.msra.gmra.mxu0 %v5135_v25 }
 0x7b0   :  { %2452 = vmatpush1.msra.mxu1 %v4520_v20  ;;  %2523 = vmatpush1.msra.mxu0 %v4526_v53  ;;  %v2648_v20 = vld [vmem:[%s5396_s14 + $0x78] sm:$0xff] }
 0x7b1   :  { %2453 = vmatprep.subr.mxu1 %v4532_v16  ;;  %2524 = vmatprep.subr.mxu0 %v4538_v59  ;;  %v5791_v16 = vld [vmem:[#allocation79_spill] sm:$0xff] }
 0x7b2   :  { %2454 = vmatpush1.msra.mxu1 %v4544_v9  ;;  %2525 = vmatpush1.msra.mxu0 %v4550_v42 }
 0x7b3   :  { %2455 = vmatprep.subr.mxu1 %v4556_v21  ;;  %2526 = vmatprep.subr.mxu0 %v4562_v3  ;;  %v5792_v21 = vld [vmem:[#allocation81_spill] sm:$0xff] }
 0x7b4   :  { %2456 = vmatpush1.msra.mxu1 %v4568_v2  ;;  %2527 = vmatpush1.msra.mxu0 %v4574_v24 }
 0x7b5   :  { %2457 = vmatprep.subr.mxu1 %v4580_v46  ;;  %2528 = vmatprep.subr.mxu0 %v4586_v61  ;;  %v5793_v61 = vld [vmem:[#allocation82_spill] sm:$0xff] }
 0x7b6   :  { %2458 = vmatpush1.msra.mxu1 %v4592_v37  ;;  %2529 = vmatpush1.msra.mxu0 %v4598_v49  ;;  %v5794_v49 = vld [vmem:[#allocation80_spill] sm:$0xff] }
 0x7b7   :  { %2459 = vmatprep.subr.mxu1 %v4604_v14  ;;  %2530 = vmatprep.subr.mxu0 %v4610_v57 }
 0x7b8   :  { %2460 = vmatpush1.msra.mxu1 %v4616_v22  ;;  %2531 = vmatpush1.msra.mxu0 %v4622_v62 }
 0x7b9   :  { %2461 = vmatprep.subr.mxu1 %v4628_v40  ;;  %2532 = vmatprep.subr.mxu0 %v4634_v55 }
 0x7ba   :  { %2462 = vmatpush1.msra.mxu1 %v4640_v41  ;;  %2533 = vmatpush1.msra.mxu0 %v4646_v50 }
 0x7bb   :  { %2463 = vmatprep.subr.mxu1 %v4652_v58  ;;  %2534 = vmatprep.subr.mxu0 %v4658_v18 }
 0x7bc   :  { %2464 = vmatpush1.msra.mxu1 %v4664_v48  ;;  %2535 = vmatpush1.msra.mxu0 %v4670_v23 }
 0x7bd   :  { %2465 = vmatprep.subr.mxu1 %v4676_v12  ;;  %2536 = vmatprep.subr.mxu0 %v4682_v32  ;;  %v5786_v12 = vld [vmem:[#allocation21_spill] sm:$0xff]  ;;  %v5788_v32 = vld [vmem:[#allocation23_spill] sm:$0xff] }
 0x7be   :  { %2466 = vmatpush1.msra.mxu1 %v4688_v4  ;;  %2537 = vmatpush1.msra.mxu0 %v4694_v45  ;;  %v5785_v45 = vld [vmem:[#allocation22_spill] sm:$0xff]  ;;  %v5787_v4 = vld [vmem:[#allocation24_spill] sm:$0xff] }
 0x7bf   :  { %2467 = vmatprep.subr.mxu1 %v4700_v15  ;;  %2538 = vmatprep.subr.mxu0 %v4706_v10  ;;  %v5789_v10 = vmov 0.0   ;;  %v5790_v15 = vld [vmem:[#allocation26_spill] sm:$0xff] }
 0x7c0   :  { %2468 = vmatpush1.msra.mxu1 %v4712_v30  ;;  %2539 = vmatpush1.msra.mxu0 %v4718_v1  ;;  %v5773_v30 = vld [vmem:[#allocation8_spill] sm:$0xff]  ;;  %v5784_v1 = vld [vmem:[#allocation19_spill] sm:$0xff] }
 0x7c1   :  { %2469 = vmatprep.subr.mxu1 %v4724_v54  ;;  %2540 = vmatprep.subr.mxu0 %v4730_v0  ;;  %v5774_v0 = vld [vmem:[#allocation10_spill] sm:$0xff]  ;;  %v5783_v54 = vld [vmem:[#allocation20_spill] sm:$0xff] }
 0x7c2   :  { %2470 = vmatpush1.msra.mxu1 %v4736_v47  ;;  %2541 = vmatpush1.msra.mxu0 %v4742_v39  ;;  %v5775_v47 = vld [vmem:[#allocation9_spill] sm:$0xff]  ;;  %v5776_v39 = vld [vmem:[#allocation12_spill] sm:$0xff] }
 0x7c3   :  { %2471 = vmatprep.subr.mxu1 %v4748_v26  ;;  %2542 = vmatprep.subr.mxu0 %v4754_v29  ;;  %v5777_v26 = vld [vmem:[#allocation11_spill] sm:$0xff]  ;;  %v5778_v29 = vld [vmem:[#allocation14_spill] sm:$0xff] }
 0x7c4   :  { %2472 = vmatpush1.msra.mxu1 %v4760_v11  ;;  %2543 = vmatpush1.msra.mxu0 %v4766_v34  ;;  %v5779_v11 = vld [vmem:[#allocation13_spill] sm:$0xff]  ;;  %v5780_v34 = vld [vmem:[#allocation16_spill] sm:$0xff] }
 0x7c5   :  { %2473 = vmatprep.subr.mxu1 %v4772_v35  ;;  %2544 = vmatprep.subr.mxu0 %v4778_v31  ;;  %v5781_v35 = vld [vmem:[#allocation17_spill] sm:$0xff]  ;;  %v5782_v31 = vld [vmem:[#allocation15_spill] sm:$0xff] }
 0x7c6   :  { %2474 = vmatpush1.msra.mxu1 %v5699_v7  ;;  %2545 = vmatpush1.msra.mxu0 %v5773_v30  ;;  %v2634_v30 = vld [vmem:[%s5396_s14 + $0x8] sm:$0xff] }
 0x7c7   :  { %2475 = vmatprep.subr.mxu1 %v5774_v0  ;;  %2546 = vmatprep.subr.mxu0 %v5775_v47  ;;  %v2633_v0 = vld [vmem:[%s5396_s14] sm:$0xff]  ;;  %v5796_v47 = vld [vmem:[#allocation6_spill] sm:$0xff] }
 0x7c8   :  { %2476 = vmatpush1.msra.mxu1 %v5776_v39  ;;  %2547 = vmatpush1.msra.mxu0 %v5777_v26  ;;  %v5797_v39 = vld [vmem:[#allocation18_spill] sm:$0xff]  ;;  %v5798_v26 = vld [vmem:[#allocation25_spill] sm:$0xff] }
 0x7c9   :  { %2477 = vmatprep.subr.mxu1 %v5778_v29  ;;  %2548 = vmatprep.subr.mxu0 %v5779_v11  ;;  %v5799_v29 = vld [vmem:[#allocation28_spill] sm:$0xff] }
 0x7ca   :  { %2478 = vmatpush1.msra.mxu1 %v5780_v34  ;;  %2549 = vmatpush1.msra.mxu0 %v5781_v35  ;;  %v5800_v34 = vld [vmem:[#allocation83_spill] sm:$0xff] }
 0x7cb   :  { %2479 = vmatprep.subr.mxu1 %v5782_v31  ;;  %2550 = vmatprep.subr.mxu0 %v5783_v54 }
 0x7cc   :  { %2480 = vmatpush1.msra.mxu1 %v5784_v1  ;;  %2551 = vmatpush1.msra.mxu0 %v5785_v45  ;;  %v5801_v1 = vld [vmem:[#allocation85_spill] sm:$0xff] }
 0x7cd   :  { %2481 = vmatprep.subr.mxu1 %v5786_v12  ;;  %2552 = vmatprep.subr.mxu0 %v5787_v4 }
 0x7ce   :  { %2482 = vmatpush1.msra.mxu1 %v5788_v32  ;;  %2515 = vmatprep.mubr.f32.mxu1 %v5789_v10 }
 0x7cf   :  { %2553 = vmatpush1.msra.mxu0 %v5790_v15  ;;  %2586 = vmatprep.mubr.f32.mxu0 %v5789_v10  ;;  %v5802_v10 = vld [vmem:[#allocation86_spill] sm:$0xff] }
 0x7d0   :  { %3059 = vmatprep.subr.mxu1 %v2648_v20 }
 0x86f   :  { %v2338_v53 = vpop.f32.mrf.mxu1  ;;  %v2409_v2 = vpop.f32.mrf.mxu0 }
 0x870   :  { %v2414_v59 = vadd.f32 %v2338_v53, %v5791_v16  ;;  %v2416_v14 = vadd.f32 %v2409_v2, %v5794_v49  ;;  %v5275_v2 = vld [vmem:[%s5397_s15] ss:$0 sm:$0xff] }
 0x871   :  { %v2340_v9 = vpop.f32.mrf.mxu1  ;;  %v2411_v46 = vpop.f32.mrf.mxu0 }
 0x872   :  { %v2952_v42 = vmul.f32 -1.442695, %v2414_v59  ;;  %v2415_v3 = vadd.f32 %v2340_v9, %v5792_v21  ;;  %v2417_v37 = vadd.f32 %v2411_v46, %v5793_v61  ;;  %v5804_v21 = vlaneseq }
 0x874   :  { %3205 = vpow2.f32 %v2952_v42  ;;  %v2953_v24 = vmul.f32 -1.442695, %v2415_v3  ;;  %v2954_v57 = vmul.f32 -1.442695, %v2417_v37  ;;  %v5270_v3 = vand.u32 127, %v5804_v21 }
 0x876   :  { %3207 = vpow2.f32 %v2953_v24  ;;  %vm2763_vm4 = vcmp.lt.s32.totalorder %v5270_v3, 4  ;;  %vm2844_vm5 = vcmp.eq.s32.totalorder %v5270_v3, 4 }
 0x877   :  { %3209 = vtanh.f32 %v2416_v14 }
 0x878   :  { %3211 = vpow2.f32 %v2954_v57 }
 0x881   :  { %v3206_v22 = vpop.eup %3205 }
 0x882   :  { %v2421_v62 = vadd.f32 1.0, %v3206_v22 }
 0x883   :  { %v3208_v40 = vpop.eup %3207 }
 0x884   :  { %3213 = vrcp.f32 %v2421_v62  ;;  %v2427_v55 = vadd.f32 1.0, %v3208_v40  ;;  %v3210_v41 = vpop.eup %3209 }
 0x885   :  { %v3212_v50 = vpop.eup %3211 }
 0x886   :  { %3215 = vrcp.f32 %v2427_v55  ;;  %v2434_v23 = vadd.f32 1.0, %v3212_v50 }
 0x888   :  { %3217 = vrcp.f32 %v2434_v23 }
 0x891   :  { %v3214_v58 = vpop.eup %3213 }
 0x892   :  { %v2438_v18 = vmul.f32 %v3214_v58, %v3210_v41 }
 0x893   :  { %v3216_v48 = vpop.eup %3215 }
 0x894   :  { %v2437_v7 = vmul.f32 %v3216_v48, %v5132_v33  ;;  %v2637_v33 = vld [vmem:[%s5396_s14 + $0x20] sm:$0xff] }
 0x895   :  { %v3218_v43 = vpop.eup %3217 }
 0x896   :  { %v5211_v38 = vadd.f32 %v2438_v18, %v2437_v7 }
 0x898   :  { %3219 = vtanh.f32 %v5211_v38 }
 0x8a5   :  { %v3220_v36 = vpop.eup %3219 }
 0x8a6   :  { %v2441_v8 = vmul.f32 %v3220_v36, %v3218_v43 }
 0x8a8   :  { %2516 = vmatmul.mubr.f32.vlgmr.msra.gmra.mxu1 %v2441_v8  ;;  %2587 = vmatmul.mubr.f32.vlgmr.msra.gmra.mxu0 %v2441_v8 }
 0x8a9   :  { %3060 = vmatpush3.msra.mxu1 %v2648_v20  ;;  %3091 = vmatprep.mubr.f32.mxu1 %v5795_v5  ;;  %v5803_v20 = vld [vmem:[#allocation84_spill] sm:$0xff] }
 0x8aa   :  { %3061 = vmatprep.subr.mxu1 %v2647_v13 }
 0x8ab   :  { %3062 = vmatpush3.msra.mxu1 %v2647_v13 }
 0x8ac   :  { %3063 = vmatprep.subr.mxu1 %v2646_v27 }
 0x8ad   :  { %3064 = vmatpush3.msra.mxu1 %v2646_v27 }
 0x8ae   :  { %3065 = vmatprep.subr.mxu1 %v2645_v52 }
 0x8af   :  { %3066 = vmatpush3.msra.mxu1 %v2645_v52 }
 0x8b0   :  { %3067 = vmatprep.subr.mxu1 %v2644_v17 }
 0x8b1   :  { %3068 = vmatpush3.msra.mxu1 %v2644_v17 }
 0x8b2   :  { %3069 = vmatprep.subr.mxu1 %v2643_v6 }
 0x8b3   :  { %3070 = vmatpush3.msra.mxu1 %v2643_v6 }
 0x8b4   :  { %3071 = vmatprep.subr.mxu1 %v2642_v28 }
 0x8b5   :  { %3072 = vmatpush3.msra.mxu1 %v2642_v28 }
 0x8b6   :  { %3073 = vmatprep.subr.mxu1 %v2641_v51 }
 0x8b7   :  { %3074 = vmatpush3.msra.mxu1 %v2641_v51 }
 0x8b8   :  { %3075 = vmatprep.subr.mxu1 %v2640_v44 }
 0x8b9   :  { %3076 = vmatpush3.msra.mxu1 %v2640_v44 }
 0x8ba   :  { %3077 = vmatprep.subr.mxu1 %v2639_v60 }
 0x8bb   :  { %3078 = vmatpush3.msra.mxu1 %v2639_v60 }
 0x8bc   :  { %3079 = vmatprep.subr.mxu1 %v2638_v56 }
 0x8bd   :  { %3080 = vmatpush3.msra.mxu1 %v2638_v56 }
 0x8be   :  { %3081 = vmatprep.subr.mxu1 %v2637_v33 }
 0x8bf   :  { %3082 = vmatpush3.msra.mxu1 %v2637_v33 }
 0x8c0   :  { %3083 = vmatprep.subr.mxu1 %v2636_v19 }
 0x8c1   :  { %3084 = vmatpush3.msra.mxu1 %v2636_v19 }
 0x8c2   :  { %3085 = vmatprep.subr.mxu1 %v2635_v63 }
 0x8c3   :  { %3086 = vmatpush3.msra.mxu1 %v2635_v63 }
 0x8c4   :  { %3087 = vmatprep.subr.mxu1 %v2634_v30 }
 0x8c5   :  { %3088 = vmatpush3.msra.mxu1 %v2634_v30 }
 0x8c6   :  { %3089 = vmatprep.subr.mxu1 %v2633_v0 }
 0x8c7   :  { %3090 = vmatpush3.msra.mxu1 %v2633_v0 }
 0x8c8   :  { %3092 = vmatmul.mubr.f32.vlgmr.msra.gmra.mxu1 %v5796_v47 }
 0x8c9   :  { %3094 = vmatprep.mubr.f32.mxu1 %v5797_v39 }
 0x8cc   :  { %3095 = vmatmul.mubr.f32.gmra.mxu1 %v5798_v26 }
 0x8cd   :  { %3097 = vmatprep.mubr.f32.mxu1 %v5799_v29 }
 0x8d0   :  { %3098 = vmatmul.mubr.f32.gmra.mxu1 %v5135_v25 }
 0x8d1   :  { %3100 = vmatprep.mubr.f32.mxu1 %v2441_v8 }
 0x968   :  { %v2517_v11 = vpop.f32.mrf.mxu1  ;;  %v2588_v12 = vpop.f32.mrf.mxu0 }
 0x969   :  { %v2593_v35 = vadd.f32 %v2517_v11, %v5800_v34  ;;  %v2595_v53 = vadd.f32 %v2588_v12, %v5803_v20 }
 0x96a   :  { %v2519_v31 = vpop.f32.mrf.mxu1  ;;  %v2590_v32 = vpop.f32.mrf.mxu0 }
 0x96b   :  { %v2955_v54 = vmul.f32 -1.442695, %v2593_v35  ;;  %v2594_v45 = vadd.f32 %v2519_v31, %v5801_v1  ;;  %v2596_v15 = vadd.f32 %v2590_v32, %v5802_v10 }
 0x96d   :  { %3221 = vpow2.f32 %v2955_v54  ;;  %v2956_v4 = vmul.f32 -1.442695, %v2594_v45  ;;  %v2957_v16 = vmul.f32 -1.442695, %v2596_v15 }
 0x96f   :  { %3223 = vpow2.f32 %v2956_v4 }
 0x970   :  { %3225 = vtanh.f32 %v2595_v53 }
 0x971   :  { %3227 = vpow2.f32 %v2957_v16 }
 0x97a   :  { %v3222_v59 = vpop.eup %3221 }
 0x97b   :  { %v2600_v25 = vadd.f32 1.0, %v3222_v59 }
 0x97c   :  { %v3224_v9 = vpop.eup %3223 }
 0x97d   :  { %3229 = vrcp.f32 %v2600_v25  ;;  %v2606_v42 = vadd.f32 1.0, %v3224_v9  ;;  %v3226_v24 = vpop.eup %3225 }
 0x97e   :  { %v3228_v61 = vpop.eup %3227 }
 0x97f   :  { %3231 = vrcp.f32 %v2606_v42  ;;  %v2613_v55 = vadd.f32 1.0, %v3228_v61 }
 0x981   :  { %3233 = vrcp.f32 %v2613_v55 }
 0x988   :  { %v3093_v46 = vpop.f32.mrf.mxu1 }
 0x989   :  { %v5279_v37 = vadd.f32 %v3093_v46, %v5275_v2 }
 0x98a   :  { %v3230_v49 = vpop.eup %3229  ;;  %v2722_v14 = vpop.f32.mrf.mxu1 }
 0x98b   :  { %v2617_v57 = vmul.f32 %v3230_v49, %v3226_v24  ;;  %v5282_v22 = vadd.f32 %v5275_v2, %v2722_v14  ;;  %v2765_v62 = vsel %vm2763_vm4, %v5279_v37, -1e+30 }
 0x98c   :  { %v3232_v40 = vpop.eup %3231  ;;  %2774 = vmax.xlane.f32.xlu1 %v2765_v62  ;;  %v3096_v41 = vpop.f32.mrf.mxu1 }
 0x98d   :  { %v2616_v50 = vmul.f32 %v3232_v40, %v5211_v38  ;;  %v5289_v58 = vadd.f32 %v3096_v41, %v5275_v2  ;;  %v2764_v18 = vsel %vm2763_vm4, %v5282_v22, -1e+30 }
 0x98e   :  { %v2732_v48 = vpop.f32.mrf.mxu1  ;;  %2772 = vmax.xlane.f32.xlu0 %v2764_v18  ;;  %v3234_v17 = vpop.eup %3233 }
 0x98f   :  { %v2618_v23 = vadd.f32 %v2617_v57, %v2616_v50  ;;  %v5295_v43 = vadd.f32 %v5275_v2, %v2732_v48  ;;  %v2767_v36 = vsel %vm2763_vm4, %v5289_v58, -1e+30 }
 0x990   :  { %v3099_v7 = vpop.f32.mrf.mxu1 }
 0x991   :  { %3235 = vtanh.f32 %v2618_v23  ;;  %2624 = vst [vmem:[%s5398_s18] sm:$0xff] %v2618_v23  ;;  %v5307_v13 = vadd.f32 %v3099_v7, %v5275_v2  ;;  %v2766_v27 = vsel %vm2763_vm4, %v5295_v43, -1e+30 }
 0x992   :  { %v2742_v38 = vpop.f32.mrf.mxu1  ;;  %2778 = vmax.xlane.f32.xlu0 %v2767_v36 }
 0x993   :  { %v5304_v8 = vadd.f32 %v5275_v2, %v2742_v38  ;;  %v2769_v52 = vsel %vm2763_vm4, %v5307_v13, -1e+30 }
 0x995   :  { %v2768_v5 = vsel %vm2763_vm4, %v5304_v8, -1e+30 }
 0x996   :  { %2780 = vmax.xlane.f32.xlu1 %v2768_v5  ;;  %2776 = vmax.xlane.f32.xlu0 %v2766_v27 }
 0x99a   :  { %2782 = vmax.xlane.f32.xlu0 %v2769_v52 }
 0x99e   :  { %v3236_v6 = vpop.eup %3235 }
 0x99f   :  { %v2620_v28 = vmul.f32 %v3236_v6, %v3234_v17 }
 0x9a1   :  { %2623 = vst [vmem:[%s5399_s17] sm:$0xff] %v2620_v28  ;;  %3101 = vmatmul.mubr.f32.gmra.mxu1 %v2620_v28 }
 0xa15   :  { %v2775_v60 = vpop.xlane.xlu1 %2774 }
 0xa16   :  { %v2789_v33 = vsub.f32 %v2765_v62, %v2775_v60 }
 0xa17   :  { %v2773_v51 = vpop.xlane.xlu0 %2772 }
 0xa18   :  { %v2788_v19 = vsub.f32 %v2764_v18, %v2773_v51  ;;  %v2798_v63 = vmul.f32 1.442695, %v2789_v33 }
 0xa1a   :  { %v2796_v47 = vmul.f32 1.442695, %v2788_v19  ;;  %3237 = vpow2.f32 %v2798_v63 }
 0xa1b   :  { %v2779_v44 = vpop.xlane.xlu0 %2778 }
 0xa1c   :  { %v2791_v30 = vsub.f32 %v2767_v36, %v2779_v44  ;;  %3239 = vpow2.f32 %v2796_v47 }
 0xa1e   :  { %v2802_v29 = vmul.f32 1.442695, %v2791_v30 }
 0xa1f   :  { %v2777_v56 = vpop.xlane.xlu0 %2776  ;;  %v2781_v26 = vpop.xlane.xlu1 %2780 }
 0xa20   :  { %v2790_v39 = vsub.f32 %v2766_v27, %v2777_v56  ;;  %v2792_v34 = vsub.f32 %v2768_v5, %v2781_v26  ;;  %3241 = vpow2.f32 %v2802_v29 }
 0xa22   :  { %v2800_v35 = vmul.f32 1.442695, %v2790_v39  ;;  %v2804_v54 = vmul.f32 1.442695, %v2792_v34 }
 0xa23   :  { %v2783_v0 = vpop.xlane.xlu0 %2782 }
 0xa24   :  { %v2793_v11 = vsub.f32 %v2769_v52, %v2783_v0  ;;  %3243 = vpow2.f32 %v2800_v35 }
 0xa26   :  { %v2806_v31 = vmul.f32 1.442695, %v2793_v11 }
 0xa27   :  { %v3238_v15 = vpop.eup %3237 }
 0xa28   :  { %3245 = vpow2.f32 %v2806_v31 }
 0xa29   :  { %3247 = vpow2.f32 %v2804_v54  ;;  %v3240_v20 = vpop.eup %3239 }
 0xa2d   :  { %v3242_v53 = vpop.eup %3241 }
 0xa31   :  { %v3244_v16 = vpop.eup %3243 }
 0xa35   :  { %v3246_v59 = vpop.eup %3245 }
 0xa36   :  { %v3248_v25 = vpop.eup %3247 }
 0xa61   :  { %v3102_v1 = vpop.f32.mrf.mxu1 }
 0xa62   :  { %v5322_v45 = vadd.f32 %v3102_v1, %v5275_v2 }
 0xa63   :  { %v2752_v12 = vpop.f32.mrf.mxu1 }
 0xa64   :  { %v5325_v4 = vadd.f32 %v5275_v2, %v2752_v12  ;;  %v2771_v32 = vsel %vm2763_vm4, %v5322_v45, -1e+30 }
 0xa65   :  { %2786 = vmax.xlane.f32.xlu0 %v2771_v32 }
 0xa66   :  { %v2770_v10 = vsel %vm2763_vm4, %v5325_v4, -1e+30 }
 0xa67   :  { %2784 = vmax.xlane.f32.xlu1 %v2770_v10 }
 0xa69   :  { %2814 = vadd.xlane.f32.xlu0 %v3238_v15 }
 0xa6b   :  { %2812 = vadd.xlane.f32.xlu1 %v3240_v20 }
 0xa6d   :  { %2818 = vadd.xlane.f32.xlu0 %v3242_v53 }
 0xa6f   :  { %2816 = vadd.xlane.f32.xlu1 %v3244_v16 }
 0xa71   :  { %2822 = vadd.xlane.f32.xlu0 %v3246_v59 }
 0xa73   :  { %2820 = vadd.xlane.f32.xlu1 %v3248_v25 }
 0xaee   :  { %v2787_v9 = vpop.xlane.xlu0 %2786 }
 0xaef   :  { %v2795_v42 = vsub.f32 %v2771_v32, %v2787_v9 }
 0xaf0   :  { %v2785_v21 = vpop.xlane.xlu1 %2784 }
 0xaf1   :  { %v2810_v2 = vmul.f32 1.442695, %v2795_v42  ;;  %v2794_v24 = vsub.f32 %v2770_v10, %v2785_v21 }
 0xaf2   :  { %v2815_v46 = vpop.xlane.xlu0 %2814 }
 0xaf3   :  { %3249 = vpow2.f32 %v2810_v2  ;;  %v2808_v61 = vmul.f32 1.442695, %v2794_v24 }
 0xaf4   :  { %3251 = vrcp.f32 %v2815_v46  ;;  %v2813_v49 = vpop.xlane.xlu1 %2812 }
 0xaf5   :  { %3253 = vpow2.f32 %v2808_v61 }
 0xaf6   :  { %3255 = vrcp.f32 %v2813_v49  ;;  %v2819_v14 = vpop.xlane.xlu0 %2818 }
 0xaf7   :  { %3257 = vrcp.f32 %v2819_v14 }
 0xaf8   :  { %v2817_v57 = vpop.xlane.xlu1 %2816 }
 0xaf9   :  { %3259 = vrcp.f32 %v2817_v57 }
 0xafa   :  { %v2823_v62 = vpop.xlane.xlu0 %2822 }
 0xafb   :  { %3261 = vrcp.f32 %v2823_v62 }
 0xafc   :  { %v2821_v40 = vpop.xlane.xlu1 %2820 }
 0xafd   :  { %3263 = vrcp.f32 %v2821_v40 }
 0xb00   :  { %v3250_v55 = vpop.eup %3249 }
 0xb01   :  { %v3252_v41 = vpop.eup %3251  ;;  %2826 = vadd.xlane.f32.xlu0 %v3250_v55 }
 0xb02   :  { %v3254_v50 = vpop.eup %3253  ;;  %v2837_v18 = vmul.f32 %v3252_v41, %v3238_v15 }
 0xb03   :  { %v3256_v48 = vpop.eup %3255  ;;  %2824 = vadd.xlane.f32.xlu1 %v3254_v50 }
 0xb04   :  { %v3258_v23 = vpop.eup %3257  ;;  %v2846_v7 = vsel %vm2844_vm5, %v5279_v37, %v2837_v18  ;;  %v2836_v36 = vmul.f32 %v3256_v48, %v3240_v20 }
 0xb05   :  { %2854 = vst [vmem:[%s5400_s16 + $0x8] sm:$0xff] %v2846_v7  ;;  %v2839_v38 = vmul.f32 %v3258_v23, %v3242_v53 }
 0xb06   :  { %v3260_v5 = vpop.eup %3259  ;;  %v2845_v27 = vsel %vm2844_vm5, %v5282_v22, %v2836_v36 }
 0xb07   :  { %2853 = vst [vmem:[%s5400_s16] sm:$0xff] %v2845_v27  ;;  %v2848_v52 = vsel %vm2844_vm5, %v5289_v58, %v2839_v38  ;;  %v2838_v37 = vmul.f32 %v3260_v5, %v3244_v16 }
 0xb08   :  { %v3262_v17 = vpop.eup %3261  ;;  %2856 = vst [vmem:[%s5400_s16 + $0x18] sm:$0xff] %v2848_v52 }
 0xb09   :  { %v2847_v6 = vsel %vm2844_vm5, %v5295_v43, %v2838_v37  ;;  %v2841_v28 = vmul.f32 %v3262_v17, %v3246_v59 }
 0xb0a   :  { %v3264_v22 = vpop.eup %3263  ;;  %2855 = vst [vmem:[%s5400_s16 + $0x10] sm:$0xff] %v2847_v6 }
 0xb0b   :  { %v2850_v58 = vsel %vm2844_vm5, %v5307_v13, %v2841_v28  ;;  %v2840_v51 = vmul.f32 %v3264_v22, %v3248_v25 }
 0xb0c   :  { %2858 = vst [vmem:[%s5400_s16 + $0x28] sm:$0xff] %v2850_v58 }
 0xb0d   :  { %v2849_v44 = vsel %vm2844_vm5, %v5304_v8, %v2840_v51 }
 0xb0e   :  { %2857 = vst [vmem:[%s5400_s16 + $0x20] sm:$0xff] %v2849_v44 }
 0xb8a   :  { %v2827_v43 = vpop.xlane.xlu0 %2826 }
 0xb8b   :  { %3265 = vrcp.f32 %v2827_v43 }
 0xb8c   :  { %v2825_v60 = vpop.xlane.xlu1 %2824 }
 0xb8d   :  { %3267 = vrcp.f32 %v2825_v60 }
 0xb98   :  { %v3266_v56 = vpop.eup %3265 }
 0xb99   :  { %v2843_v33 = vmul.f32 %v3266_v56, %v3250_v55 }
 0xb9a   :  { %v3268_v13 = vpop.eup %3267 }
 0xb9b   :  { %v2852_v19 = vsel %vm2844_vm5, %v5322_v45, %v2843_v33  ;;  %v2842_v63 = vmul.f32 %v3268_v13, %v3254_v50 }
 0xb9c   :  { %2860 = vst [vmem:[%s5400_s16 + $0x38] sm:$0xff] %v2852_v19 }
 0xb9d   :  { %v2851_v8 = vsel %vm2844_vm5, %v5325_v4, %v2842_v63 }
 0xb9e   :  { %2859 = vst [vmem:[%s5400_s16 + $0x30] sm:$0xff] %v2851_v8 }

</bundles_post_ra>
